<compile_context>
chip_gen: v6e
topology: v6e:2x2x1
jax: 0.10.0
libtpu: 0.0.40
codegen_flags: <defaults>
</compile_context>

<pallas_src>
import functools

import numpy as np
import jax
import jax.numpy as jnp
from jax import lax
from jax.experimental import pallas as pl
from jax.experimental.pallas import tpu as pltpu

RATIO = 1.0 / np.sqrt(2.0)
KH = KW = 3  # conv kernel size


def _residual_conv_kernel(x_ref, w_ref, b_ref, o_ref, xp_ref, acc_ref, *, left):
    # x_ref  : (1, H, W, C)            un-padded input (conv input AND residual)
    # w_ref  : (KH*KW, C, C)           conv weights, one (Cin, Cout) matrix per tap
    # b_ref  : (1, C)                  conv bias (f32)
    # o_ref  : (1, H, W, C)            output block
    # xp_ref : (H+2, left+W+left, C)   VMEM padded copy of the input (compute dtype)
    # acc_ref: (H*W, C) f32            VMEM conv accumulator
    H = x_ref.shape[1]
    W = x_ref.shape[2]
    C = x_ref.shape[3]
    wpad = xp_ref.shape[1]
    cdt = xp_ref.dtype

    # --- border-only zeroing (every step => megacore-safe; interior is fully
    #     overwritten below, so no full-buffer clear) ---
    xp_ref[0:1, :, :] = jnp.zeros((1, wpad, C), cdt)            # top halo row
    xp_ref[H + 1:H + 2, :, :] = jnp.zeros((1, wpad, C), cdt)    # bottom halo row
    xp_ref[1:1 + H, 0:left, :] = jnp.zeros((H, left, C), cdt)   # left pad band
    xp_ref[1:1 + H, left + W:wpad, :] = jnp.zeros((H, wpad - left - W, C), cdt)

    # --- sublane-aligned interior copy (W offset `left` is a multiple of the
    #     sublane packing, so these are full-width unmasked stores) ---
    xp_ref[1:1 + H, left:left + W, :] = x_ref[0].astype(cdt)

    # --- 9 shifted-window matmuls accumulated into the f32 VMEM accumulator.
    #     kh shifts are major-dim slices (free); only the kw +/-1 shifts are
    #     sublane-misaligned reads.  No im2col buffer, no 9x-image writes. ---
    for kh in range(KH):
        for kw in range(KW):
            k = kh * KW + kw
            win = xp_ref[kh:kh + H, left - 1 + kw:left - 1 + kw + W, :]
            win = win.reshape(H * W, C)
            part = jnp.dot(win, w_ref[k], preferred_element_type=jnp.float32)
            if k == 0:
                acc_ref[...] = part
            else:
                acc_ref[...] += part

    # --- f32 epilogue: bias + residual + 1/sqrt(2) (ResidualBlock.forward) ---
    y = acc_ref[...].reshape(H, W, C) + b_ref[...].astype(jnp.float32)
    res = x_ref[0].astype(jnp.float32)
    out = (y + res) * RATIO
    o_ref[...] = out.astype(o_ref.dtype).reshape(1, H, W, C)


def _sublane_pack(dtype) -> int:
    """Sublane packing factor (rows per vreg sublane group) for a dtype."""
    return 8 * max(1, 4 // np.dtype(dtype).itemsize)   # f32: 8, bf16: 16


def _padded_vmem_bytes(shape, dtype) -> int:
    """Conservative VMEM footprint of one buffer incl. tile padding."""
    shape = tuple(int(s) for s in shape)
    if len(shape) == 1:
        shape = (1,) + shape
    itemsize = np.dtype(dtype).itemsize
    pack = _sublane_pack(dtype)
    *major, sub, lane = shape
    sub_p = -(-sub // pack) * pack
    lane_p = -(-lane // 128) * 128
    n_major = 1
    for m in major:
        n_major *= m
    return n_major * sub_p * lane_p * itemsize


def _vmem_capacity_bytes() -> int:
    """Per-core VMEM capacity; conservative fallback if the query is unavailable."""
    try:
        info = pltpu.get_tpu_info()
        cap = getattr(info, "vmem_capacity_bytes", None)
        if cap:
            return int(cap)
    except Exception:
        pass
    return 64 << 20   # v7x-sized fallback (safe lower bound for v5e/v6e too)


def residual_block_nhwc(x_nhwc: jax.Array, w_hwio: jax.Array, b: jax.Array,
                        *, compute_dtype=None) -> jax.Array:
    """(conv3x3_same(x) + x) * (1/sqrt(2)); NHWC in / NHWC out (native layout).

    `compute_dtype=jnp.bfloat16` feeds the MXU bf16 operands (f32 accumulation
    and f32 epilogue kept) — recommended for production on v5e/v6e/v7x.
    """
    N, H, W, C = x_nhwc.shape
    dt = x_nhwc.dtype
    cdt = dt if compute_dtype is None else compute_dtype

    # One (Cin, Cout) weight matrix per tap, row order kh*KW + kw (matches HWIO).
    w_taps = w_hwio.reshape(KH * KW, C, C).astype(cdt)
    b2 = b.reshape(1, C).astype(jnp.float32)

    pack = _sublane_pack(cdt)
    left = pack                         # sublane-aligned interior W offset
    wpad = left + W + pack              # left pad band + image + right pad band

    # Per-step VMEM footprint: double-buffered in/out blocks + weights/bias
    # + the padded-input scratch + the f32 accumulator.
    per_step = (
        2 * _padded_vmem_bytes((1, H, W, C), dt)          # input block (x2 buffers)
        + 2 * _padded_vmem_bytes((1, H, W, C), dt)        # output block (x2 buffers)
        + 2 * _padded_vmem_bytes((KH * KW, C, C), cdt)    # weights (x2 buffers)
        + 2 * _padded_vmem_bytes((1, C), jnp.float32)     # bias (x2 buffers)
        + _padded_vmem_bytes((H + 2, wpad, C), cdt)       # padded-input scratch
        + _padded_vmem_bytes((H * W, C), jnp.float32)     # conv accumulator
    )
    cap = _vmem_capacity_bytes()
    usable = (cap * 3) // 4             # leave headroom for compiler-internal scratch
    if per_step > usable:
        raise ValueError(
            f"ResidualBlock per-step VMEM footprint ({per_step / 2**20:.1f} MiB) exceeds "
            f"the usable VMEM budget ({usable / 2**20:.1f} MiB); add a spatial row-tile "
            "grid axis with a 2-row halo for this feature-map size.")
    vmem_limit = int(min(max((per_step * 5) // 4, 16 << 20), usable))

    kernel = functools.partial(_residual_conv_kernel, left=left)

    return pl.pallas_call(
        kernel,
        out_shape=jax.ShapeDtypeStruct((N, H, W, C), dt),
        grid_spec=pltpu.PrefetchScalarGridSpec(
            num_scalar_prefetch=0,
            grid=(N,),
            in_specs=[
                pl.BlockSpec((1, H, W, C), lambda n: (n, 0, 0, 0)),
                pl.BlockSpec((KH * KW, C, C), lambda n: (0, 0, 0)),
                pl.BlockSpec((1, C), lambda n: (0, 0)),
            ],
            out_specs=pl.BlockSpec((1, H, W, C), lambda n: (n, 0, 0, 0)),
            scratch_shapes=[
                pltpu.VMEM((H + 2, wpad, C), cdt),        # padded input (halo)
                pltpu.VMEM((H * W, C), jnp.float32),      # conv accumulator
            ],
        ),
        compiler_params=pltpu.CompilerParams(
            dimension_semantics=("parallel",),
            vmem_limit_bytes=vmem_limit,
        ),
    )(x_nhwc, w_taps, b2)


def residual_block(x_nchw: jax.Array, w_hwio: jax.Array, b: jax.Array,
                   *, compute_dtype=None) -> jax.Array:
    """NCHW interface matching the PyTorch module.

    In a full model, keep activations NHWC end-to-end and call
    `residual_block_nhwc` directly — these transposes only exist so the
    standalone test matches PyTorch's NCHW convention.
    """
    x = jnp.transpose(x_nchw, (0, 2, 3, 1))                   # NCHW -> NHWC
    out_nhwc = residual_block_nhwc(x, w_hwio, b, compute_dtype=compute_dtype)
    return jnp.transpose(out_nhwc, (0, 3, 1, 2))              # NHWC -> NCHW


def _reference(x_nchw, w_hwio, b):
    # Pure-JAX reference: conv2d (SAME padding) + bias + residual + scale.
    y = lax.conv_general_dilated(
        x_nchw, w_hwio,
        window_strides=(1, 1), padding="SAME",
        dimension_numbers=("NCHW", "HWIO", "NCHW"),
    )
    y = y + b.reshape(1, -1, 1, 1)
    return (y + x_nchw) * RATIO


if __name__ == "__main__":
    key = jax.random.PRNGKey(0)
    k_x, k_w, k_b = jax.random.split(key, 3)

    N, C, H, W = 2, 4, 16, 16
    x = jax.random.normal(k_x, (N, C, H, W), dtype=jnp.float32)
    # Deterministic conv parameters (fan-in scaled), HWIO layout.
    fan_in = C * KH * KW
    w = jax.random.normal(k_w, (KH, KW, C, C), dtype=jnp.float32) / np.sqrt(fan_in)
    b = jax.random.normal(k_b, (C,), dtype=jnp.float32) * 0.1

    ref = _reference(x, w, b)

    # f32 path: bit-level match expectations vs the XLA conv reference.
    out = jax.block_until_ready(residual_block(x, w, b))
    assert out.shape == (N, C, H, W)
    assert jnp.allclose(out, ref, atol=1e-4, rtol=1e-4), "f32 mismatch vs reference"

    # bf16 MXU-operand path (production setting): loose tolerance, f32 epilogue.
    out_bf16 = jax.block_until_ready(
        residual_block(x, w, b, compute_dtype=jnp.bfloat16))
    assert jnp.allclose(out_bf16, ref, atol=1e-1, rtol=5e-2), "bf16 mismatch vs reference"

    print("KERNEL_OK")
</pallas_src>

<mosaic_0001>
module attributes {stable_mosaic.version = 11 : i64} {
  func.func @_residual_conv_kernel(%arg0: i32, %arg1: memref<1x16x16x4xf32, #tpu.memory_space<vmem>>, %arg2: memref<9x4x4xf32, #tpu.memory_space<vmem>>, %arg3: memref<1x4xf32, #tpu.memory_space<vmem>>, %arg4: memref<1x16x16x4xf32, #tpu.memory_space<vmem>>, %arg5: memref<18x32x4xf32, #tpu.memory_space<vmem>>, %arg6: memref<256x4xf32, #tpu.memory_space<vmem>>) attributes {dimension_semantics = [#tpu.dimension_semantics<parallel>], iteration_bounds = array<i64: 2>, scalar_prefetch = 0 : i64, scratch_operands = 2 : i64, tpu.core_type = #tpu.core_type<tc>, window_params = [{transform_indices = @transform_0, window_bounds = array<i64: 1, 16, 16, 4>}, {pipeline_mode = #tpu.pipeline_mode<synchronous>, transform_indices = @transform_1, window_bounds = array<i64: 9, 4, 4>}, {pipeline_mode = #tpu.pipeline_mode<synchronous>, transform_indices = @transform_2, window_bounds = array<i64: 1, 4>}, {transform_indices = @transform_3, window_bounds = array<i64: 1, 16, 16, 4>}]} {
    %cst = arith.constant 0.000000e+00 : f32
    %0 = vector.broadcast %cst : f32 to vector<1x32x4xf32>
    %c0 = arith.constant 0 : index
    %c0_0 = arith.constant 0 : index
    %c0_1 = arith.constant 0 : index
    %1 = vector.load %arg5[%c0, %c0_0, %c0_1] : memref<18x32x4xf32, #tpu.memory_space<vmem>>, vector<1x32x4xf32>
    tpu.vector_store %arg5[%c0, %c0_0, %c0_1], %0 {strides = array<i32>} : memref<18x32x4xf32, #tpu.memory_space<vmem>>, vector<1x32x4xf32>,
    %cst_2 = arith.constant 0.000000e+00 : f32
    %2 = vector.broadcast %cst_2 : f32 to vector<1x32x4xf32>
    %c17 = arith.constant 17 : index
    %c0_3 = arith.constant 0 : index
    %c0_4 = arith.constant 0 : index
    %3 = vector.load %arg5[%c17, %c0_3, %c0_4] : memref<18x32x4xf32, #tpu.memory_space<vmem>>, vector<1x32x4xf32>
    tpu.vector_store %arg5[%c17, %c0_3, %c0_4], %2 {strides = array<i32>} : memref<18x32x4xf32, #tpu.memory_space<vmem>>, vector<1x32x4xf32>,
    %cst_5 = arith.constant 0.000000e+00 : f32
    %4 = vector.broadcast %cst_5 : f32 to vector<16x8x4xf32>
    %c1 = arith.constant 1 : index
    %c0_6 = arith.constant 0 : index
    %c0_7 = arith.constant 0 : index
    %5 = vector.load %arg5[%c1, %c0_6, %c0_7] : memref<18x32x4xf32, #tpu.memory_space<vmem>>, vector<16x8x4xf32>
    tpu.vector_store %arg5[%c1, %c0_6, %c0_7], %4 {strides = array<i32>} : memref<18x32x4xf32, #tpu.memory_space<vmem>>, vector<16x8x4xf32>,
    %cst_8 = arith.constant 0.000000e+00 : f32
    %6 = vector.broadcast %cst_8 : f32 to vector<16x8x4xf32>
    %c1_9 = arith.constant 1 : index
    %c24 = arith.constant 24 : index
    %c0_10 = arith.constant 0 : index
    %7 = vector.load %arg5[%c1_9, %c24, %c0_10] : memref<18x32x4xf32, #tpu.memory_space<vmem>>, vector<16x8x4xf32>
    tpu.vector_store %arg5[%c1_9, %c24, %c0_10], %6 {strides = array<i32>} : memref<18x32x4xf32, #tpu.memory_space<vmem>>, vector<16x8x4xf32>,
    %c0_11 = arith.constant 0 : index
    %c0_12 = arith.constant 0 : index
    %c0_13 = arith.constant 0 : index
    %c0_14 = arith.constant 0 : index
    %8 = vector.load %arg1[%c0_11, %c0_12, %c0_13, %c0_14] : memref<1x16x16x4xf32, #tpu.memory_space<vmem>>, vector<1x16x16x4xf32>
    %9 = vector.shape_cast %8 : vector<1x16x16x4xf32> to vector<16x16x4xf32>
    %c1_15 = arith.constant 1 : index
    %c8 = arith.constant 8 : index
    %c0_16 = arith.constant 0 : index
    %10 = vector.load %arg5[%c1_15, %c8, %c0_16] : memref<18x32x4xf32, #tpu.memory_space<vmem>>, vector<16x16x4xf32>
    tpu.vector_store %arg5[%c1_15, %c8, %c0_16], %9 {strides = array<i32>} : memref<18x32x4xf32, #tpu.memory_space<vmem>>, vector<16x16x4xf32>,
    %c0_17 = arith.constant 0 : index
    %c7 = arith.constant 7 : index
    %c0_18 = arith.constant 0 : index
    %11 = vector.load %arg5[%c0_17, %c7, %c0_18] : memref<18x32x4xf32, #tpu.memory_space<vmem>>, vector<16x16x4xf32>
    %12 = vector.shape_cast %11 : vector<16x16x4xf32> to vector<256x4xf32>
    %c0_19 = arith.constant 0 : index
    %c0_20 = arith.constant 0 : index
    %c0_21 = arith.constant 0 : index
    %13 = vector.load %arg2[%c0_19, %c0_20, %c0_21] : memref<9x4x4xf32, #tpu.memory_space<vmem>>, vector<1x4x4xf32>
    %14 = vector.shape_cast %13 : vector<1x4x4xf32> to vector<4x4xf32>
    %cst_22 = arith.constant dense<0.000000e+00> : vector<256x4xf32>
    %15 = tpu.matmul %12, %14, %cst_22 {dimension_numbers = #tpu.dot_dimension_numbers<[1], [0], [0], [1], [0, 0, 1, 1], [], []>} : vector<256x4xf32>, vector<4x4xf32>, vector<256x4xf32> -> vector<256x4xf32>
    %c0_23 = arith.constant 0 : index
    %c0_24 = arith.constant 0 : index
    %16 = vector.load %arg6[%c0_23, %c0_24] : memref<256x4xf32, #tpu.memory_space<vmem>>, vector<256x4xf32>
    tpu.vector_store %arg6[%c0_23, %c0_24], %15 {strides = array<i32>} : memref<256x4xf32, #tpu.memory_space<vmem>>, vector<256x4xf32>,
    %c0_25 = arith.constant 0 : index
    %c8_26 = arith.constant 8 : index
    %c0_27 = arith.constant 0 : index
    %17 = vector.load %arg5[%c0_25, %c8_26, %c0_27] : memref<18x32x4xf32, #tpu.memory_space<vmem>>, vector<16x16x4xf32>
    %18 = vector.shape_cast %17 : vector<16x16x4xf32> to vector<256x4xf32>
    %c1_28 = arith.constant 1 : index
    %c0_29 = arith.constant 0 : index
    %c0_30 = arith.constant 0 : index
    %19 = vector.load %arg2[%c1_28, %c0_29, %c0_30] : memref<9x4x4xf32, #tpu.memory_space<vmem>>, vector<1x4x4xf32>
    %20 = vector.shape_cast %19 : vector<1x4x4xf32> to vector<4x4xf32>
    %cst_31 = arith.constant dense<0.000000e+00> : vector<256x4xf32>
    %21 = tpu.matmul %18, %20, %cst_31 {dimension_numbers = #tpu.dot_dimension_numbers<[1], [0], [0], [1], [0, 0, 1, 1], [], []>} : vector<256x4xf32>, vector<4x4xf32>, vector<256x4xf32> -> vector<256x4xf32>
    %c0_32 = arith.constant 0 : index
    %c0_33 = arith.constant 0 : index
    %22 = vector.load %arg6[%c0_32, %c0_33] : memref<256x4xf32, #tpu.memory_space<vmem>>, vector<256x4xf32>
    %23 = arith.addf %22, %21 : vector<256x4xf32>
    %c0_34 = arith.constant 0 : index
    %c0_35 = arith.constant 0 : index
    %24 = vector.load %arg6[%c0_34, %c0_35] : memref<256x4xf32, #tpu.memory_space<vmem>>, vector<256x4xf32>
    tpu.vector_store %arg6[%c0_34, %c0_35], %23 {strides = array<i32>} : memref<256x4xf32, #tpu.memory_space<vmem>>, vector<256x4xf32>,
    %c0_36 = arith.constant 0 : index
    %c9 = arith.constant 9 : index
    %c0_37 = arith.constant 0 : index
    %25 = vector.load %arg5[%c0_36, %c9, %c0_37] : memref<18x32x4xf32, #tpu.memory_space<vmem>>, vector<16x16x4xf32>
    %26 = vector.shape_cast %25 : vector<16x16x4xf32> to vector<256x4xf32>
    %c2 = arith.constant 2 : index
    %c0_38 = arith.constant 0 : index
    %c0_39 = arith.constant 0 : index
    %27 = vector.load %arg2[%c2, %c0_38, %c0_39] : memref<9x4x4xf32, #tpu.memory_space<vmem>>, vector<1x4x4xf32>
    %28 = vector.shape_cast %27 : vector<1x4x4xf32> to vector<4x4xf32>
    %cst_40 = arith.constant dense<0.000000e+00> : vector<256x4xf32>
    %29 = tpu.matmul %26, %28, %cst_40 {dimension_numbers = #tpu.dot_dimension_numbers<[1], [0], [0], [1], [0, 0, 1, 1], [], []>} : vector<256x4xf32>, vector<4x4xf32>, vector<256x4xf32> -> vector<256x4xf32>
    %c0_41 = arith.constant 0 : index
    %c0_42 = arith.constant 0 : index
    %30 = vector.load %arg6[%c0_41, %c0_42] : memref<256x4xf32, #tpu.memory_space<vmem>>, vector<256x4xf32>
    %31 = arith.addf %30, %29 : vector<256x4xf32>
    %c0_43 = arith.constant 0 : index
    %c0_44 = arith.constant 0 : index
    %32 = vector.load %arg6[%c0_43, %c0_44] : memref<256x4xf32, #tpu.memory_space<vmem>>, vector<256x4xf32>
    tpu.vector_store %arg6[%c0_43, %c0_44], %31 {strides = array<i32>} : memref<256x4xf32, #tpu.memory_space<vmem>>, vector<256x4xf32>,
    %c1_45 = arith.constant 1 : index
    %c7_46 = arith.constant 7 : index
    %c0_47 = arith.constant 0 : index
    %33 = vector.load %arg5[%c1_45, %c7_46, %c0_47] : memref<18x32x4xf32, #tpu.memory_space<vmem>>, vector<16x16x4xf32>
    %34 = vector.shape_cast %33 : vector<16x16x4xf32> to vector<256x4xf32>
    %c3 = arith.constant 3 : index
    %c0_48 = arith.constant 0 : index
    %c0_49 = arith.constant 0 : index
    %35 = vector.load %arg2[%c3, %c0_48, %c0_49] : memref<9x4x4xf32, #tpu.memory_space<vmem>>, vector<1x4x4xf32>
    %36 = vector.shape_cast %35 : vector<1x4x4xf32> to vector<4x4xf32>
    %cst_50 = arith.constant dense<0.000000e+00> : vector<256x4xf32>
    %37 = tpu.matmul %34, %36, %cst_50 {dimension_numbers = #tpu.dot_dimension_numbers<[1], [0], [0], [1], [0, 0, 1, 1], [], []>} : vector<256x4xf32>, vector<4x4xf32>, vector<256x4xf32> -> vector<256x4xf32>
    %c0_51 = arith.constant 0 : index
    %c0_52 = arith.constant 0 : index
    %38 = vector.load %arg6[%c0_51, %c0_52] : memref<256x4xf32, #tpu.memory_space<vmem>>, vector<256x4xf32>
    %39 = arith.addf %38, %37 : vector<256x4xf32>
    %c0_53 = arith.constant 0 : index
    %c0_54 = arith.constant 0 : index
    %40 = vector.load %arg6[%c0_53, %c0_54] : memref<256x4xf32, #tpu.memory_space<vmem>>, vector<256x4xf32>
    tpu.vector_store %arg6[%c0_53, %c0_54], %39 {strides = array<i32>} : memref<256x4xf32, #tpu.memory_space<vmem>>, vector<256x4xf32>,
    %c1_55 = arith.constant 1 : index
    %c8_56 = arith.constant 8 : index
    %c0_57 = arith.constant 0 : index
    %41 = vector.load %arg5[%c1_55, %c8_56, %c0_57] : memref<18x32x4xf32, #tpu.memory_space<vmem>>, vector<16x16x4xf32>
    %42 = vector.shape_cast %41 : vector<16x16x4xf32> to vector<256x4xf32>
    %c4 = arith.constant 4 : index
    %c0_58 = arith.constant 0 : index
    %c0_59 = arith.constant 0 : index
    %43 = vector.load %arg2[%c4, %c0_58, %c0_59] : memref<9x4x4xf32, #tpu.memory_space<vmem>>, vector<1x4x4xf32>
    %44 = vector.shape_cast %43 : vector<1x4x4xf32> to vector<4x4xf32>
    %cst_60 = arith.constant dense<0.000000e+00> : vector<256x4xf32>
    %45 = tpu.matmul %42, %44, %cst_60 {dimension_numbers = #tpu.dot_dimension_numbers<[1], [0], [0], [1], [0, 0, 1, 1], [], []>} : vector<256x4xf32>, vector<4x4xf32>, vector<256x4xf32> -> vector<256x4xf32>
    %c0_61 = arith.constant 0 : index
    %c0_62 = arith.constant 0 : index
    %46 = vector.load %arg6[%c0_61, %c0_62] : memref<256x4xf32, #tpu.memory_space<vmem>>, vector<256x4xf32>
    %47 = arith.addf %46, %45 : vector<256x4xf32>
    %c0_63 = arith.constant 0 : index
    %c0_64 = arith.constant 0 : index
    %48 = vector.load %arg6[%c0_63, %c0_64] : memref<256x4xf32, #tpu.memory_space<vmem>>, vector<256x4xf32>
    tpu.vector_store %arg6[%c0_63, %c0_64], %47 {strides = array<i32>} : memref<256x4xf32, #tpu.memory_space<vmem>>, vector<256x4xf32>,
    %c1_65 = arith.constant 1 : index
    %c9_66 = arith.constant 9 : index
    %c0_67 = arith.constant 0 : index
    %49 = vector.load %arg5[%c1_65, %c9_66, %c0_67] : memref<18x32x4xf32, #tpu.memory_space<vmem>>, vector<16x16x4xf32>
    %50 = vector.shape_cast %49 : vector<16x16x4xf32> to vector<256x4xf32>
    %c5 = arith.constant 5 : index
    %c0_68 = arith.constant 0 : index
    %c0_69 = arith.constant 0 : index
    %51 = vector.load %arg2[%c5, %c0_68, %c0_69] : memref<9x4x4xf32, #tpu.memory_space<vmem>>, vector<1x4x4xf32>
    %52 = vector.shape_cast %51 : vector<1x4x4xf32> to vector<4x4xf32>
    %cst_70 = arith.constant dense<0.000000e+00> : vector<256x4xf32>
    %53 = tpu.matmul %50, %52, %cst_70 {dimension_numbers = #tpu.dot_dimension_numbers<[1], [0], [0], [1], [0, 0, 1, 1], [], []>} : vector<256x4xf32>, vector<4x4xf32>, vector<256x4xf32> -> vector<256x4xf32>
    %c0_71 = arith.constant 0 : index
    %c0_72 = arith.constant 0 : index
    %54 = vector.load %arg6[%c0_71, %c0_72] : memref<256x4xf32, #tpu.memory_space<vmem>>, vector<256x4xf32>
    %55 = arith.addf %54, %53 : vector<256x4xf32>
    %c0_73 = arith.constant 0 : index
    %c0_74 = arith.constant 0 : index
    %56 = vector.load %arg6[%c0_73, %c0_74] : memref<256x4xf32, #tpu.memory_space<vmem>>, vector<256x4xf32>
    tpu.vector_store %arg6[%c0_73, %c0_74], %55 {strides = array<i32>} : memref<256x4xf32, #tpu.memory_space<vmem>>, vector<256x4xf32>,
    %c2_75 = arith.constant 2 : index
    %c7_76 = arith.constant 7 : index
    %c0_77 = arith.constant 0 : index
    %57 = vector.load %arg5[%c2_75, %c7_76, %c0_77] : memref<18x32x4xf32, #tpu.memory_space<vmem>>, vector<16x16x4xf32>
    %58 = vector.shape_cast %57 : vector<16x16x4xf32> to vector<256x4xf32>
    %c6 = arith.constant 6 : index
    %c0_78 = arith.constant 0 : index
    %c0_79 = arith.constant 0 : index
    %59 = vector.load %arg2[%c6, %c0_78, %c0_79] : memref<9x4x4xf32, #tpu.memory_space<vmem>>, vector<1x4x4xf32>
    %60 = vector.shape_cast %59 : vector<1x4x4xf32> to vector<4x4xf32>
    %cst_80 = arith.constant dense<0.000000e+00> : vector<256x4xf32>
    %61 = tpu.matmul %58, %60, %cst_80 {dimension_numbers = #tpu.dot_dimension_numbers<[1], [0], [0], [1], [0, 0, 1, 1], [], []>} : vector<256x4xf32>, vector<4x4xf32>, vector<256x4xf32> -> vector<256x4xf32>
    %c0_81 = arith.constant 0 : index
    %c0_82 = arith.constant 0 : index
    %62 = vector.load %arg6[%c0_81, %c0_82] : memref<256x4xf32, #tpu.memory_space<vmem>>, vector<256x4xf32>
    %63 = arith.addf %62, %61 : vector<256x4xf32>
    %c0_83 = arith.constant 0 : index
    %c0_84 = arith.constant 0 : index
    %64 = vector.load %arg6[%c0_83, %c0_84] : memref<256x4xf32, #tpu.memory_space<vmem>>, vector<256x4xf32>
    tpu.vector_store %arg6[%c0_83, %c0_84], %63 {strides = array<i32>} : memref<256x4xf32, #tpu.memory_space<vmem>>, vector<256x4xf32>,
    %c2_85 = arith.constant 2 : index
    %c8_86 = arith.constant 8 : index
    %c0_87 = arith.constant 0 : index
    %65 = vector.load %arg5[%c2_85, %c8_86, %c0_87] : memref<18x32x4xf32, #tpu.memory_space<vmem>>, vector<16x16x4xf32>
    %66 = vector.shape_cast %65 : vector<16x16x4xf32> to vector<256x4xf32>
    %c7_88 = arith.constant 7 : index
    %c0_89 = arith.constant 0 : index
    %c0_90 = arith.constant 0 : index
    %67 = vector.load %arg2[%c7_88, %c0_89, %c0_90] : memref<9x4x4xf32, #tpu.memory_space<vmem>>, vector<1x4x4xf32>
    %68 = vector.shape_cast %67 : vector<1x4x4xf32> to vector<4x4xf32>
    %cst_91 = arith.constant dense<0.000000e+00> : vector<256x4xf32>
    %69 = tpu.matmul %66, %68, %cst_91 {dimension_numbers = #tpu.dot_dimension_numbers<[1], [0], [0], [1], [0, 0, 1, 1], [], []>} : vector<256x4xf32>, vector<4x4xf32>, vector<256x4xf32> -> vector<256x4xf32>
    %c0_92 = arith.constant 0 : index
    %c0_93 = arith.constant 0 : index
    %70 = vector.load %arg6[%c0_92, %c0_93] : memref<256x4xf32, #tpu.memory_space<vmem>>, vector<256x4xf32>
    %71 = arith.addf %70, %69 : vector<256x4xf32>
    %c0_94 = arith.constant 0 : index
    %c0_95 = arith.constant 0 : index
    %72 = vector.load %arg6[%c0_94, %c0_95] : memref<256x4xf32, #tpu.memory_space<vmem>>, vector<256x4xf32>
    tpu.vector_store %arg6[%c0_94, %c0_95], %71 {strides = array<i32>} : memref<256x4xf32, #tpu.memory_space<vmem>>, vector<256x4xf32>,
    %c2_96 = arith.constant 2 : index
    %c9_97 = arith.constant 9 : index
    %c0_98 = arith.constant 0 : index
    %73 = vector.load %arg5[%c2_96, %c9_97, %c0_98] : memref<18x32x4xf32, #tpu.memory_space<vmem>>, vector<16x16x4xf32>
    %74 = vector.shape_cast %73 : vector<16x16x4xf32> to vector<256x4xf32>
    %c8_99 = arith.constant 8 : index
    %c0_100 = arith.constant 0 : index
    %c0_101 = arith.constant 0 : index
    %75 = vector.load %arg2[%c8_99, %c0_100, %c0_101] : memref<9x4x4xf32, #tpu.memory_space<vmem>>, vector<1x4x4xf32>
    %76 = vector.shape_cast %75 : vector<1x4x4xf32> to vector<4x4xf32>
    %cst_102 = arith.constant dense<0.000000e+00> : vector<256x4xf32>
    %77 = tpu.matmul %74, %76, %cst_102 {dimension_numbers = #tpu.dot_dimension_numbers<[1], [0], [0], [1], [0, 0, 1, 1], [], []>} : vector<256x4xf32>, vector<4x4xf32>, vector<256x4xf32> -> vector<256x4xf32>
    %c0_103 = arith.constant 0 : index
    %c0_104 = arith.constant 0 : index
    %78 = vector.load %arg6[%c0_103, %c0_104] : memref<256x4xf32, #tpu.memory_space<vmem>>, vector<256x4xf32>
    %79 = arith.addf %78, %77 : vector<256x4xf32>
    %c0_105 = arith.constant 0 : index
    %c0_106 = arith.constant 0 : index
    %80 = vector.load %arg6[%c0_105, %c0_106] : memref<256x4xf32, #tpu.memory_space<vmem>>, vector<256x4xf32>
    tpu.vector_store %arg6[%c0_105, %c0_106], %79 {strides = array<i32>} : memref<256x4xf32, #tpu.memory_space<vmem>>, vector<256x4xf32>,
    %c0_107 = arith.constant 0 : index
    %c0_108 = arith.constant 0 : index
    %81 = vector.load %arg6[%c0_107, %c0_108] : memref<256x4xf32, #tpu.memory_space<vmem>>, vector<256x4xf32>
    %82 = vector.shape_cast %81 : vector<256x4xf32> to vector<16x16x4xf32>
    %c0_109 = arith.constant 0 : index
    %c0_110 = arith.constant 0 : index
    %83 = vector.load %arg3[%c0_109, %c0_110] : memref<1x4xf32, #tpu.memory_space<vmem>>, vector<1x4xf32>
    %84 = vector.shape_cast %83 : vector<1x4xf32> to vector<1x1x4xf32>
    %85 = vector.broadcast %84 : vector<1x1x4xf32> to vector<16x16x4xf32>
    %86 = arith.addf %82, %85 : vector<16x16x4xf32>
    %c0_111 = arith.constant 0 : index
    %c0_112 = arith.constant 0 : index
    %c0_113 = arith.constant 0 : index
    %c0_114 = arith.constant 0 : index
    %87 = vector.load %arg1[%c0_111, %c0_112, %c0_113, %c0_114] : memref<1x16x16x4xf32, #tpu.memory_space<vmem>>, vector<1x16x16x4xf32>
    %88 = vector.shape_cast %87 : vector<1x16x16x4xf32> to vector<16x16x4xf32>
    %89 = arith.addf %86, %88 : vector<16x16x4xf32>
    %cst_115 = arith.constant 0.707106769 : f32
    %90 = vector.broadcast %cst_115 : f32 to vector<16x16x4xf32>
    %91 = arith.mulf %89, %90 : vector<16x16x4xf32>
    %92 = vector.shape_cast %91 : vector<16x16x4xf32> to vector<1x16x16x4xf32>
    %c0_116 = arith.constant 0 : index
    %c0_117 = arith.constant 0 : index
    %c0_118 = arith.constant 0 : index
    %c0_119 = arith.constant 0 : index
    %93 = vector.load %arg4[%c0_116, %c0_117, %c0_118, %c0_119] : memref<1x16x16x4xf32, #tpu.memory_space<vmem>>, vector<1x16x16x4xf32>
    tpu.vector_store %arg4[%c0_116, %c0_117, %c0_118, %c0_119], %92 {strides = array<i32>} : memref<1x16x16x4xf32, #tpu.memory_space<vmem>>, vector<1x16x16x4xf32>,
    return
  }
  func.func @transform_0(%arg0: i32) -> (i32, i32, i32, i32) {
    %c0_i32 = arith.constant 0 : i32
    %c0_i32_0 = arith.constant 0 : i32
    %c0_i32_1 = arith.constant 0 : i32
    %c0_i32_2 = arith.constant 0 : i32
    return %arg0, %c0_i32, %c0_i32_0, %c0_i32_1 : i32, i32, i32, i32
  }
  func.func @transform_1(%arg0: i32) -> (i32, i32, i32) {
    %c0_i32 = arith.constant 0 : i32
    %c0_i32_0 = arith.constant 0 : i32
    %c0_i32_1 = arith.constant 0 : i32
    %c0_i32_2 = arith.constant 0 : i32
    return %c0_i32, %c0_i32_0, %c0_i32_1 : i32, i32, i32
  }
  func.func @transform_2(%arg0: i32) -> (i32, i32) {
    %c0_i32 = arith.constant 0 : i32
    %c0_i32_0 = arith.constant 0 : i32
    %c0_i32_1 = arith.constant 0 : i32
    return %c0_i32, %c0_i32_0 : i32, i32
  }
  func.func @transform_3(%arg0: i32) -> (i32, i32, i32, i32) {
    %c0_i32 = arith.constant 0 : i32
    %c0_i32_0 = arith.constant 0 : i32
    %c0_i32_1 = arith.constant 0 : i32
    %c0_i32_2 = arith.constant 0 : i32
    return %arg0, %c0_i32, %c0_i32_0, %c0_i32_1 : i32, i32, i32, i32
  }
}

</mosaic_0001>

<bundles_post_ra>
// kernel: tpu_custom_call.1
= control target key start
LH: loop header
LB: loop body
LE: loop exit
PB: predicated region body
PF: predicated region fallthrough
CT: control target
= control target key end

     0   :  { %s5661_s12 = smov 0   ;;  %s7130_s0 = inlined_call_operand.vmem [shape: f32[2,16,16,4], index: 0, kind: input, shape index: {}]   ;;  %s7131_s1 = inlined_call_operand.vmem [shape: f32[9,4,4], index: 1, kind: input, shape index: {}]   ;;  %s7132_s2 = inlined_call_operand.vmem [shape: f32[1,4], index: 2, kind: input, shape index: {}]   ;;  %s7133_s3 = inlined_call_operand.vmem [shape: f32[2,16,16,4], index: 3, kind: output, shape index: {}]  }
   0x1 LB: > { %s4555_s13 = sadd.s32 4294967295, %s5638_s12   ;;  %p4559_p0 = scmp.ge.s32.totalorder %s5638_s12, 1  ;;  %s5638_s12 = sphi %s5661_s12, %s13_s12  }
   0x2   : > { %p137_p1 = scmp.lt.s32.totalorder %s5638_s12, 3 }
   0x4   : > { %p138_p2 = pnand %p4559_p0, %p137_p1 }
   0x6   : > { %141 = sbr.rel (%p138_p2) target bundleno = 548 (0x224), region = 32 }
   0xb   : > { %v310_v0 = vld [vmem:[%s7131_s1] sm:$0xf]  ;;  %vm407_vm0 = vcmask 1043456   ;;  %p5674_p3 = scmp.lt.s32.totalorder %s4555_s13, 1  ;;  %vm171_vm1 = vcmask 31744   ;;  %v5640_v1 = vmov 0.0  }
   0xc   : > { %5621 = vmatprep.subr.msk.mxu1 %vm407_vm0, %v310_v0  ;;  %189 = vst.msk [vmem:[#allocation2 + $0x100] sm:$0xff] %vm171_vm1, %v5640_v1  ;;  %172 = vst.msk [vmem:[#allocation2] sm:$0xff] %vm171_vm1, %v5640_v1  ;;  %v5722_v2 = vld [vmem:[%s7131_s1 + $0x4] sm:$0xf]  ;;  %5171 = vmatprep.subr.msk.mxu0 %vm407_vm0, %v310_v0  ;;  %v4631_v3 = vld [vmem:[%s7131_s1 + $0x8] sm:$0xf] }
   0xd   : > { %173 = vst.msk [vmem:[#allocation2 + $0x8] sm:$0xff] %vm171_vm1, %v5640_v1  ;;  %174 = vst.msk [vmem:[#allocation2 + $0x10] sm:$0xff] %vm171_vm1, %v5640_v1  ;;  %5622 = vmatpush3.msk.msra.mxu1 %vm407_vm0, %v310_v0  ;;  %s7231_s13 = smov (!%p5674_p3, %s4555_s13), 1  ;;  %5172 = vmatpush3.msk.msra.mxu0 %vm407_vm0, %v310_v0  ;;  %v5759_v10 = vld [vmem:[%s7131_s1 + $0x10] sm:$0xf] }
   0xe   : > { %175 = vst.msk [vmem:[#allocation2 + $0x18] sm:$0xff] %vm171_vm1, %v5640_v1  ;;  %177 = vst.msk [vmem:[#allocation2 + $0x220] sm:$0xff] %vm171_vm1, %v5640_v1  ;;  %5221 = vmatprep.subr.msk.mxu1 %vm407_vm0, %v5722_v2  ;;  %5271 = vmatprep.subr.msk.mxu0 %vm407_vm0, %v4631_v3  ;;  %s4872_s21 = sshll.u32 %s7231_s13, 8  ;;  %v5812_v32 = vld [vmem:[%s7131_s1 + $0xc] sm:$0xf] }
   0xf   : > { %178 = vst.msk [vmem:[#allocation2 + $0x228] sm:$0xff] %vm171_vm1, %v5640_v1  ;;  %179 = vst.msk [vmem:[#allocation2 + $0x230] sm:$0xff] %vm171_vm1, %v5640_v1  ;;  %s5745_s24 = scalar_lea.vmem %s7130_s0, %s4872_s21  ;;  %s6907_s16 = scalar_lea.vmem %s7133_s3, %s4872_s21 }
  0x10   : > { %180 = vst.msk [vmem:[#allocation2 + $0x238] sm:$0xff] %vm171_vm1, %v5640_v1  ;;  %182 = vst.msk [vmem:[#allocation2 + $0x20] sm:$0xff] %vm171_vm1, %v5640_v1  ;;  %v228_v4 = vld [vmem:[%s5745_s24 + $0x70] sm:$0xff]  ;;  %v229_v5 = vld [vmem:[%s5745_s24 + $0x78] sm:$0xff] }
  0x11   : > { %183 = vst.msk [vmem:[#allocation2 + $0x40] sm:$0xff] %vm171_vm1, %v5640_v1  ;;  %184 = vst.msk [vmem:[#allocation2 + $0x60] sm:$0xff] %vm171_vm1, %v5640_v1  ;;  %v230_v6 = vld [vmem:[%s5745_s24 + $0x80] sm:$0xff]  ;;  %v231_v7 = vld [vmem:[%s5745_s24 + $0x88] sm:$0xff] }
  0x12   : > { %185 = vst.msk [vmem:[#allocation2 + $0x80] sm:$0xff] %vm171_vm1, %v5640_v1  ;;  %186 = vst.msk [vmem:[#allocation2 + $0xa0] sm:$0xff] %vm171_vm1, %v5640_v1  ;;  %v232_v8 = vld [vmem:[%s5745_s24 + $0x90] sm:$0xff]  ;;  %v233_v9 = vld [vmem:[%s5745_s24 + $0x98] sm:$0xff] }
  0x13   : > { %187 = vst.msk [vmem:[#allocation2 + $0xc0] sm:$0xff] %vm171_vm1, %v5640_v1  ;;  %188 = vst.msk [vmem:[#allocation2 + $0xe0] sm:$0xff] %vm171_vm1, %v5640_v1  ;;  %v214_v13 = vld [vmem:[%s5745_s24] sm:$0xff]  ;;  %v215_v15 = vld [vmem:[%s5745_s24 + $0x8] sm:$0xff] }
  0x14   : > { %190 = vst.msk [vmem:[#allocation2 + $0x120] sm:$0xff] %vm171_vm1, %v5640_v1  ;;  %191 = vst.msk [vmem:[#allocation2 + $0x140] sm:$0xff] %vm171_vm1, %v5640_v1  ;;  %v278_v11 = vld [vmem:[#allocation2 + $0x7] sm:$0xff]  ;;  %v279_v12 = vld [vmem:[#allocation2 + $0xf] sm:$0xff] }
  0x15   : > { %192 = vst.msk [vmem:[#allocation2 + $0x160] sm:$0xff] %vm171_vm1, %v5640_v1  ;;  %193 = vst.msk [vmem:[#allocation2 + $0x180] sm:$0xff] %vm171_vm1, %v5640_v1  ;;  %5173 = vmatprep.mubr.msk.f32.mxu0 %vm171_vm1, %v278_v11  ;;  %v234_v14 = vld [vmem:[%s5745_s24 + $0xa0] sm:$0xff]  ;;  %v235_v16 = vld [vmem:[%s5745_s24 + $0xa8] sm:$0xff] }
  0x16   : > { %194 = vst.msk [vmem:[#allocation2 + $0x1a0] sm:$0xff] %vm171_vm1, %v5640_v1  ;;  %195 = vst.msk [vmem:[#allocation2 + $0x1c0] sm:$0xff] %vm171_vm1, %v5640_v1  ;;  %5174 = vmatmul.mubr.msk.f32.vlgmr.msra.gmra.mxu0 %vm171_vm1, %v279_v12  ;;  %v216_v17 = vld [vmem:[%s5745_s24 + $0x10] sm:$0xff]  ;;  %v217_v19 = vld [vmem:[%s5745_s24 + $0x18] sm:$0xff] }
  0x17   : > { %196 = vst.msk [vmem:[#allocation2 + $0x1e0] sm:$0xff] %vm171_vm1, %v5640_v1  ;;  %197 = vst.msk [vmem:[#allocation2 + $0x200] sm:$0xff] %vm171_vm1, %v5640_v1  ;;  %v236_v18 = vld [vmem:[%s5745_s24 + $0xb0] sm:$0xff]  ;;  %5272 = vmatpush3.msk.msra.mxu0 %vm407_vm0, %v4631_v3  ;;  %v237_v20 = vld [vmem:[%s5745_s24 + $0xb8] sm:$0xff] }
  0x18   : > { %198 = vst.msk [vmem:[#allocation2 + $0x38] sm:$0xff] %vm171_vm1, %v5640_v1  ;;  %199 = vst.msk [vmem:[#allocation2 + $0x58] sm:$0xff] %vm171_vm1, %v5640_v1  ;;  %v218_v21 = vld [vmem:[%s5745_s24 + $0x20] sm:$0xff]  ;;  %v219_v23 = vld [vmem:[%s5745_s24 + $0x28] sm:$0xff]  ;;  %5371 = vmatprep.subr.msk.mxu0 %vm407_vm0, %v5759_v10 }
  0x19   : > { %200 = vst.msk [vmem:[#allocation2 + $0x78] sm:$0xff] %vm171_vm1, %v5640_v1  ;;  %201 = vst.msk [vmem:[#allocation2 + $0x98] sm:$0xff] %vm171_vm1, %v5640_v1  ;;  %v238_v22 = vld [vmem:[%s5745_s24 + $0xc0] sm:$0xff]  ;;  %v239_v24 = vld [vmem:[%s5745_s24 + $0xc8] sm:$0xff] }
  0x1a   : > { %202 = vst.msk [vmem:[#allocation2 + $0xb8] sm:$0xff] %vm171_vm1, %v5640_v1  ;;  %203 = vst.msk [vmem:[#allocation2 + $0xd8] sm:$0xff] %vm171_vm1, %v5640_v1  ;;  %v220_v25 = vld [vmem:[%s5745_s24 + $0x30] sm:$0xff]  ;;  %v221_v27 = vld [vmem:[%s5745_s24 + $0x38] sm:$0xff] }
  0x1b   : > { %204 = vst.msk [vmem:[#allocation2 + $0xf8] sm:$0xff] %vm171_vm1, %v5640_v1  ;;  %205 = vst.msk [vmem:[#allocation2 + $0x118] sm:$0xff] %vm171_vm1, %v5640_v1  ;;  %v240_v26 = vld [vmem:[%s5745_s24 + $0xd0] sm:$0xff]  ;;  %v241_v28 = vld [vmem:[%s5745_s24 + $0xd8] sm:$0xff] }
  0x1c   : > { %206 = vst.msk [vmem:[#allocation2 + $0x138] sm:$0xff] %vm171_vm1, %v5640_v1  ;;  %207 = vst.msk [vmem:[#allocation2 + $0x158] sm:$0xff] %vm171_vm1, %v5640_v1  ;;  %v222_v34 = vld [vmem:[%s5745_s24 + $0x40] sm:$0xff]  ;;  %v223_v44 = vld [vmem:[%s5745_s24 + $0x48] sm:$0xff] }
  0x1d   : > { %208 = vst.msk [vmem:[#allocation2 + $0x178] sm:$0xff] %vm171_vm1, %v5640_v1  ;;  %209 = vst.msk [vmem:[#allocation2 + $0x198] sm:$0xff] %vm171_vm1, %v5640_v1  ;;  %v242_v35 = vld [vmem:[%s5745_s24 + $0xe0] sm:$0xff]  ;;  %v243_v45 = vld [vmem:[%s5745_s24 + $0xe8] sm:$0xff] }
  0x1e   : > { %210 = vst.msk [vmem:[#allocation2 + $0x1b8] sm:$0xff] %vm171_vm1, %v5640_v1  ;;  %211 = vst.msk [vmem:[#allocation2 + $0x1d8] sm:$0xff] %vm171_vm1, %v5640_v1  ;;  %v224_v46 = vld [vmem:[%s5745_s24 + $0x50] sm:$0xff]  ;;  %v225_v47 = vld [vmem:[%s5745_s24 + $0x58] sm:$0xff] }
  0x1f   : > { %212 = vst.msk [vmem:[#allocation2 + $0x1f8] sm:$0xff] %vm171_vm1, %v5640_v1  ;;  %213 = vst.msk [vmem:[#allocation2 + $0x218] sm:$0xff] %vm171_vm1, %v5640_v1  ;;  %v226_v49 = vld [vmem:[%s5745_s24 + $0x60] sm:$0xff]  ;;  %v227_v52 = vld [vmem:[%s5745_s24 + $0x68] sm:$0xff] }
  0x20   : > { %260 = vst.msk [vmem:[#allocation2 + $0x108] sm:$0xff] %vm171_vm1, %v228_v4  ;;  %261 = vst.msk [vmem:[#allocation2 + $0x110] sm:$0xff] %vm171_vm1, %v229_v5  ;;  %v1122_v4 = vld [vmem:[#allocation2 + $0x9] sm:$0xff]  ;;  %v5956_v11 = vld [vmem:[%s7131_s1 + $0x14] sm:$0xf] }
  0x21   : > { %262 = vst.msk [vmem:[#allocation2 + $0x128] sm:$0xff] %vm171_vm1, %v230_v6  ;;  %263 = vst.msk [vmem:[#allocation2 + $0x130] sm:$0xff] %vm171_vm1, %v231_v7  ;;  %v668_v5 = vld [vmem:[#allocation2 + $0x8] sm:$0xff]  ;;  %v1123_v6 = vld [vmem:[#allocation2 + $0x11] sm:$0xff] }
  0x22   : > { %264 = vst.msk [vmem:[#allocation2 + $0x148] sm:$0xff] %vm171_vm1, %v232_v8  ;;  %265 = vst.msk [vmem:[#allocation2 + $0x150] sm:$0xff] %vm171_vm1, %v233_v9  ;;  %v669_v7 = vld [vmem:[#allocation2 + $0x10] sm:$0xff]  ;;  %v5961_v12 = vld [vmem:[%s7131_s1 + $0x18] sm:$0xf] }
  0x23   : > { %246 = vst.msk [vmem:[#allocation2 + $0x28] sm:$0xff] %vm171_vm1, %v214_v13  ;;  %266 = vst.msk [vmem:[#allocation2 + $0x168] sm:$0xff] %vm171_vm1, %v234_v14  ;;  %v244_v14 = vld [vmem:[%s5745_s24 + $0xf0] sm:$0xff] }
  0x24   : > { %247 = vst.msk [vmem:[#allocation2 + $0x30] sm:$0xff] %vm171_vm1, %v215_v15  ;;  %267 = vst.msk [vmem:[#allocation2 + $0x170] sm:$0xff] %vm171_vm1, %v235_v16  ;;  %v245_v15 = vld [vmem:[%s5745_s24 + $0xf8] sm:$0xff] }
  0x25   : > { %248 = vst.msk [vmem:[#allocation2 + $0x48] sm:$0xff] %vm171_vm1, %v216_v17  ;;  %268 = vst.msk [vmem:[#allocation2 + $0x188] sm:$0xff] %vm171_vm1, %v236_v18 }
  0x26   : > { %249 = vst.msk [vmem:[#allocation2 + $0x50] sm:$0xff] %vm171_vm1, %v217_v19  ;;  %269 = vst.msk [vmem:[#allocation2 + $0x190] sm:$0xff] %vm171_vm1, %v237_v20 }
  0x27   : > { %250 = vst.msk [vmem:[#allocation2 + $0x68] sm:$0xff] %vm171_vm1, %v218_v21  ;;  %270 = vst.msk [vmem:[#allocation2 + $0x1a8] sm:$0xff] %vm171_vm1, %v238_v22  ;;  %v5798_v29 = vld [vmem:[#allocation2 + $0x107] sm:$0xff]  ;;  %v5800_v30 = vld [vmem:[#allocation2 + $0x10f] sm:$0xff] }
  0x28   : > { %251 = vst.msk [vmem:[#allocation2 + $0x70] sm:$0xff] %vm171_vm1, %v219_v23  ;;  %271 = vst.msk [vmem:[#allocation2 + $0x1b0] sm:$0xff] %vm171_vm1, %v239_v24  ;;  %v5802_v31 = vld [vmem:[#allocation2 + $0x127] sm:$0xff]  ;;  %5197 = vmatprep.mubr.msk.f32.mxu1 %vm171_vm1, %v5798_v29  ;;  %v5824_v36 = vld [vmem:[#allocation2 + $0x12f] sm:$0xff] }
  0x29   : > { %252 = vst.msk [vmem:[#allocation2 + $0x88] sm:$0xff] %vm171_vm1, %v220_v25  ;;  %272 = vst.msk [vmem:[#allocation2 + $0x1c8] sm:$0xff] %vm171_vm1, %v240_v26  ;;  %5198 = vmatmul.mubr.msk.f32.vlgmr.msra.gmra.mxu1 %vm171_vm1, %v5800_v30  ;;  %v5830_v38 = vld [vmem:[#allocation2 + $0x147] sm:$0xff]  ;;  %v5848_v41 = vld [vmem:[#allocation2 + $0x14f] sm:$0xff] }
  0x2a   : > { %253 = vst.msk [vmem:[#allocation2 + $0x90] sm:$0xff] %vm171_vm1, %v221_v27  ;;  %273 = vst.msk [vmem:[#allocation2 + $0x1d0] sm:$0xff] %vm171_vm1, %v241_v28  ;;  %v5816_v33 = vld [vmem:[#allocation2 + $0x27] sm:$0xff]  ;;  %5222 = vmatpush3.msk.msra.mxu1 %vm407_vm0, %v5722_v2  ;;  %5200 = vmatprep.mubr.msk.f32.mxu1 %vm171_vm1, %v5802_v31 }
  0x2b   : > { %v5826_v37 = vld [vmem:[#allocation2 + $0x2f] sm:$0xff]  ;;  %254 = vst.msk [vmem:[#allocation2 + $0xa8] sm:$0xff] %vm171_vm1, %v222_v34  ;;  %274 = vst.msk [vmem:[#allocation2 + $0x1e8] sm:$0xff] %vm171_vm1, %v242_v35  ;;  %5176 = vmatprep.mubr.msk.f32.mxu0 %vm171_vm1, %v5816_v33  ;;  %5321 = vmatprep.subr.msk.mxu1 %vm407_vm0, %v5812_v32  ;;  %v5850_v42 = vld [vmem:[#allocation2 + $0x167] sm:$0xff] }
  0x2c   : > { %v5834_v39 = vld [vmem:[#allocation2 + $0x47] sm:$0xff]  ;;  %5177 = vmatmul.mubr.msk.f32.gmra.mxu0 %vm171_vm1, %v5826_v37  ;;  %255 = vst.msk [vmem:[#allocation2 + $0xb0] sm:$0xff] %vm171_vm1, %v223_v44  ;;  %275 = vst.msk [vmem:[#allocation2 + $0x1f0] sm:$0xff] %vm171_vm1, %v243_v45  ;;  %v5873_v50 = vld [vmem:[#allocation2 + $0x16f] sm:$0xff] }
  0x2d   : > { %5201 = vmatmul.mubr.msk.f32.gmra.mxu1 %vm171_vm1, %v5824_v36  ;;  %5179 = vmatprep.mubr.msk.f32.mxu0 %vm171_vm1, %v5834_v39  ;;  %v5844_v40 = vld [vmem:[#allocation2 + $0x4f] sm:$0xff]  ;;  %256 = vst.msk [vmem:[#allocation2 + $0xc8] sm:$0xff] %vm171_vm1, %v224_v46  ;;  %257 = vst.msk [vmem:[#allocation2 + $0xd0] sm:$0xff] %vm171_vm1, %v225_v47  ;;  %v5879_v53 = vld [vmem:[#allocation2 + $0x187] sm:$0xff] }
  0x2e   : > { %5203 = vmatprep.mubr.msk.f32.mxu1 %vm171_vm1, %v5830_v38  ;;  %v5852_v43 = vld [vmem:[#allocation2 + $0x67] sm:$0xff]  ;;  %258 = vst.msk [vmem:[#allocation2 + $0xe8] sm:$0xff] %vm171_vm1, %v226_v49  ;;  %259 = vst.msk [vmem:[#allocation2 + $0xf0] sm:$0xff] %vm171_vm1, %v227_v52  ;;  %v5892_v55 = vld [vmem:[#allocation2 + $0x18f] sm:$0xff] }
  0x2f   : > { %v5867_v48 = vld [vmem:[#allocation2 + $0x6f] sm:$0xff]  ;;  %v5896_v57 = vld [vmem:[#allocation2 + $0x1a7] sm:$0xff]  ;;  %276 = vst.msk [vmem:[#allocation2 + $0x208] sm:$0xff] %vm171_vm1, %v244_v14  ;;  %277 = vst.msk [vmem:[#allocation2 + $0x210] sm:$0xff] %vm171_vm1, %v245_v15 }
  0x30   : > { %5180 = vmatmul.mubr.msk.f32.gmra.mxu0 %vm171_vm1, %v5844_v40  ;;  %v5875_v51 = vld [vmem:[#allocation2 + $0x87] sm:$0xff]  ;;  %v5908_v59 = vld [vmem:[#allocation2 + $0x1af] sm:$0xff] }
  0x31   : > { %5204 = vmatmul.mubr.msk.f32.gmra.mxu1 %vm171_vm1, %v5848_v41  ;;  %5182 = vmatprep.mubr.msk.f32.mxu0 %vm171_vm1, %v5852_v43  ;;  %v5888_v54 = vld [vmem:[#allocation2 + $0x8f] sm:$0xff]  ;;  %v5912_v61 = vld [vmem:[#allocation2 + $0x1c7] sm:$0xff] }
  0x32   : > { %5206 = vmatprep.mubr.msk.f32.mxu1 %vm171_vm1, %v5850_v42  ;;  %v5894_v56 = vld [vmem:[#allocation2 + $0xa7] sm:$0xff]  ;;  %v5924_v63 = vld [vmem:[#allocation2 + $0x1cf] sm:$0xff] }
  0x33   : > { %v5904_v58 = vld [vmem:[#allocation2 + $0xaf] sm:$0xff]  ;;  %v5928_v1 = vld [vmem:[#allocation2 + $0x1e7] sm:$0xff] }
  0x34   : > { %5183 = vmatmul.mubr.msk.f32.gmra.mxu0 %vm171_vm1, %v5867_v48  ;;  %v5910_v60 = vld [vmem:[#allocation2 + $0xc7] sm:$0xff]  ;;  %v5920_v62 = vld [vmem:[#allocation2 + $0xcf] sm:$0xff] }
  0x35   : > { %5207 = vmatmul.mubr.msk.f32.gmra.mxu1 %vm171_vm1, %v5873_v50  ;;  %5185 = vmatprep.mubr.msk.f32.mxu0 %vm171_vm1, %v5875_v51  ;;  %v5926_v0 = vld [vmem:[#allocation2 + $0xe7] sm:$0xff]  ;;  %v5936_v2 = vld [vmem:[#allocation2 + $0xef] sm:$0xff] }
  0x36   : > { %5209 = vmatprep.mubr.msk.f32.mxu1 %vm171_vm1, %v5879_v53  ;;  %v5940_v3 = vld [vmem:[#allocation2 + $0x1ef] sm:$0xff] }
  0x37   : > { %7172 = vst [vmem:[#allocation4_spill] sm:$0xff] %v5940_v3  ;;  %v5948_v8 = vld [vmem:[#allocation2 + $0x28] sm:$0xff]  ;;  %v5966_v13 = vld [vmem:[#allocation2 + $0x31] sm:$0xff] }
  0x38   : > { %5186 = vmatmul.mubr.msk.f32.gmra.mxu0 %vm171_vm1, %v5888_v54  ;;  %v5951_v9 = vld [vmem:[#allocation2 + $0x29] sm:$0xff]  ;;  %7174 = vst [vmem:[#allocation6_spill] sm:$0xff] %v5966_v13  ;;  %v6010_v22 = vld [vmem:[#allocation2 + $0x71] sm:$0xff] }
  0x39   : > { %5210 = vmatmul.mubr.msk.f32.gmra.mxu1 %vm171_vm1, %v5892_v55  ;;  %5188 = vmatprep.mubr.msk.f32.mxu0 %vm171_vm1, %v5894_v56  ;;  %7173 = vst [vmem:[#allocation5_spill] sm:$0xff] %v5951_v9  ;;  %v5974_v16 = vld [vmem:[#allocation2 + $0x30] sm:$0xff]  ;;  %v5980_v18 = vld [vmem:[#allocation2 + $0x48] sm:$0xff]  ;;  %7178 = vst [vmem:[#allocation10_spill] sm:$0xff] %v6010_v22 }
  0x3a   : > { %5212 = vmatprep.mubr.msk.f32.mxu1 %vm171_vm1, %v5896_v57  ;;  %v5976_v17 = vld [vmem:[#allocation2 + $0x49] sm:$0xff]  ;;  %v6026_v26 = vld [vmem:[#allocation2 + $0x91] sm:$0xff] }
  0x3b   : > { %7175 = vst [vmem:[#allocation7_spill] sm:$0xff] %v5976_v17  ;;  %v5998_v19 = vld [vmem:[#allocation2 + $0x50] sm:$0xff]  ;;  %v6002_v21 = vld [vmem:[#allocation2 + $0x68] sm:$0xff]  ;;  %7180 = vst [vmem:[#allocation12_spill] sm:$0xff] %v6026_v26 }
  0x3c   : > { %5189 = vmatmul.mubr.msk.f32.gmra.mxu0 %vm171_vm1, %v5904_v58  ;;  %v6000_v20 = vld [vmem:[#allocation2 + $0x69] sm:$0xff]  ;;  %v6042_v34 = vld [vmem:[#allocation2 + $0xb1] sm:$0xff] }
  0x3d   : > { %5213 = vmatmul.mubr.msk.f32.gmra.mxu1 %vm171_vm1, %v5908_v59  ;;  %5191 = vmatprep.mubr.msk.f32.mxu0 %vm171_vm1, %v5910_v60  ;;  %7177 = vst [vmem:[#allocation9_spill] sm:$0xff] %v6000_v20  ;;  %v6014_v23 = vld [vmem:[#allocation2 + $0x70] sm:$0xff]  ;;  %v6018_v25 = vld [vmem:[#allocation2 + $0x88] sm:$0xff]  ;;  %7182 = vst [vmem:[#allocation14_spill] sm:$0xff] %v6042_v34 }
  0x3e   : > { %5215 = vmatprep.mubr.msk.f32.mxu1 %vm171_vm1, %v5912_v61  ;;  %v6016_v24 = vld [vmem:[#allocation2 + $0x89] sm:$0xff]  ;;  %v6058_v46 = vld [vmem:[#allocation2 + $0xd1] sm:$0xff] }
  0x3f   : > { %7179 = vst [vmem:[#allocation11_spill] sm:$0xff] %v6016_v24  ;;  %v6030_v27 = vld [vmem:[#allocation2 + $0x90] sm:$0xff]  ;;  %v6050_v45 = vld [vmem:[#allocation2 + $0xc8] sm:$0xff]  ;;  %7184 = vst [vmem:[#allocation16_spill] sm:$0xff] %v6058_v46 }
  0x40   : > { %5192 = vmatmul.mubr.msk.f32.gmra.mxu0 %vm171_vm1, %v5920_v62  ;;  %v6032_v28 = vld [vmem:[#allocation2 + $0xa9] sm:$0xff]  ;;  %v6090_v14 = vld [vmem:[#allocation2 + $0x111] sm:$0xff] }
  0x41   : > { %5216 = vmatmul.mubr.msk.f32.gmra.mxu1 %vm171_vm1, %v5924_v63  ;;  %5194 = vmatprep.mubr.msk.f32.mxu0 %vm171_vm1, %v5926_v0  ;;  %7181 = vst [vmem:[#allocation13_spill] sm:$0xff] %v6032_v28  ;;  %v6046_v35 = vld [vmem:[#allocation2 + $0xb0] sm:$0xff]  ;;  %v6066_v52 = vld [vmem:[#allocation2 + $0xe8] sm:$0xff]  ;;  %7188 = vst [vmem:[#allocation20_spill] sm:$0xff] %v6090_v14 }
  0x42   : > { %5218 = vmatprep.mubr.msk.f32.mxu1 %vm171_vm1, %v5928_v1  ;;  %v6048_v44 = vld [vmem:[#allocation2 + $0xc9] sm:$0xff] }
  0x43   : > { %7183 = vst [vmem:[#allocation15_spill] sm:$0xff] %v6048_v44  ;;  %v6062_v47 = vld [vmem:[#allocation2 + $0xd0] sm:$0xff] }
  0x44   : > { %5195 = vmatmul.mubr.msk.f32.gmra.mxu0 %vm171_vm1, %v5936_v2  ;;  %v6064_v49 = vld [vmem:[#allocation2 + $0xe9] sm:$0xff] }
  0x45   : > { %5219 = vmatmul.mubr.msk.f32.gmra.mxu1 %vm171_vm1, %v5940_v3  ;;  %5273 = vmatprep.mubr.msk.f32.mxu0 %vm171_vm1, %v1122_v4  ;;  %7185 = vst [vmem:[#allocation17_spill] sm:$0xff] %v6064_v49  ;;  %v6074_v4 = vld [vmem:[#allocation2 + $0xf1] sm:$0xff]  ;;  %v6194_v3 = vld [vmem:[#allocation2 + $0x1e8] sm:$0xff] }
  0x46   : > { %5223 = vmatprep.mubr.msk.f32.mxu1 %vm171_vm1, %v668_v5  ;;  %7186 = vst [vmem:[#allocation18_spill] sm:$0xff] %v6074_v4  ;;  %v6078_v5 = vld [vmem:[#allocation2 + $0xf0] sm:$0xff] }
  0x47   : > { %v6094_v15 = vld [vmem:[#allocation2 + $0x110] sm:$0xff] }
  0x48   : > { %5274 = vmatmul.mubr.msk.f32.vlgmr.msra.gmra.mxu0 %vm171_vm1, %v1123_v6  ;;  %v6080_v6 = vld [vmem:[#allocation2 + $0x109] sm:$0xff] }
  0x49   : > { %5224 = vmatmul.mubr.msk.f32.vlgmr.msra.gmra.mxu1 %vm171_vm1, %v669_v7  ;;  %5372 = vmatpush3.msk.msra.mxu0 %vm407_vm0, %v5759_v10  ;;  %v5994_v10 = vld [vmem:[#allocation2 + $0x51] sm:$0xff]  ;;  %7187 = vst [vmem:[#allocation19_spill] sm:$0xff] %v6080_v6  ;;  %v6082_v7 = vld [vmem:[#allocation2 + $0x108] sm:$0xff] }
  0x4a   : > { %5322 = vmatpush3.msk.msra.mxu1 %vm407_vm0, %v5812_v32  ;;  %5226 = vmatprep.mubr.msk.f32.mxu1 %vm171_vm1, %v5948_v8  ;;  %7176 = vst [vmem:[#allocation8_spill] sm:$0xff] %v5994_v10  ;;  %v6034_v32 = vld [vmem:[#allocation2 + $0xa8] sm:$0xff] }
  0x4b   : > { %5276 = vmatprep.mubr.msk.f32.mxu0 %vm171_vm1, %v5951_v9  ;;  %5421 = vmatprep.subr.msk.mxu1 %vm407_vm0, %v5956_v11  ;;  %v6192_v9 = vld [vmem:[#allocation2 + $0x1e9] sm:$0xff] }
  0x4c   : > { %5277 = vmatmul.mubr.msk.f32.gmra.mxu0 %vm171_vm1, %v5966_v13  ;;  %5471 = vmatprep.subr.msk.mxu0 %vm407_vm0, %v5961_v12  ;;  %v6178_v13 = vld [vmem:[#allocation2 + $0x1c8] sm:$0xff]  ;;  %7200 = vst [vmem:[#allocation32_spill] sm:$0xff] %v6192_v9 }
  0x4d   : > { %5227 = vmatmul.mubr.msk.f32.gmra.mxu1 %vm171_vm1, %v5974_v16  ;;  %5279 = vmatprep.mubr.msk.f32.mxu0 %vm171_vm1, %v5976_v17  ;;  %v6176_v17 = vld [vmem:[#allocation2 + $0x1c9] sm:$0xff] }
  0x4e   : > { %5229 = vmatprep.mubr.msk.f32.mxu1 %vm171_vm1, %v5980_v18  ;;  %7199 = vst [vmem:[#allocation31_spill] sm:$0xff] %v6176_v17 }
  0x50   : > { %5280 = vmatmul.mubr.msk.f32.gmra.mxu0 %vm171_vm1, %v5994_v10  ;;  %v6162_v10 = vld [vmem:[#allocation2 + $0x1a8] sm:$0xff] }
  0x51   : > { %5230 = vmatmul.mubr.msk.f32.gmra.mxu1 %vm171_vm1, %v5998_v19  ;;  %5282 = vmatprep.mubr.msk.f32.mxu0 %vm171_vm1, %v6000_v20  ;;  %v6160_v20 = vld [vmem:[#allocation2 + $0x1a9] sm:$0xff] }
  0x52   : > { %5232 = vmatprep.mubr.msk.f32.mxu1 %vm171_vm1, %v6002_v21  ;;  %7197 = vst [vmem:[#allocation29_spill] sm:$0xff] %v6160_v20 }
  0x54   : > { %5283 = vmatmul.mubr.msk.f32.gmra.mxu0 %vm171_vm1, %v6010_v22  ;;  %v6146_v22 = vld [vmem:[#allocation2 + $0x188] sm:$0xff] }
  0x55   : > { %5233 = vmatmul.mubr.msk.f32.gmra.mxu1 %vm171_vm1, %v6014_v23  ;;  %5285 = vmatprep.mubr.msk.f32.mxu0 %vm171_vm1, %v6016_v24  ;;  %v6144_v24 = vld [vmem:[#allocation2 + $0x189] sm:$0xff] }
  0x56   : > { %5235 = vmatprep.mubr.msk.f32.mxu1 %vm171_vm1, %v6018_v25  ;;  %7195 = vst [vmem:[#allocation27_spill] sm:$0xff] %v6144_v24 }
  0x58   : > { %5286 = vmatmul.mubr.msk.f32.gmra.mxu0 %vm171_vm1, %v6026_v26  ;;  %v6130_v26 = vld [vmem:[#allocation2 + $0x168] sm:$0xff] }
  0x59   : > { %5236 = vmatmul.mubr.msk.f32.gmra.mxu1 %vm171_vm1, %v6030_v27  ;;  %5288 = vmatprep.mubr.msk.f32.mxu0 %vm171_vm1, %v6032_v28  ;;  %v6128_v28 = vld [vmem:[#allocation2 + $0x169] sm:$0xff] }
  0x5a   : > { %5238 = vmatprep.mubr.msk.f32.mxu1 %vm171_vm1, %v6034_v32  ;;  %7193 = vst [vmem:[#allocation25_spill] sm:$0xff] %v6128_v28 }
  0x5c   : > { %5289 = vmatmul.mubr.msk.f32.gmra.mxu0 %vm171_vm1, %v6042_v34  ;;  %v6114_v34 = vld [vmem:[#allocation2 + $0x148] sm:$0xff] }
  0x5d   : > { %5239 = vmatmul.mubr.msk.f32.gmra.mxu1 %vm171_vm1, %v6046_v35  ;;  %5291 = vmatprep.mubr.msk.f32.mxu0 %vm171_vm1, %v6048_v44  ;;  %v6112_v44 = vld [vmem:[#allocation2 + $0x149] sm:$0xff] }
  0x5e   : > { %5241 = vmatprep.mubr.msk.f32.mxu1 %vm171_vm1, %v6050_v45  ;;  %7191 = vst [vmem:[#allocation23_spill] sm:$0xff] %v6112_v44 }
  0x60   : > { %5292 = vmatmul.mubr.msk.f32.gmra.mxu0 %vm171_vm1, %v6058_v46  ;;  %v6098_v46 = vld [vmem:[#allocation2 + $0x128] sm:$0xff] }
  0x61   : > { %5242 = vmatmul.mubr.msk.f32.gmra.mxu1 %vm171_vm1, %v6062_v47  ;;  %5294 = vmatprep.mubr.msk.f32.mxu0 %vm171_vm1, %v6064_v49  ;;  %v6096_v49 = vld [vmem:[#allocation2 + $0x129] sm:$0xff] }
  0x62   : > { %5244 = vmatprep.mubr.msk.f32.mxu1 %vm171_vm1, %v6066_v52  ;;  %7189 = vst [vmem:[#allocation21_spill] sm:$0xff] %v6096_v49 }
  0x64   : > { %5295 = vmatmul.mubr.msk.f32.gmra.mxu0 %vm171_vm1, %v6074_v4  ;;  %v6110_v4 = vld [vmem:[#allocation2 + $0x130] sm:$0xff] }
  0x65   : > { %5245 = vmatmul.mubr.msk.f32.gmra.mxu1 %vm171_vm1, %v6078_v5  ;;  %5297 = vmatprep.mubr.msk.f32.mxu0 %vm171_vm1, %v6080_v6  ;;  %v6106_v6 = vld [vmem:[#allocation2 + $0x131] sm:$0xff] }
  0x66   : > { %5247 = vmatprep.mubr.msk.f32.mxu1 %vm171_vm1, %v6082_v7  ;;  %7190 = vst [vmem:[#allocation22_spill] sm:$0xff] %v6106_v6 }
  0x68   : > { %5298 = vmatmul.mubr.msk.f32.gmra.mxu0 %vm171_vm1, %v6090_v14  ;;  %v6126_v14 = vld [vmem:[#allocation2 + $0x150] sm:$0xff] }
  0x69   : > { %5248 = vmatmul.mubr.msk.f32.gmra.mxu1 %vm171_vm1, %v6094_v15  ;;  %5300 = vmatprep.mubr.msk.f32.mxu0 %vm171_vm1, %v6096_v49  ;;  %v6122_v49 = vld [vmem:[#allocation2 + $0x151] sm:$0xff] }
  0x6a   : > { %5250 = vmatprep.mubr.msk.f32.mxu1 %vm171_vm1, %v6098_v46  ;;  %7192 = vst [vmem:[#allocation24_spill] sm:$0xff] %v6122_v49 }
  0x6c   : > { %5301 = vmatmul.mubr.msk.f32.gmra.mxu0 %vm171_vm1, %v6106_v6  ;;  %v6142_v6 = vld [vmem:[#allocation2 + $0x170] sm:$0xff] }
  0x6d   : > { %5251 = vmatmul.mubr.msk.f32.gmra.mxu1 %vm171_vm1, %v6110_v4  ;;  %5303 = vmatprep.mubr.msk.f32.mxu0 %vm171_vm1, %v6112_v44  ;;  %v6138_v44 = vld [vmem:[#allocation2 + $0x171] sm:$0xff] }
  0x6e   : > { %5253 = vmatprep.mubr.msk.f32.mxu1 %vm171_vm1, %v6114_v34  ;;  %7194 = vst [vmem:[#allocation26_spill] sm:$0xff] %v6138_v44 }
  0x70   : > { %5304 = vmatmul.mubr.msk.f32.gmra.mxu0 %vm171_vm1, %v6122_v49  ;;  %v6158_v49 = vld [vmem:[#allocation2 + $0x190] sm:$0xff] }
  0x71   : > { %5254 = vmatmul.mubr.msk.f32.gmra.mxu1 %vm171_vm1, %v6126_v14  ;;  %5306 = vmatprep.mubr.msk.f32.mxu0 %vm171_vm1, %v6128_v28  ;;  %v6154_v28 = vld [vmem:[#allocation2 + $0x191] sm:$0xff] }
  0x72   : > { %5256 = vmatprep.mubr.msk.f32.mxu1 %vm171_vm1, %v6130_v26  ;;  %7196 = vst [vmem:[#allocation28_spill] sm:$0xff] %v6154_v28 }
  0x74   : > { %5307 = vmatmul.mubr.msk.f32.gmra.mxu0 %vm171_vm1, %v6138_v44  ;;  %v6174_v44 = vld [vmem:[#allocation2 + $0x1b0] sm:$0xff] }
  0x75   : > { %5257 = vmatmul.mubr.msk.f32.gmra.mxu1 %vm171_vm1, %v6142_v6  ;;  %5309 = vmatprep.mubr.msk.f32.mxu0 %vm171_vm1, %v6144_v24  ;;  %v6170_v24 = vld [vmem:[#allocation2 + $0x1b1] sm:$0xff] }
  0x76   : > { %5259 = vmatprep.mubr.msk.f32.mxu1 %vm171_vm1, %v6146_v22  ;;  %7198 = vst [vmem:[#allocation30_spill] sm:$0xff] %v6170_v24 }
  0x78   : > { %5310 = vmatmul.mubr.msk.f32.gmra.mxu0 %vm171_vm1, %v6154_v28  ;;  %v6190_v28 = vld [vmem:[#allocation2 + $0x1d0] sm:$0xff] }
  0x79   : > { %5260 = vmatmul.mubr.msk.f32.gmra.mxu1 %vm171_vm1, %v6158_v49  ;;  %5312 = vmatprep.mubr.msk.f32.mxu0 %vm171_vm1, %v6160_v20  ;;  %v6186_v20 = vld [vmem:[#allocation2 + $0x1d1] sm:$0xff] }
  0x7a   : > { %5262 = vmatprep.mubr.msk.f32.mxu1 %vm171_vm1, %v6162_v10 }
  0x7c   : > { %5313 = vmatmul.mubr.msk.f32.gmra.mxu0 %vm171_vm1, %v6170_v24  ;;  %v6206_v24 = vld [vmem:[#allocation2 + $0x1f0] sm:$0xff] }
  0x7d   : > { %5263 = vmatmul.mubr.msk.f32.gmra.mxu1 %vm171_vm1, %v6174_v44  ;;  %5315 = vmatprep.mubr.msk.f32.mxu0 %vm171_vm1, %v6176_v17  ;;  %v6202_v17 = vld [vmem:[#allocation2 + $0x1f1] sm:$0xff] }
  0x7e   : > { %5265 = vmatprep.mubr.msk.f32.mxu1 %vm171_vm1, %v6178_v13 }
  0x80   : > { %5316 = vmatmul.mubr.msk.f32.gmra.mxu0 %vm171_vm1, %v6186_v20 }
  0x81   : > { %5266 = vmatmul.mubr.msk.f32.gmra.mxu1 %vm171_vm1, %v6190_v28  ;;  %5318 = vmatprep.mubr.msk.f32.mxu0 %vm171_vm1, %v6192_v9  ;;  %v6221_v9 = vld [vmem:[%s7131_s1 + $0x1c] sm:$0xf] }
  0x82   : > { %5268 = vmatprep.mubr.msk.f32.mxu1 %vm171_vm1, %v6194_v3 }
  0x84   : > { %5319 = vmatmul.mubr.msk.f32.gmra.mxu0 %vm171_vm1, %v6202_v17 }
  0x85   : > { %5269 = vmatmul.mubr.msk.f32.gmra.mxu1 %vm171_vm1, %v6206_v24  ;;  %5373 = vmatprep.mubr.msk.f32.mxu0 %vm171_vm1, %v5948_v8  ;;  %v6230_v8 = vld [vmem:[%s7131_s1 + $0x20] sm:$0xf] }
  0x86   : > { %5323 = vmatprep.mubr.msk.f32.mxu1 %vm171_vm1, %v5816_v33  ;;  %v6346_v33 = vld [vmem:[#allocation2 + $0x208] sm:$0xff] }
  0x88   : > { %5374 = vmatmul.mubr.msk.f32.vlgmr.msra.gmra.mxu0 %vm171_vm1, %v5974_v16  ;;  %v7203_v16 = vld [vmem:[#allocation6_spill] sm:$0xff] }
  0x89   : > { %5324 = vmatmul.mubr.msk.f32.vlgmr.msra.gmra.mxu1 %vm171_vm1, %v5826_v37  ;;  %5472 = vmatpush3.msk.msra.mxu0 %vm407_vm0, %v5961_v12  ;;  %v6348_v37 = vld [vmem:[#allocation2 + $0x207] sm:$0xff]  ;;  %v2061_v12 = vld [vmem:[#allocation2 + $0x210] sm:$0xff] }
  0x8a   : > { %5422 = vmatpush3.msk.msra.mxu1 %vm407_vm0, %v5956_v11  ;;  %5326 = vmatprep.mubr.msk.f32.mxu1 %vm171_vm1, %v5834_v39  ;;  %v7201_v11 = vld [vmem:[#allocation4_spill] sm:$0xff] }
  0x8b   : > { %5376 = vmatprep.mubr.msk.f32.mxu0 %vm171_vm1, %v5980_v18  ;;  %5521 = vmatprep.subr.msk.mxu1 %vm407_vm0, %v6221_v9 }
  0x8c   : > { %5377 = vmatmul.mubr.msk.f32.gmra.mxu0 %vm171_vm1, %v5998_v19  ;;  %5571 = vmatprep.subr.msk.mxu0 %vm407_vm0, %v6230_v8 }
  0x8d   : > { %5327 = vmatmul.mubr.msk.f32.gmra.mxu1 %vm171_vm1, %v5844_v40  ;;  %5379 = vmatprep.mubr.msk.f32.mxu0 %vm171_vm1, %v6002_v21 }
  0x8e   : > { %5329 = vmatprep.mubr.msk.f32.mxu1 %vm171_vm1, %v5852_v43 }
  0x90   : > { %5380 = vmatmul.mubr.msk.f32.gmra.mxu0 %vm171_vm1, %v6014_v23 }
  0x91   : > { %5330 = vmatmul.mubr.msk.f32.gmra.mxu1 %vm171_vm1, %v5867_v48  ;;  %5382 = vmatprep.mubr.msk.f32.mxu0 %vm171_vm1, %v6018_v25 }
  0x92   : > { %5332 = vmatprep.mubr.msk.f32.mxu1 %vm171_vm1, %v5875_v51 }
  0x94   : > { %5383 = vmatmul.mubr.msk.f32.gmra.mxu0 %vm171_vm1, %v6030_v27 }
  0x95   : > { %5333 = vmatmul.mubr.msk.f32.gmra.mxu1 %vm171_vm1, %v5888_v54  ;;  %5385 = vmatprep.mubr.msk.f32.mxu0 %vm171_vm1, %v6034_v32 }
  0x96   : > { %5335 = vmatprep.mubr.msk.f32.mxu1 %vm171_vm1, %v5894_v56 }
  0x98   : > { %5386 = vmatmul.mubr.msk.f32.gmra.mxu0 %vm171_vm1, %v6046_v35 }
  0x99   : > { %5336 = vmatmul.mubr.msk.f32.gmra.mxu1 %vm171_vm1, %v5904_v58  ;;  %5388 = vmatprep.mubr.msk.f32.mxu0 %vm171_vm1, %v6050_v45 }
  0x9a   : > { %5338 = vmatprep.mubr.msk.f32.mxu1 %vm171_vm1, %v5910_v60 }
  0x9c   : > { %5389 = vmatmul.mubr.msk.f32.gmra.mxu0 %vm171_vm1, %v6062_v47 }
  0x9d   : > { %5339 = vmatmul.mubr.msk.f32.gmra.mxu1 %vm171_vm1, %v5920_v62  ;;  %5391 = vmatprep.mubr.msk.f32.mxu0 %vm171_vm1, %v6066_v52 }
  0x9e   : > { %5341 = vmatprep.mubr.msk.f32.mxu1 %vm171_vm1, %v5926_v0 }
  0xa0   : > { %5392 = vmatmul.mubr.msk.f32.gmra.mxu0 %vm171_vm1, %v6078_v5 }
  0xa1   : > { %5342 = vmatmul.mubr.msk.f32.gmra.mxu1 %vm171_vm1, %v5936_v2  ;;  %5394 = vmatprep.mubr.msk.f32.mxu0 %vm171_vm1, %v6082_v7  ;;  %v7225_v7 = vld [vmem:[#allocation28_spill] sm:$0xff] }
  0xa2   : > { %5344 = vmatprep.mubr.msk.f32.mxu1 %vm171_vm1, %v5798_v29 }
  0xa4   : > { %5395 = vmatmul.mubr.msk.f32.gmra.mxu0 %vm171_vm1, %v6094_v15 }
  0xa5   : > { %5345 = vmatmul.mubr.msk.f32.gmra.mxu1 %vm171_vm1, %v5800_v30  ;;  %5397 = vmatprep.mubr.msk.f32.mxu0 %vm171_vm1, %v6098_v46 }
  0xa6   : > { %5347 = vmatprep.mubr.msk.f32.mxu1 %vm171_vm1, %v5802_v31 }
  0xa8   : > { %5398 = vmatmul.mubr.msk.f32.gmra.mxu0 %vm171_vm1, %v6110_v4 }
  0xa9   : > { %5348 = vmatmul.mubr.msk.f32.gmra.mxu1 %vm171_vm1, %v5824_v36  ;;  %5400 = vmatprep.mubr.msk.f32.mxu0 %vm171_vm1, %v6114_v34 }
  0xaa   : > { %5350 = vmatprep.mubr.msk.f32.mxu1 %vm171_vm1, %v5830_v38 }
  0xac   : > { %5401 = vmatmul.mubr.msk.f32.gmra.mxu0 %vm171_vm1, %v6126_v14 }
  0xad   : > { %5351 = vmatmul.mubr.msk.f32.gmra.mxu1 %vm171_vm1, %v5848_v41  ;;  %5403 = vmatprep.mubr.msk.f32.mxu0 %vm171_vm1, %v6130_v26 }
  0xae   : > { %5353 = vmatprep.mubr.msk.f32.mxu1 %vm171_vm1, %v5850_v42 }
  0xb0   : > { %5404 = vmatmul.mubr.msk.f32.gmra.mxu0 %vm171_vm1, %v6142_v6 }
  0xb1   : > { %5354 = vmatmul.mubr.msk.f32.gmra.mxu1 %vm171_vm1, %v5873_v50  ;;  %5406 = vmatprep.mubr.msk.f32.mxu0 %vm171_vm1, %v6146_v22  ;;  %v7218_v22 = vld [vmem:[#allocation21_spill] sm:$0xff] }
  0xb2   : > { %5356 = vmatprep.mubr.msk.f32.mxu1 %vm171_vm1, %v5879_v53 }
  0xb4   : > { %5407 = vmatmul.mubr.msk.f32.gmra.mxu0 %vm171_vm1, %v6158_v49  ;;  %v7223_v49 = vld [vmem:[#allocation26_spill] sm:$0xff] }
  0xb5   : > { %5357 = vmatmul.mubr.msk.f32.gmra.mxu1 %vm171_vm1, %v5892_v55  ;;  %5409 = vmatprep.mubr.msk.f32.mxu0 %vm171_vm1, %v6162_v10  ;;  %v7204_v10 = vld [vmem:[#allocation7_spill] sm:$0xff] }
  0xb6   : > { %5359 = vmatprep.mubr.msk.f32.mxu1 %vm171_vm1, %v5896_v57 }
  0xb8   : > { %5410 = vmatmul.mubr.msk.f32.gmra.mxu0 %vm171_vm1, %v6174_v44 }
  0xb9   : > { %5360 = vmatmul.mubr.msk.f32.gmra.mxu1 %vm171_vm1, %v5908_v59  ;;  %5412 = vmatprep.mubr.msk.f32.mxu0 %vm171_vm1, %v6178_v13  ;;  %v7202_v13 = vld [vmem:[#allocation5_spill] sm:$0xff] }
  0xba   : > { %5362 = vmatprep.mubr.msk.f32.mxu1 %vm171_vm1, %v5912_v61 }
  0xbc   : > { %5413 = vmatmul.mubr.msk.f32.gmra.mxu0 %vm171_vm1, %v6190_v28  ;;  %v7221_v28 = vld [vmem:[#allocation24_spill] sm:$0xff] }
  0xbd   : > { %5363 = vmatmul.mubr.msk.f32.gmra.mxu1 %vm171_vm1, %v5924_v63  ;;  %5415 = vmatprep.mubr.msk.f32.mxu0 %vm171_vm1, %v6194_v3  ;;  %v6358_v3 = vld [vmem:[#allocation2 + $0x20f] sm:$0xff] }
  0xbe   : > { %5365 = vmatprep.mubr.msk.f32.mxu1 %vm171_vm1, %v5928_v1 }
  0xc0   : > { %5416 = vmatmul.mubr.msk.f32.gmra.mxu0 %vm171_vm1, %v6206_v24  ;;  %v7219_v24 = vld [vmem:[#allocation22_spill] sm:$0xff] }
  0xc1   : > { %5366 = vmatmul.mubr.msk.f32.gmra.mxu1 %vm171_vm1, %v7201_v11  ;;  %5418 = vmatprep.mubr.msk.f32.mxu0 %vm171_vm1, %v6346_v33 }
  0xc2   : > { %5368 = vmatprep.mubr.msk.f32.mxu1 %vm171_vm1, %v6348_v37 }
  0xc4   : > { %5419 = vmatmul.mubr.msk.f32.gmra.mxu0 %vm171_vm1, %v2061_v12  ;;  %v7227_v12 = vld [vmem:[#allocation30_spill] sm:$0xff] }
  0xc5   : > { %5369 = vmatmul.mubr.msk.f32.gmra.mxu1 %vm171_vm1, %v6358_v3  ;;  %5473 = vmatprep.mubr.msk.f32.mxu0 %vm171_vm1, %v5834_v39  ;;  %v7205_v39 = vld [vmem:[#allocation8_spill] sm:$0xff] }
  0xc6   : > { %5423 = vmatprep.mubr.msk.f32.mxu1 %vm171_vm1, %v7202_v13 }
  0xc8   : > { %5474 = vmatmul.mubr.msk.f32.vlgmr.msra.gmra.mxu0 %vm171_vm1, %v5844_v40  ;;  %v7206_v40 = vld [vmem:[#allocation9_spill] sm:$0xff] }
  0xc9   : > { %5424 = vmatmul.mubr.msk.f32.vlgmr.msra.gmra.mxu1 %vm171_vm1, %v7203_v16  ;;  %5572 = vmatpush3.msk.msra.mxu0 %vm407_vm0, %v6230_v8 }
  0xca   : > { %5522 = vmatpush3.msk.msra.mxu1 %vm407_vm0, %v6221_v9  ;;  %5426 = vmatprep.mubr.msk.f32.mxu1 %vm171_vm1, %v7204_v10  ;;  %v7207_v9 = vld [vmem:[#allocation10_spill] sm:$0xff] }
  0xcb   : > { %5476 = vmatprep.mubr.msk.f32.mxu0 %vm171_vm1, %v5852_v43  ;;  %v7208_v43 = vld [vmem:[#allocation11_spill] sm:$0xff] }
  0xcc   : > { %5477 = vmatmul.mubr.msk.f32.gmra.mxu0 %vm171_vm1, %v5867_v48  ;;  %v7209_v48 = vld [vmem:[#allocation12_spill] sm:$0xff] }
  0xcd   : > { %5427 = vmatmul.mubr.msk.f32.gmra.mxu1 %vm171_vm1, %v7205_v39  ;;  %5479 = vmatprep.mubr.msk.f32.mxu0 %vm171_vm1, %v5875_v51  ;;  %v7210_v51 = vld [vmem:[#allocation13_spill] sm:$0xff] }
  0xce   : > { %5429 = vmatprep.mubr.msk.f32.mxu1 %vm171_vm1, %v7206_v40 }
  0xd0   : > { %5480 = vmatmul.mubr.msk.f32.gmra.mxu0 %vm171_vm1, %v5888_v54  ;;  %v7211_v54 = vld [vmem:[#allocation14_spill] sm:$0xff] }
  0xd1   : > { %5430 = vmatmul.mubr.msk.f32.gmra.mxu1 %vm171_vm1, %v7207_v9  ;;  %5482 = vmatprep.mubr.msk.f32.mxu0 %vm171_vm1, %v5894_v56  ;;  %v7212_v56 = vld [vmem:[#allocation15_spill] sm:$0xff] }
  0xd2   : > { %5432 = vmatprep.mubr.msk.f32.mxu1 %vm171_vm1, %v7208_v43 }
  0xd4   : > { %5483 = vmatmul.mubr.msk.f32.gmra.mxu0 %vm171_vm1, %v5904_v58  ;;  %v7213_v58 = vld [vmem:[#allocation16_spill] sm:$0xff] }
  0xd5   : > { %5433 = vmatmul.mubr.msk.f32.gmra.mxu1 %vm171_vm1, %v7209_v48  ;;  %5485 = vmatprep.mubr.msk.f32.mxu0 %vm171_vm1, %v5910_v60  ;;  %v7214_v60 = vld [vmem:[#allocation17_spill] sm:$0xff] }
  0xd6   : > { %5435 = vmatprep.mubr.msk.f32.mxu1 %vm171_vm1, %v7210_v51 }
  0xd8   : > { %5486 = vmatmul.mubr.msk.f32.gmra.mxu0 %vm171_vm1, %v5920_v62  ;;  %v7215_v62 = vld [vmem:[#allocation18_spill] sm:$0xff] }
  0xd9   : > { %5436 = vmatmul.mubr.msk.f32.gmra.mxu1 %vm171_vm1, %v7211_v54  ;;  %5488 = vmatprep.mubr.msk.f32.mxu0 %vm171_vm1, %v5926_v0  ;;  %v7216_v0 = vld [vmem:[#allocation19_spill] sm:$0xff] }
  0xda   : > { %5438 = vmatprep.mubr.msk.f32.mxu1 %vm171_vm1, %v7212_v56 }
  0xdc   : > { %5489 = vmatmul.mubr.msk.f32.gmra.mxu0 %vm171_vm1, %v5936_v2  ;;  %v5175_v2 = vpop.f32.mrf.mxu0 }
  0xdd   : > { %5439 = vmatmul.mubr.msk.f32.gmra.mxu1 %vm171_vm1, %v7213_v58  ;;  %5491 = vmatprep.mubr.msk.f32.mxu0 %vm171_vm1, %v5798_v29  ;;  %637 = vst.msk [vmem:[#allocation3 + $0x8] sm:$0xff] %vm171_vm1, %v5175_v2  ;;  %v7217_v29 = vld [vmem:[#allocation20_spill] sm:$0xff] }
  0xde   : > { %5441 = vmatprep.mubr.msk.f32.mxu1 %vm171_vm1, %v7214_v60  ;;  %v2969_v58 = vld [vmem:[#allocation2 + $0x227] sm:$0xff] }
  0xe0   : > { %5492 = vmatmul.mubr.msk.f32.gmra.mxu0 %vm171_vm1, %v5800_v30  ;;  %v477_v30 = vpop.f32.mrf.mxu0 }
  0xe1   : > { %5442 = vmatmul.mubr.msk.f32.gmra.mxu1 %vm171_vm1, %v7215_v62  ;;  %5494 = vmatprep.mubr.msk.f32.mxu0 %vm171_vm1, %v5802_v31  ;;  %636 = vst.msk [vmem:[#allocation3] sm:$0xff] %vm171_vm1, %v477_v30  ;;  %v6505_v62 = vld [vmem:[#allocation2 + $0x209] sm:$0xff] }
  0xe2   : > { %5444 = vmatprep.mubr.msk.f32.mxu1 %vm171_vm1, %v7216_v0  ;;  %v6518_v0 = vld [vmem:[#allocation2 + $0x211] sm:$0xff] }
  0xe4   : > { %5495 = vmatmul.mubr.msk.f32.gmra.mxu0 %vm171_vm1, %v5824_v36  ;;  %v7220_v36 = vld [vmem:[#allocation23_spill] sm:$0xff] }
  0xe5   : > { %5445 = vmatmul.mubr.msk.f32.gmra.mxu1 %vm171_vm1, %v7217_v29  ;;  %5497 = vmatprep.mubr.msk.f32.mxu0 %vm171_vm1, %v5830_v38 }
  0xe6   : > { %5447 = vmatprep.mubr.msk.f32.mxu1 %vm171_vm1, %v7218_v22 }
  0xe8   : > { %5498 = vmatmul.mubr.msk.f32.gmra.mxu0 %vm171_vm1, %v5848_v41 }
  0xe9   : > { %v5199_v31 = vpop.f32.mrf.mxu1  ;;  %5448 = vmatmul.mubr.msk.f32.gmra.mxu1 %vm171_vm1, %v7219_v24  ;;  %5500 = vmatprep.mubr.msk.f32.mxu0 %vm171_vm1, %v5850_v42  ;;  %v7222_v42 = vld [vmem:[#allocation25_spill] sm:$0xff] }
  0xea   : > { %653 = vst.msk [vmem:[#allocation3 + $0x88] sm:$0xff] %vm171_vm1, %v5199_v31  ;;  %5450 = vmatprep.mubr.msk.f32.mxu1 %vm171_vm1, %v7220_v36  ;;  %v1027_v36 = vld [vmem:[#allocation3 + $0x8] sm:$0xff] }
  0xeb   : > { %v557_v38 = vpop.f32.mrf.mxu1 }
  0xec   : > { %652 = vst.msk [vmem:[#allocation3 + $0x80] sm:$0xff] %vm171_vm1, %v557_v38  ;;  %v5178_v26 = vpop.f32.mrf.mxu0  ;;  %5501 = vmatmul.mubr.msk.f32.gmra.mxu0 %vm171_vm1, %v5873_v50 }
  0xed   : > { %v5202_v41 = vpop.f32.mrf.mxu1  ;;  %5451 = vmatmul.mubr.msk.f32.gmra.mxu1 %vm171_vm1, %v7221_v28  ;;  %639 = vst.msk [vmem:[#allocation3 + $0x18] sm:$0xff] %vm171_vm1, %v5178_v26  ;;  %5503 = vmatprep.mubr.msk.f32.mxu0 %vm171_vm1, %v5879_v53  ;;  %v7224_v53 = vld [vmem:[#allocation27_spill] sm:$0xff]  ;;  %v1026_v26 = vld [vmem:[#allocation3] sm:$0xff] }
  0xee   : > { %655 = vst.msk [vmem:[#allocation3 + $0x98] sm:$0xff] %vm171_vm1, %v5202_v41  ;;  %5453 = vmatprep.mubr.msk.f32.mxu1 %vm171_vm1, %v7222_v42  ;;  %v487_v34 = vpop.f32.mrf.mxu0 }
  0xef   : > { %v567_v44 = vpop.f32.mrf.mxu1  ;;  %638 = vst.msk [vmem:[#allocation3 + $0x10] sm:$0xff] %vm171_vm1, %v487_v34 }
  0xf0   : > { %654 = vst.msk [vmem:[#allocation3 + $0x90] sm:$0xff] %vm171_vm1, %v567_v44  ;;  %v5181_v50 = vpop.f32.mrf.mxu0  ;;  %5504 = vmatmul.mubr.msk.f32.gmra.mxu0 %vm171_vm1, %v5892_v55 }
  0xf1   : > { %v5205_v46 = vpop.f32.mrf.mxu1  ;;  %5454 = vmatmul.mubr.msk.f32.gmra.mxu1 %vm171_vm1, %v7223_v49  ;;  %641 = vst.msk [vmem:[#allocation3 + $0x28] sm:$0xff] %vm171_vm1, %v5181_v50  ;;  %5506 = vmatprep.mubr.msk.f32.mxu0 %vm171_vm1, %v5896_v57  ;;  %v7226_v57 = vld [vmem:[#allocation29_spill] sm:$0xff] }
  0xf2   : > { %657 = vst.msk [vmem:[#allocation3 + $0xa8] sm:$0xff] %vm171_vm1, %v5205_v46  ;;  %5456 = vmatprep.mubr.msk.f32.mxu1 %vm171_vm1, %v7224_v53  ;;  %v497_v4 = vpop.f32.mrf.mxu0  ;;  %v3855_v49 = vld [vmem:[#allocation2 + $0xc9] sm:$0xff] }
  0xf3   : > { %v577_v5 = vpop.f32.mrf.mxu1  ;;  %640 = vst.msk [vmem:[#allocation3 + $0x20] sm:$0xff] %vm171_vm1, %v497_v4 }
  0xf4   : > { %656 = vst.msk [vmem:[#allocation3 + $0xa0] sm:$0xff] %vm171_vm1, %v577_v5  ;;  %v5184_v55 = vpop.f32.mrf.mxu0  ;;  %5507 = vmatmul.mubr.msk.f32.gmra.mxu0 %vm171_vm1, %v5908_v59  ;;  %v1029_v42 = vld [vmem:[#allocation3 + $0x18] sm:$0xff] }
  0xf5   : > { %v5208_v6 = vpop.f32.mrf.mxu1  ;;  %5457 = vmatmul.mubr.msk.f32.gmra.mxu1 %vm171_vm1, %v7225_v7  ;;  %643 = vst.msk [vmem:[#allocation3 + $0x38] sm:$0xff] %vm171_vm1, %v5184_v55  ;;  %5509 = vmatprep.mubr.msk.f32.mxu0 %vm171_vm1, %v5912_v61  ;;  %v7228_v61 = vld [vmem:[#allocation31_spill] sm:$0xff] }
  0xf6   : > { %659 = vst.msk [vmem:[#allocation3 + $0xb8] sm:$0xff] %vm171_vm1, %v5208_v6  ;;  %5459 = vmatprep.mubr.msk.f32.mxu1 %vm171_vm1, %v7226_v57  ;;  %v507_v14 = vpop.f32.mrf.mxu0  ;;  %v1028_v34 = vld [vmem:[#allocation3 + $0x10] sm:$0xff] }
  0xf7   : > { %v587_v15 = vpop.f32.mrf.mxu1  ;;  %642 = vst.msk [vmem:[#allocation3 + $0x30] sm:$0xff] %vm171_vm1, %v507_v14 }
  0xf8   : > { %658 = vst.msk [vmem:[#allocation3 + $0xb0] sm:$0xff] %vm171_vm1, %v587_v15  ;;  %v5187_v59 = vpop.f32.mrf.mxu0  ;;  %5510 = vmatmul.mubr.msk.f32.gmra.mxu0 %vm171_vm1, %v5924_v63  ;;  %v1031_v50 = vld [vmem:[#allocation3 + $0x28] sm:$0xff] }
  0xf9   : > { %v5211_v8 = vpop.f32.mrf.mxu1  ;;  %5460 = vmatmul.mubr.msk.f32.gmra.mxu1 %vm171_vm1, %v7227_v12  ;;  %645 = vst.msk [vmem:[#allocation3 + $0x48] sm:$0xff] %vm171_vm1, %v5187_v59  ;;  %5512 = vmatprep.mubr.msk.f32.mxu0 %vm171_vm1, %v5928_v1  ;;  %v7229_v1 = vld [vmem:[#allocation32_spill] sm:$0xff]  ;;  %v3857_v59 = vld [vmem:[#allocation2 + $0xe9] sm:$0xff] }
  0xfa   : > { %661 = vst.msk [vmem:[#allocation3 + $0xc8] sm:$0xff] %vm171_vm1, %v5211_v8  ;;  %5462 = vmatprep.mubr.msk.f32.mxu1 %vm171_vm1, %v7228_v61  ;;  %v517_v13 = vpop.f32.mrf.mxu0  ;;  %v1030_v4 = vld [vmem:[#allocation3 + $0x20] sm:$0xff] }
  0xfb   : > { %v597_v16 = vpop.f32.mrf.mxu1  ;;  %644 = vst.msk [vmem:[#allocation3 + $0x40] sm:$0xff] %vm171_vm1, %v517_v13 }
  0xfc   : > { %660 = vst.msk [vmem:[#allocation3 + $0xc0] sm:$0xff] %vm171_vm1, %v597_v16  ;;  %v5190_v63 = vpop.f32.mrf.mxu0  ;;  %5513 = vmatmul.mubr.msk.f32.gmra.mxu0 %vm171_vm1, %v7201_v11  ;;  %v1033_v7 = vld [vmem:[#allocation3 + $0x38] sm:$0xff] }
  0xfd   : > { %v5214_v54 = vpop.f32.mrf.mxu1  ;;  %5463 = vmatmul.mubr.msk.f32.gmra.mxu1 %vm171_vm1, %v6186_v20  ;;  %647 = vst.msk [vmem:[#allocation3 + $0x58] sm:$0xff] %vm171_vm1, %v5190_v63  ;;  %5515 = vmatprep.mubr.msk.f32.mxu0 %vm171_vm1, %v6348_v37  ;;  %v2970_v37 = vld [vmem:[#allocation2 + $0x22f] sm:$0xff] }
  0xfe   : > { %663 = vst.msk [vmem:[#allocation3 + $0xd8] sm:$0xff] %vm171_vm1, %v5214_v54  ;;  %5465 = vmatprep.mubr.msk.f32.mxu1 %vm171_vm1, %v7229_v1  ;;  %v527_v56 = vpop.f32.mrf.mxu0  ;;  %v1032_v61 = vld [vmem:[#allocation3 + $0x30] sm:$0xff] }
  0xff   : > { %v607_v60 = vpop.f32.mrf.mxu1  ;;  %646 = vst.msk [vmem:[#allocation3 + $0x50] sm:$0xff] %vm171_vm1, %v527_v56 }
 0x100   : > { %662 = vst.msk [vmem:[#allocation3 + $0xd0] sm:$0xff] %vm171_vm1, %v607_v60  ;;  %v5193_v20 = vpop.f32.mrf.mxu0  ;;  %5516 = vmatmul.mubr.msk.f32.gmra.mxu0 %vm171_vm1, %v6358_v3  ;;  %v1035_v1 = vld [vmem:[#allocation3 + $0x48] sm:$0xff]  ;;  %v3404_v60 = vld [vmem:[#allocation2 + $0xf0] sm:$0xff] }
 0x101   : > { %v5217_v11 = vpop.f32.mrf.mxu1  ;;  %5466 = vmatmul.mubr.msk.f32.gmra.mxu1 %vm171_vm1, %v6202_v17  ;;  %649 = vst.msk [vmem:[#allocation3 + $0x68] sm:$0xff] %vm171_vm1, %v5193_v20  ;;  %5518 = vmatprep.mubr.msk.f32.mxu0 %vm171_vm1, %v2969_v58 }
 0x102   : > { %665 = vst.msk [vmem:[#allocation3 + $0xe8] sm:$0xff] %vm171_vm1, %v5217_v11  ;;  %5468 = vmatprep.mubr.msk.f32.mxu1 %vm171_vm1, %v6505_v62  ;;  %v537_v2 = vpop.f32.mrf.mxu0  ;;  %v3859_v11 = vld [vmem:[#allocation2 + $0x109] sm:$0xff] }
 0x103   : > { %v617_v29 = vpop.f32.mrf.mxu1  ;;  %648 = vst.msk [vmem:[#allocation3 + $0x60] sm:$0xff] %vm171_vm1, %v537_v2 }
 0x104   : > { %664 = vst.msk [vmem:[#allocation3 + $0xe0] sm:$0xff] %vm171_vm1, %v617_v29  ;;  %v5196_v3 = vpop.f32.mrf.mxu0  ;;  %5519 = vmatmul.mubr.msk.f32.gmra.mxu0 %vm171_vm1, %v2970_v37  ;;  %v1034_v29 = vld [vmem:[#allocation3 + $0x40] sm:$0xff] }
 0x105   : > { %v5220_v17 = vpop.f32.mrf.mxu1  ;;  %5469 = vmatmul.mubr.msk.f32.gmra.mxu1 %vm171_vm1, %v6518_v0  ;;  %651 = vst.msk [vmem:[#allocation3 + $0x78] sm:$0xff] %vm171_vm1, %v5196_v3  ;;  %5573 = vmatprep.mubr.msk.f32.mxu0 %vm171_vm1, %v7204_v10 }
 0x106   : > { %667 = vst.msk [vmem:[#allocation3 + $0xf8] sm:$0xff] %vm171_vm1, %v5220_v17  ;;  %5523 = vmatprep.mubr.msk.f32.mxu1 %vm171_vm1, %v5980_v18  ;;  %v547_v30 = vpop.f32.mrf.mxu0 }
 0x107   : > { %v627_v22 = vpop.f32.mrf.mxu1  ;;  %650 = vst.msk [vmem:[#allocation3 + $0x70] sm:$0xff] %vm171_vm1, %v547_v30 }
 0x108   : > { %666 = vst.msk [vmem:[#allocation3 + $0xf0] sm:$0xff] %vm171_vm1, %v627_v22  ;;  %v5275_v31 = vpop.f32.mrf.mxu0  ;;  %5574 = vmatmul.mubr.msk.f32.vlgmr.msra.gmra.mxu0 %vm171_vm1, %v7205_v39 }
 0x109   : > { %v5225_v24 = vpop.f32.mrf.mxu1  ;;  %5524 = vmatmul.mubr.msk.f32.vlgmr.msra.gmra.mxu1 %vm171_vm1, %v5998_v19  ;;  %5576 = vmatprep.mubr.msk.f32.mxu0 %vm171_vm1, %v7206_v40 }
 0x10a   : > { %v1059_v10 = vadd.f32 %v5225_v24, %v1027_v36  ;;  %5526 = vmatprep.mubr.msk.f32.mxu1 %vm171_vm1, %v6002_v21  ;;  %v1321_v18 = vpop.f32.mrf.mxu0  ;;  %v3860_v24 = vld [vmem:[#allocation2 + $0x111] sm:$0xff] }
 0x10b   : > { %v867_v38 = vpop.f32.mrf.mxu1 }
 0x10c   : > { %1091 = vst.msk [vmem:[#allocation3 + $0x8] sm:$0xff] %vm171_vm1, %v1059_v10  ;;  %v1058_v41 = vadd.f32 %v1026_v26, %v867_v38  ;;  %v5278_v28 = vpop.f32.mrf.mxu0  ;;  %5577 = vmatmul.mubr.msk.f32.gmra.mxu0 %vm171_vm1, %v7207_v9  ;;  %v3861_v26 = vld [vmem:[#allocation2 + $0x129] sm:$0xff] }
 0x10d   : > { %v5228_v39 = vpop.f32.mrf.mxu1  ;;  %5527 = vmatmul.mubr.msk.f32.gmra.mxu1 %vm171_vm1, %v6014_v23  ;;  %5579 = vmatprep.mubr.msk.f32.mxu0 %vm171_vm1, %v7208_v43  ;;  %v3854_v43 = vld [vmem:[#allocation2 + $0xb1] sm:$0xff] }
 0x10e   : > { %1090 = vst.msk [vmem:[#allocation3] sm:$0xff] %vm171_vm1, %v1058_v41  ;;  %v1061_v19 = vadd.f32 %v5228_v39, %v1029_v42  ;;  %5529 = vmatprep.mubr.msk.f32.mxu1 %vm171_vm1, %v6018_v25  ;;  %v1331_v21 = vpop.f32.mrf.mxu0  ;;  %v1036_v39 = vld [vmem:[#allocation3 + $0x50] sm:$0xff]  ;;  %v3407_v42 = vld [vmem:[#allocation2 + $0x128] sm:$0xff] }
 0x10f   : > { %v877_v40 = vpop.f32.mrf.mxu1 }
 0x110   : > { %1093 = vst.msk [vmem:[#allocation3 + $0x18] sm:$0xff] %vm171_vm1, %v1061_v19  ;;  %v1060_v9 = vadd.f32 %v1028_v34, %v877_v40  ;;  %v5281_v44 = vpop.f32.mrf.mxu0  ;;  %5580 = vmatmul.mubr.msk.f32.gmra.mxu0 %vm171_vm1, %v7209_v48 }
 0x111   : > { %v5231_v23 = vpop.f32.mrf.mxu1  ;;  %5530 = vmatmul.mubr.msk.f32.gmra.mxu1 %vm171_vm1, %v6030_v27  ;;  %5582 = vmatprep.mubr.msk.f32.mxu0 %vm171_vm1, %v7210_v51 }
 0x112   : > { %1092 = vst.msk [vmem:[#allocation3 + $0x10] sm:$0xff] %vm171_vm1, %v1060_v9  ;;  %v1063_v25 = vadd.f32 %v5231_v23, %v1031_v50  ;;  %5532 = vmatprep.mubr.msk.f32.mxu1 %vm171_vm1, %v6034_v32  ;;  %v6561_v46 = vpop.f32.mrf.mxu0  ;;  %v3856_v32 = vld [vmem:[#allocation2 + $0xd1] sm:$0xff] }
 0x113   : > { %v1481_v53 = vld [vmem:[#allocation3 + $0x8] sm:$0xff]  ;;  %v887_v48 = vpop.f32.mrf.mxu1  ;;  %v3862_v23 = vld [vmem:[#allocation2 + $0x131] sm:$0xff] }
 0x114   : > { %1095 = vst.msk [vmem:[#allocation3 + $0x28] sm:$0xff] %vm171_vm1, %v1063_v25  ;;  %v1513_v5 = vadd.f32 %v5275_v31, %v1481_v53  ;;  %v1062_v27 = vadd.f32 %v1030_v4, %v887_v48  ;;  %v6564_v55 = vpop.f32.mrf.mxu0  ;;  %5583 = vmatmul.mubr.msk.f32.gmra.mxu0 %vm171_vm1, %v3854_v43  ;;  %v1037_v31 = vld [vmem:[#allocation3 + $0x58] sm:$0xff]  ;;  %v3408_v25 = vld [vmem:[#allocation2 + $0x130] sm:$0xff]  ;;  %v1038_v4 = vld [vmem:[#allocation3 + $0x60] sm:$0xff] }
 0x115   : > { %v1480_v51 = vld [vmem:[#allocation3] sm:$0xff]  ;;  %v5234_v6 = vpop.f32.mrf.mxu1  ;;  %5533 = vmatmul.mubr.msk.f32.gmra.mxu1 %vm171_vm1, %v6046_v35  ;;  %5585 = vmatprep.mubr.msk.f32.mxu0 %vm171_vm1, %v3855_v49  ;;  %v3863_v49 = vld [vmem:[#allocation2 + $0x149] sm:$0xff] }
 0x116   : > { %1545 = vst.msk [vmem:[#allocation3 + $0x8] sm:$0xff] %vm171_vm1, %v1513_v5  ;;  %1094 = vst.msk [vmem:[#allocation3 + $0x20] sm:$0xff] %vm171_vm1, %v1062_v27  ;;  %v1512_v57 = vadd.f32 %v1480_v51, %v1321_v18  ;;  %v1065_v14 = vadd.f32 %v5234_v6, %v1033_v7  ;;  %5535 = vmatprep.mubr.msk.f32.mxu1 %vm171_vm1, %v6050_v45  ;;  %v6574_v15 = vpop.f32.mrf.mxu0  ;;  %v3858_v45 = vld [vmem:[#allocation2 + $0xf1] sm:$0xff]  ;;  %v3409_v5 = vld [vmem:[#allocation2 + $0x148] sm:$0xff] }
 0x117   : > { %v1483_v8 = vld [vmem:[#allocation3 + $0x18] sm:$0xff]  ;;  %v897_v12 = vpop.f32.mrf.mxu1  ;;  %v3406_v18 = vld [vmem:[#allocation2 + $0x110] sm:$0xff] }
 0x118   : > { %1544 = vst.msk [vmem:[#allocation3] sm:$0xff] %vm171_vm1, %v1512_v57  ;;  %1097 = vst.msk [vmem:[#allocation3 + $0x38] sm:$0xff] %vm171_vm1, %v1065_v14  ;;  %v1515_v35 = vadd.f32 %v5278_v28, %v1483_v8  ;;  %v1064_v13 = vadd.f32 %v1032_v61, %v897_v12  ;;  %v6578_v16 = vpop.f32.mrf.mxu0  ;;  %5586 = vmatmul.mubr.msk.f32.gmra.mxu0 %vm171_vm1, %v3856_v32  ;;  %v1041_v32 = vld [vmem:[#allocation3 + $0x78] sm:$0xff]  ;;  %v3865_v12 = vld [vmem:[#allocation2 + $0x169] sm:$0xff] }
 0x119   : > { %v1482_v63 = vld [vmem:[#allocation3 + $0x10] sm:$0xff]  ;;  %v5237_v54 = vpop.f32.mrf.mxu1  ;;  %5536 = vmatmul.mubr.msk.f32.gmra.mxu1 %vm171_vm1, %v6062_v47  ;;  %5588 = vmatprep.mubr.msk.f32.mxu0 %vm171_vm1, %v3857_v59  ;;  %v3405_v47 = vld [vmem:[#allocation2 + $0x108] sm:$0xff] }
 0x11a   : > { %1547 = vst.msk [vmem:[#allocation3 + $0x18] sm:$0xff] %vm171_vm1, %v1515_v35  ;;  %1096 = vst.msk [vmem:[#allocation3 + $0x30] sm:$0xff] %vm171_vm1, %v1064_v13  ;;  %v1514_v56 = vadd.f32 %v1482_v63, %v1331_v21  ;;  %v1067_v58 = vadd.f32 %v5237_v54, %v1035_v1  ;;  %5538 = vmatprep.mubr.msk.f32.mxu1 %vm171_vm1, %v6066_v52  ;;  %v6588_v20 = vpop.f32.mrf.mxu0  ;;  %v3864_v57 = vld [vmem:[#allocation2 + $0x151] sm:$0xff] }
 0x11b   : > { %v1485_v37 = vld [vmem:[#allocation3 + $0x28] sm:$0xff]  ;;  %v907_v2 = vpop.f32.mrf.mxu1  ;;  %v3410_v59 = vld [vmem:[#allocation2 + $0x150] sm:$0xff] }
 0x11c   : > { %1546 = vst.msk [vmem:[#allocation3 + $0x10] sm:$0xff] %vm171_vm1, %v1514_v56  ;;  %1099 = vst.msk [vmem:[#allocation3 + $0x48] sm:$0xff] %vm171_vm1, %v1067_v58  ;;  %v1517_v3 = vadd.f32 %v5281_v44, %v1485_v37  ;;  %v1066_v17 = vadd.f32 %v1034_v29, %v907_v2  ;;  %v6592_v30 = vpop.f32.mrf.mxu0  ;;  %5589 = vmatmul.mubr.msk.f32.gmra.mxu0 %vm171_vm1, %v3858_v45  ;;  %v1039_v44 = vld [vmem:[#allocation3 + $0x68] sm:$0xff]  ;;  %v1040_v13 = vld [vmem:[#allocation3 + $0x70] sm:$0xff] }
 0x11d   : > { %v1484_v22 = vld [vmem:[#allocation3 + $0x20] sm:$0xff]  ;;  %v5240_v52 = vpop.f32.mrf.mxu1  ;;  %5539 = vmatmul.mubr.msk.f32.gmra.mxu1 %vm171_vm1, %v3404_v60  ;;  %5591 = vmatprep.mubr.msk.f32.mxu0 %vm171_vm1, %v3859_v11  ;;  %v1043_v58 = vld [vmem:[#allocation3 + $0x88] sm:$0xff]  ;;  %v3866_v60 = vld [vmem:[#allocation2 + $0x171] sm:$0xff] }
 0x11e   : > { %1549 = vst.msk [vmem:[#allocation3 + $0x28] sm:$0xff] %vm171_vm1, %v1517_v3  ;;  %1098 = vst.msk [vmem:[#allocation3 + $0x40] sm:$0xff] %vm171_vm1, %v1066_v17  ;;  %v1516_v36 = vadd.f32 %v1484_v22, %v6561_v46  ;;  %v1069_v10 = vadd.f32 %v5240_v52, %v1037_v31  ;;  %5541 = vmatprep.mubr.msk.f32.mxu1 %vm171_vm1, %v3405_v47  ;;  %v6601_v38 = vpop.f32.mrf.mxu0  ;;  %v3412_v37 = vld [vmem:[#allocation2 + $0x170] sm:$0xff]  ;;  %v1042_v17 = vld [vmem:[#allocation3 + $0x80] sm:$0xff] }
 0x11f   : > { %v1487_v41 = vld [vmem:[#allocation3 + $0x38] sm:$0xff]  ;;  %v917_v28 = vpop.f32.mrf.mxu1  ;;  %v3867_v29 = vld [vmem:[#allocation2 + $0x189] sm:$0xff] }
 0x120   : > { %1548 = vst.msk [vmem:[#allocation3 + $0x20] sm:$0xff] %vm171_vm1, %v1516_v36  ;;  %1101 = vst.msk [vmem:[#allocation3 + $0x58] sm:$0xff] %vm171_vm1, %v1069_v10  ;;  %v1519_v19 = vadd.f32 %v6564_v55, %v1487_v41  ;;  %v1068_v21 = vadd.f32 %v1036_v39, %v917_v28  ;;  %v6606_v40 = vpop.f32.mrf.mxu0  ;;  %5592 = vmatmul.mubr.msk.f32.gmra.mxu0 %vm171_vm1, %v3860_v24  ;;  %v1045_v10 = vld [vmem:[#allocation3 + $0x98] sm:$0xff]  ;;  %v3414_v41 = vld [vmem:[#allocation2 + $0x190] sm:$0xff] }
 0x121   : > { %v1486_v34 = vld [vmem:[#allocation3 + $0x30] sm:$0xff]  ;;  %v5243_v9 = vpop.f32.mrf.mxu1  ;;  %5542 = vmatmul.mubr.msk.f32.gmra.mxu1 %vm171_vm1, %v3406_v18  ;;  %5594 = vmatprep.mubr.msk.f32.mxu0 %vm171_vm1, %v3861_v26 }
 0x122   : > { %1551 = vst.msk [vmem:[#allocation3 + $0x38] sm:$0xff] %vm171_vm1, %v1519_v19  ;;  %1100 = vst.msk [vmem:[#allocation3 + $0x50] sm:$0xff] %vm171_vm1, %v1068_v21  ;;  %v1518_v50 = vadd.f32 %v1486_v34, %v6574_v15  ;;  %v1071_v43 = vadd.f32 %v5243_v9, %v1039_v44  ;;  %5544 = vmatprep.mubr.msk.f32.mxu1 %vm171_vm1, %v3407_v42  ;;  %v6615_v46 = vpop.f32.mrf.mxu0  ;;  %v3868_v18 = vld [vmem:[#allocation2 + $0x191] sm:$0xff]  ;;  %v3869_v39 = vld [vmem:[#allocation2 + $0x1a9] sm:$0xff] }
 0x123   : > { %v1489_v53 = vld [vmem:[#allocation3 + $0x48] sm:$0xff]  ;;  %v927_v48 = vpop.f32.mrf.mxu1  ;;  %v1044_v21 = vld [vmem:[#allocation3 + $0x90] sm:$0xff] }
 0x124   : > { %1550 = vst.msk [vmem:[#allocation3 + $0x30] sm:$0xff] %vm171_vm1, %v1518_v50  ;;  %1103 = vst.msk [vmem:[#allocation3 + $0x68] sm:$0xff] %vm171_vm1, %v1071_v43  ;;  %v1521_v27 = vadd.f32 %v6578_v16, %v1489_v53  ;;  %v1070_v55 = vadd.f32 %v1038_v4, %v927_v48  ;;  %v6620_v51 = vpop.f32.mrf.mxu0  ;;  %5595 = vmatmul.mubr.msk.f32.gmra.mxu0 %vm171_vm1, %v3862_v23  ;;  %v3411_v16 = vld [vmem:[#allocation2 + $0x168] sm:$0xff]  ;;  %v3416_v53 = vld [vmem:[#allocation2 + $0x1b0] sm:$0xff] }
 0x125   : > { %v1488_v6 = vld [vmem:[#allocation3 + $0x40] sm:$0xff]  ;;  %v5246_v7 = vpop.f32.mrf.mxu1  ;;  %5545 = vmatmul.mubr.msk.f32.gmra.mxu1 %vm171_vm1, %v3408_v25  ;;  %5597 = vmatprep.mubr.msk.f32.mxu0 %vm171_vm1, %v3863_v49  ;;  %v1047_v43 = vld [vmem:[#allocation3 + $0xa8] sm:$0xff]  ;;  %v3870_v25 = vld [vmem:[#allocation2 + $0x1b1] sm:$0xff] }
 0x126   : > { %1553 = vst.msk [vmem:[#allocation3 + $0x48] sm:$0xff] %vm171_vm1, %v1521_v27  ;;  %1102 = vst.msk [vmem:[#allocation3 + $0x60] sm:$0xff] %vm171_vm1, %v1070_v55  ;;  %v1520_v14 = vadd.f32 %v1488_v6, %v6588_v20  ;;  %v1073_v15 = vadd.f32 %v5246_v7, %v1041_v32  ;;  %5547 = vmatprep.mubr.msk.f32.mxu1 %vm171_vm1, %v3409_v5  ;;  %v6629_v8 = vpop.f32.mrf.mxu0  ;;  %v3871_v4 = vld [vmem:[#allocation2 + $0x1c9] sm:$0xff]  ;;  %v1046_v55 = vld [vmem:[#allocation3 + $0xa0] sm:$0xff] }
 0x127   : > { %v1491_v61 = vld [vmem:[#allocation3 + $0x58] sm:$0xff]  ;;  %v937_v35 = vpop.f32.mrf.mxu1 }
 0x128   : > { %1552 = vst.msk [vmem:[#allocation3 + $0x40] sm:$0xff] %vm171_vm1, %v1520_v14  ;;  %1105 = vst.msk [vmem:[#allocation3 + $0x78] sm:$0xff] %vm171_vm1, %v1073_v15  ;;  %v1523_v63 = vadd.f32 %v6592_v30, %v1491_v61  ;;  %v1072_v54 = vadd.f32 %v1040_v13, %v937_v35  ;;  %v6634_v1 = vpop.f32.mrf.mxu0  ;;  %5598 = vmatmul.mubr.msk.f32.gmra.mxu0 %vm171_vm1, %v3864_v57  ;;  %v3413_v30 = vld [vmem:[#allocation2 + $0x188] sm:$0xff]  ;;  %v1049_v15 = vld [vmem:[#allocation3 + $0xb8] sm:$0xff] }
 0x129   : > { %v1490_v45 = vld [vmem:[#allocation3 + $0x50] sm:$0xff]  ;;  %v5249_v56 = vpop.f32.mrf.mxu1  ;;  %5548 = vmatmul.mubr.msk.f32.gmra.mxu1 %vm171_vm1, %v3410_v59  ;;  %5600 = vmatprep.mubr.msk.f32.mxu0 %vm171_vm1, %v3865_v12 }
 0x12a   : > { %1555 = vst.msk [vmem:[#allocation3 + $0x58] sm:$0xff] %vm171_vm1, %v1523_v63  ;;  %1104 = vst.msk [vmem:[#allocation3 + $0x70] sm:$0xff] %vm171_vm1, %v1072_v54  ;;  %v1522_v20 = vadd.f32 %v1490_v45, %v6601_v38  ;;  %v1075_v11 = vadd.f32 %v5249_v56, %v1043_v58  ;;  %5550 = vmatprep.mubr.msk.f32.mxu1 %vm171_vm1, %v3411_v16  ;;  %v6643_v2 = vpop.f32.mrf.mxu0  ;;  %v3872_v59 = vld [vmem:[#allocation2 + $0x1d1] sm:$0xff]  ;;  %v3873_v13 = vld [vmem:[#allocation2 + $0x1e9] sm:$0xff] }
 0x12b   : > { %v1493_v47 = vld [vmem:[#allocation3 + $0x68] sm:$0xff]  ;;  %v947_v3 = vpop.f32.mrf.mxu1  ;;  %v3418_v61 = vld [vmem:[#allocation2 + $0x1d0] sm:$0xff] }
 0x12c   : > { %1554 = vst.msk [vmem:[#allocation3 + $0x50] sm:$0xff] %vm171_vm1, %v1522_v20  ;;  %1107 = vst.msk [vmem:[#allocation3 + $0x88] sm:$0xff] %vm171_vm1, %v1075_v11  ;;  %v1525_v22 = vadd.f32 %v6606_v40, %v1493_v47  ;;  %v1074_v52 = vadd.f32 %v1042_v17, %v947_v3  ;;  %v6648_v31 = vpop.f32.mrf.mxu0  ;;  %5601 = vmatmul.mubr.msk.f32.gmra.mxu0 %vm171_vm1, %v3866_v60  ;;  %v3415_v40 = vld [vmem:[#allocation2 + $0x1a8] sm:$0xff]  ;;  %v1048_v54 = vld [vmem:[#allocation3 + $0xb0] sm:$0xff] }
 0x12d   : > { %v1492_v24 = vld [vmem:[#allocation3 + $0x60] sm:$0xff]  ;;  %v5252_v36 = vpop.f32.mrf.mxu1  ;;  %5551 = vmatmul.mubr.msk.f32.gmra.mxu1 %vm171_vm1, %v3412_v37  ;;  %5603 = vmatprep.mubr.msk.f32.mxu0 %vm171_vm1, %v3867_v29  ;;  %v1051_v11 = vld [vmem:[#allocation3 + $0xc8] sm:$0xff]  ;;  %v3874_v37 = vld [vmem:[#allocation2 + $0x1f1] sm:$0xff] }
 0x12e   : > { %1557 = vst.msk [vmem:[#allocation3 + $0x68] sm:$0xff] %vm171_vm1, %v1525_v22  ;;  %1106 = vst.msk [vmem:[#allocation3 + $0x80] sm:$0xff] %vm171_vm1, %v1074_v52  ;;  %v1524_v38 = vadd.f32 %v1492_v24, %v6615_v46  ;;  %v1077_v26 = vadd.f32 %v5252_v36, %v1045_v10  ;;  %5553 = vmatprep.mubr.msk.f32.mxu1 %vm171_vm1, %v3413_v30  ;;  %v6657_v28 = vpop.f32.mrf.mxu0  ;;  %v3420_v47 = vld [vmem:[#allocation2 + $0x1f0] sm:$0xff]  ;;  %v1050_v22 = vld [vmem:[#allocation3 + $0xc0] sm:$0xff] }
 0x12f   : > { %v1495_v42 = vld [vmem:[#allocation3 + $0x78] sm:$0xff]  ;;  %v957_v19 = vpop.f32.mrf.mxu1 }
 0x130   : > { %1556 = vst.msk [vmem:[#allocation3 + $0x60] sm:$0xff] %vm171_vm1, %v1524_v38  ;;  %1109 = vst.msk [vmem:[#allocation3 + $0x98] sm:$0xff] %vm171_vm1, %v1077_v26  ;;  %v1527_v34 = vadd.f32 %v6620_v51, %v1495_v42  ;;  %v1076_v9 = vadd.f32 %v1044_v21, %v957_v19  ;;  %v6662_v44 = vpop.f32.mrf.mxu0  ;;  %5604 = vmatmul.mubr.msk.f32.gmra.mxu0 %vm171_vm1, %v3868_v18  ;;  %v3417_v51 = vld [vmem:[#allocation2 + $0x1c8] sm:$0xff]  ;;  %v1053_v18 = vld [vmem:[#allocation3 + $0xd8] sm:$0xff] }
 0x131   : > { %v1494_v23 = vld [vmem:[#allocation3 + $0x70] sm:$0xff]  ;;  %v5255_v50 = vpop.f32.mrf.mxu1  ;;  %5554 = vmatmul.mubr.msk.f32.gmra.mxu1 %vm171_vm1, %v3414_v41  ;;  %5606 = vmatprep.mubr.msk.f32.mxu0 %vm171_vm1, %v3869_v39 }
 0x132   : > { %1559 = vst.msk [vmem:[#allocation3 + $0x78] sm:$0xff] %vm171_vm1, %v1527_v34  ;;  %1108 = vst.msk [vmem:[#allocation3 + $0x90] sm:$0xff] %vm171_vm1, %v1076_v9  ;;  %v1526_v46 = vadd.f32 %v1494_v23, %v6629_v8  ;;  %v1079_v49 = vadd.f32 %v5255_v50, %v1047_v43  ;;  %5556 = vmatprep.mubr.msk.f32.mxu1 %vm171_vm1, %v3415_v40  ;;  %v6671_v48 = vpop.f32.mrf.mxu0  ;;  %v3422_v41 = vld [vmem:[#allocation2 + $0x210] sm:$0xff]  ;;  %v3423_v40 = vld [vmem:[#allocation2 + $0x228] sm:$0xff] }
 0x133   : > { %v1497_v5 = vld [vmem:[#allocation3 + $0x88] sm:$0xff]  ;;  %v967_v27 = vpop.f32.mrf.mxu1  ;;  %v1052_v21 = vld [vmem:[#allocation3 + $0xd0] sm:$0xff] }
 0x134   : > { %1558 = vst.msk [vmem:[#allocation3 + $0x70] sm:$0xff] %vm171_vm1, %v1526_v46  ;;  %1111 = vst.msk [vmem:[#allocation3 + $0xa8] sm:$0xff] %vm171_vm1, %v1079_v49  ;;  %v1529_v6 = vadd.f32 %v6634_v1, %v1497_v5  ;;  %v1078_v7 = vadd.f32 %v1046_v55, %v967_v27  ;;  %v6676_v32 = vpop.f32.mrf.mxu0  ;;  %5607 = vmatmul.mubr.msk.f32.gmra.mxu0 %vm171_vm1, %v3870_v25  ;;  %v3419_v1 = vld [vmem:[#allocation2 + $0x1e8] sm:$0xff]  ;;  %v3878_v50 = vld [vmem:[#allocation2 + $0x231] sm:$0xff] }
 0x135   : > { %v1496_v57 = vld [vmem:[#allocation3 + $0x80] sm:$0xff]  ;;  %v5258_v14 = vpop.f32.mrf.mxu1  ;;  %5557 = vmatmul.mubr.msk.f32.gmra.mxu1 %vm171_vm1, %v3416_v53  ;;  %5609 = vmatprep.mubr.msk.f32.mxu0 %vm171_vm1, %v3871_v4  ;;  %v3877_v39 = vld [vmem:[#allocation2 + $0x229] sm:$0xff] }
 0x136   : > { %1561 = vst.msk [vmem:[#allocation3 + $0x88] sm:$0xff] %vm171_vm1, %v1529_v6  ;;  %1110 = vst.msk [vmem:[#allocation3 + $0xa0] sm:$0xff] %vm171_vm1, %v1078_v7  ;;  %v1528_v8 = vadd.f32 %v1496_v57, %v6643_v2  ;;  %v1081_v12 = vadd.f32 %v5258_v14, %v1049_v15  ;;  %5559 = vmatprep.mubr.msk.f32.mxu1 %vm171_vm1, %v3417_v51  ;;  %v6685_v35 = vpop.f32.mrf.mxu0  ;;  %v1055_v23 = vld [vmem:[#allocation3 + $0xe8] sm:$0xff]  ;;  %v3424_v46 = vld [vmem:[#allocation2 + $0x230] sm:$0xff] }
 0x137   : > { %v1499_v16 = vld [vmem:[#allocation3 + $0x98] sm:$0xff]  ;;  %v977_v63 = vpop.f32.mrf.mxu1 }
 0x138   : > { %1560 = vst.msk [vmem:[#allocation3 + $0x80] sm:$0xff] %vm171_vm1, %v1528_v8  ;;  %1113 = vst.msk [vmem:[#allocation3 + $0xb8] sm:$0xff] %vm171_vm1, %v1081_v12  ;;  %v1531_v45 = vadd.f32 %v6648_v31, %v1499_v16  ;;  %v1080_v56 = vadd.f32 %v1048_v54, %v977_v63  ;;  %v6690_v58 = vpop.f32.mrf.mxu0  ;;  %5610 = vmatmul.mubr.msk.f32.gmra.mxu0 %vm171_vm1, %v3872_v59  ;;  %v1057_v6 = vld [vmem:[#allocation3 + $0xf8] sm:$0xff]  ;;  %v1056_v59 = vld [vmem:[#allocation3 + $0xf0] sm:$0xff] }
 0x139   : > { %v1498_v60 = vld [vmem:[#allocation3 + $0x90] sm:$0xff]  ;;  %v5261_v20 = vpop.f32.mrf.mxu1  ;;  %5560 = vmatmul.mubr.msk.f32.gmra.mxu1 %vm171_vm1, %v3418_v61  ;;  %5612 = vmatprep.mubr.msk.f32.mxu0 %vm171_vm1, %v3873_v13  ;;  %v1935_v16 = vld [vmem:[#allocation3 + $0x8] sm:$0xff] }
 0x13a   : > { %1563 = vst.msk [vmem:[#allocation3 + $0x98] sm:$0xff] %vm171_vm1, %v1531_v45  ;;  %1112 = vst.msk [vmem:[#allocation3 + $0xb0] sm:$0xff] %vm171_vm1, %v1080_v56  ;;  %v1530_v2 = vadd.f32 %v1498_v60, %v6657_v28  ;;  %v1083_v29 = vadd.f32 %v5261_v20, %v1051_v11  ;;  %5562 = vmatprep.mubr.msk.f32.mxu1 %vm171_vm1, %v3419_v1  ;;  %v1441_v3 = vpop.f32.mrf.mxu0 }
 0x13b   : > { %v1501_v17 = vld [vmem:[#allocation3 + $0xa8] sm:$0xff]  ;;  %v987_v30 = vpop.f32.mrf.mxu1 }
 0x13c   : > { %1562 = vst.msk [vmem:[#allocation3 + $0x90] sm:$0xff] %vm171_vm1, %v1530_v2  ;;  %1115 = vst.msk [vmem:[#allocation3 + $0xc8] sm:$0xff] %vm171_vm1, %v1083_v29  ;;  %v1533_v52 = vadd.f32 %v6662_v44, %v1501_v17  ;;  %v1082_v31 = vadd.f32 %v1050_v22, %v987_v30  ;;  %v5314_v24 = vpop.f32.mrf.mxu0  ;;  %5613 = vmatmul.mubr.msk.f32.gmra.mxu0 %vm171_vm1, %v3874_v37  ;;  %v1937_v29 = vld [vmem:[#allocation3 + $0x18] sm:$0xff] }
 0x13d   : > { %v1500_v36 = vld [vmem:[#allocation3 + $0xa0] sm:$0xff]  ;;  %v5264_v10 = vpop.f32.mrf.mxu1  ;;  %5563 = vmatmul.mubr.msk.f32.gmra.mxu1 %vm171_vm1, %v3420_v47  ;;  %5615 = vmatprep.mubr.msk.f32.mxu0 %vm171_vm1, %v6505_v62 }
 0x13e   : > { %1565 = vst.msk [vmem:[#allocation3 + $0xa8] sm:$0xff] %vm171_vm1, %v1533_v52  ;;  %1114 = vst.msk [vmem:[#allocation3 + $0xc0] sm:$0xff] %vm171_vm1, %v1082_v31  ;;  %v1532_v38 = vadd.f32 %v1500_v36, %v6671_v48  ;;  %v1085_v26 = vadd.f32 %v5264_v10, %v1053_v18  ;;  %5565 = vmatprep.mubr.msk.f32.mxu1 %vm171_vm1, %v6346_v33  ;;  %v1451_v28 = vpop.f32.mrf.mxu0  ;;  %v1054_v48 = vld [vmem:[#allocation3 + $0xe0] sm:$0xff]  ;;  %v1936_v52 = vld [vmem:[#allocation3 + $0x10] sm:$0xff] }
 0x13f   : > { %v1503_v42 = vld [vmem:[#allocation3 + $0xb8] sm:$0xff]  ;;  %v997_v19 = vpop.f32.mrf.mxu1 }
 0x140   : > { %1564 = vst.msk [vmem:[#allocation3 + $0xa0] sm:$0xff] %vm171_vm1, %v1532_v38  ;;  %1117 = vst.msk [vmem:[#allocation3 + $0xd8] sm:$0xff] %vm171_vm1, %v1085_v26  ;;  %v1535_v62 = vadd.f32 %v6676_v32, %v1503_v42  ;;  %v1084_v34 = vadd.f32 %v1052_v21, %v997_v19  ;;  %v5317_v9 = vpop.f32.mrf.mxu0  ;;  %5616 = vmatmul.mubr.msk.f32.gmra.mxu0 %vm171_vm1, %v6518_v0  ;;  %v1939_v38 = vld [vmem:[#allocation3 + $0x28] sm:$0xff]  ;;  %v1938_v19 = vld [vmem:[#allocation3 + $0x20] sm:$0xff] }
 0x141   : > { %v1502_v44 = vld [vmem:[#allocation3 + $0xb0] sm:$0xff]  ;;  %v5267_v33 = vpop.f32.mrf.mxu1  ;;  %5566 = vmatmul.mubr.msk.f32.gmra.mxu1 %vm171_vm1, %v3422_v41  ;;  %5618 = vmatprep.mubr.msk.f32.mxu0 %vm171_vm1, %v3877_v39 }
 0x142   : > { %1567 = vst.msk [vmem:[#allocation3 + $0xb8] sm:$0xff] %vm171_vm1, %v1535_v62  ;;  %1116 = vst.msk [vmem:[#allocation3 + $0xd0] sm:$0xff] %vm171_vm1, %v1084_v34  ;;  %v1534_v43 = vadd.f32 %v1502_v44, %v6685_v35  ;;  %v1087_v25 = vadd.f32 %v5267_v33, %v1055_v23  ;;  %5568 = vmatprep.mubr.msk.f32.mxu1 %vm171_vm1, %v3423_v40  ;;  %v1461_v49 = vpop.f32.mrf.mxu0  ;;  %v1941_v44 = vld [vmem:[#allocation3 + $0x38] sm:$0xff] }
 0x143   : > { %v1505_v0 = vld [vmem:[#allocation3 + $0xc8] sm:$0xff]  ;;  %v1007_v53 = vpop.f32.mrf.mxu1 }
 0x144   : > { %1566 = vst.msk [vmem:[#allocation3 + $0xb0] sm:$0xff] %vm171_vm1, %v1534_v43  ;;  %1119 = vst.msk [vmem:[#allocation3 + $0xe8] sm:$0xff] %vm171_vm1, %v1087_v25  ;;  %v1537_v4 = vadd.f32 %v6690_v58, %v1505_v0  ;;  %v1086_v5 = vadd.f32 %v1054_v48, %v1007_v53  ;;  %v5320_v27 = vpop.f32.mrf.mxu0  ;;  %5619 = vmatmul.mubr.msk.f32.gmra.mxu0 %vm171_vm1, %v3878_v50  ;;  %v1934_v58 = vld [vmem:[#allocation3] sm:$0xff] }
 0x145   : > { %v1504_v55 = vld [vmem:[#allocation3 + $0xc0] sm:$0xff]  ;;  %v5270_v51 = vpop.f32.mrf.mxu1  ;;  %5569 = vmatmul.mubr.msk.f32.gmra.mxu1 %vm171_vm1, %v3424_v46  ;;  %v1940_v46 = vld [vmem:[#allocation3 + $0x30] sm:$0xff] }
 0x146   : > { %1569 = vst.msk [vmem:[#allocation3 + $0xc8] sm:$0xff] %vm171_vm1, %v1537_v4  ;;  %1118 = vst.msk [vmem:[#allocation3 + $0xe0] sm:$0xff] %vm171_vm1, %v1086_v5  ;;  %v1536_v7 = vadd.f32 %v1504_v55, %v1441_v3  ;;  %v1089_v32 = vadd.f32 %v5270_v51, %v1057_v6  ;;  %v1471_v57 = vpop.f32.mrf.mxu0  ;;  %v1943_v5 = vld [vmem:[#allocation3 + $0x48] sm:$0xff] }
 0x147   : > { %v1507_v14 = vld [vmem:[#allocation3 + $0xd8] sm:$0xff]  ;;  %v1017_v15 = vpop.f32.mrf.mxu1 }
 0x148   : > { %1568 = vst.msk [vmem:[#allocation3 + $0xc0] sm:$0xff] %vm171_vm1, %v1536_v7  ;;  %1121 = vst.msk [vmem:[#allocation3 + $0xf8] sm:$0xff] %vm171_vm1, %v1089_v32  ;;  %v1539_v8 = vadd.f32 %v5314_v24, %v1507_v14  ;;  %v1088_v12 = vadd.f32 %v1056_v59, %v1017_v15  ;;  %v5375_v61 = vpop.f32.mrf.mxu0  ;;  %v1942_v32 = vld [vmem:[#allocation3 + $0x40] sm:$0xff] }
 0x149   : > { %v1506_v35 = vld [vmem:[#allocation3 + $0xd0] sm:$0xff]  ;;  %v5325_v13 = vpop.f32.mrf.mxu1 }
 0x14a   : > { %1571 = vst.msk [vmem:[#allocation3 + $0xd8] sm:$0xff] %vm171_vm1, %v1539_v8  ;;  %1120 = vst.msk [vmem:[#allocation3 + $0xf0] sm:$0xff] %vm171_vm1, %v1088_v12  ;;  %v1538_v63 = vadd.f32 %v1506_v35, %v1451_v28  ;;  %v1967_v54 = vadd.f32 %v5325_v13, %v1935_v16  ;;  %v2229_v1 = vpop.f32.mrf.mxu0  ;;  %v1945_v12 = vld [vmem:[#allocation3 + $0x58] sm:$0xff] }
 0x14b   : > { %v1509_v45 = vld [vmem:[#allocation3 + $0xe8] sm:$0xff]  ;;  %v1775_v56 = vpop.f32.mrf.mxu1 }
 0x14c   : > { %1570 = vst.msk [vmem:[#allocation3 + $0xd0] sm:$0xff] %vm171_vm1, %v1538_v63  ;;  %v1541_v60 = vadd.f32 %v5317_v9, %v1509_v45  ;;  %1999 = vst.msk [vmem:[#allocation3 + $0x8] sm:$0xff] %vm171_vm1, %v1967_v54  ;;  %v1966_v20 = vadd.f32 %v1934_v58, %v1775_v56  ;;  %v5378_v11 = vpop.f32.mrf.mxu0  ;;  %v1944_v54 = vld [vmem:[#allocation3 + $0x50] sm:$0xff] }
 0x14d   : > { %v1508_v37 = vld [vmem:[#allocation3 + $0xe0] sm:$0xff]  ;;  %v5328_v2 = vpop.f32.mrf.mxu1 }
 0x14e   : > { %1573 = vst.msk [vmem:[#allocation3 + $0xe8] sm:$0xff] %vm171_vm1, %v1541_v60  ;;  %v1540_v47 = vadd.f32 %v1508_v37, %v1461_v49  ;;  %1998 = vst.msk [vmem:[#allocation3] sm:$0xff] %vm171_vm1, %v1966_v20  ;;  %v1969_v3 = vadd.f32 %v5328_v2, %v1937_v29  ;;  %v2239_v17 = vpop.f32.mrf.mxu0  ;;  %v1947_v20 = vld [vmem:[#allocation3 + $0x68] sm:$0xff] }
 0x14f   : > { %v1511_v30 = vld [vmem:[#allocation3 + $0xf8] sm:$0xff]  ;;  %v1785_v22 = vpop.f32.mrf.mxu1 }
 0x150   : > { %1572 = vst.msk [vmem:[#allocation3 + $0xe0] sm:$0xff] %vm171_vm1, %v1540_v47  ;;  %v1543_v31 = vadd.f32 %v5320_v27, %v1511_v30  ;;  %2001 = vst.msk [vmem:[#allocation3 + $0x18] sm:$0xff] %vm171_vm1, %v1969_v3  ;;  %v1968_v24 = vadd.f32 %v1936_v52, %v1785_v22  ;;  %v5381_v36 = vpop.f32.mrf.mxu0  ;;  %v1946_v3 = vld [vmem:[#allocation3 + $0x60] sm:$0xff] }
 0x151   : > { %v1510_v10 = vld [vmem:[#allocation3 + $0xf0] sm:$0xff]  ;;  %v5331_v18 = vpop.f32.mrf.mxu1 }
 0x152   : > { %1575 = vst.msk [vmem:[#allocation3 + $0xf8] sm:$0xff] %vm171_vm1, %v1543_v31  ;;  %v1542_v26 = vadd.f32 %v1510_v10, %v1471_v57  ;;  %2000 = vst.msk [vmem:[#allocation3 + $0x10] sm:$0xff] %vm171_vm1, %v1968_v24  ;;  %v1971_v41 = vadd.f32 %v5331_v18, %v1939_v38  ;;  %v2249_v28 = vpop.f32.mrf.mxu0  ;;  %v1949_v24 = vld [vmem:[#allocation3 + $0x78] sm:$0xff] }
 0x153   : > { %v2389_v39 = vld [vmem:[#allocation3 + $0x8] sm:$0xff]  ;;  %v1795_v42 = vpop.f32.mrf.mxu1 }
 0x154   : > { %1574 = vst.msk [vmem:[#allocation3 + $0xf0] sm:$0xff] %vm171_vm1, %v1542_v26  ;;  %2003 = vst.msk [vmem:[#allocation3 + $0x28] sm:$0xff] %vm171_vm1, %v1971_v41  ;;  %v2421_v21 = vadd.f32 %v5375_v61, %v2389_v39  ;;  %v1970_v40 = vadd.f32 %v1938_v19, %v1795_v42  ;;  %v5384_v62 = vpop.f32.mrf.mxu0  ;;  %v1948_v41 = vld [vmem:[#allocation3 + $0x70] sm:$0xff] }
 0x155   : > { %v2388_v34 = vld [vmem:[#allocation3] sm:$0xff]  ;;  %v5334_v9 = vpop.f32.mrf.mxu1 }
 0x156   : > { %2453 = vst.msk [vmem:[#allocation3 + $0x8] sm:$0xff] %vm171_vm1, %v2421_v21  ;;  %2002 = vst.msk [vmem:[#allocation3 + $0x20] sm:$0xff] %vm171_vm1, %v1970_v40  ;;  %v2420_v33 = vadd.f32 %v2388_v34, %v2229_v1  ;;  %v1973_v23 = vadd.f32 %v5334_v9, %v1941_v44  ;;  %v2259_v50 = vpop.f32.mrf.mxu0  ;;  %v1951_v40 = vld [vmem:[#allocation3 + $0x88] sm:$0xff] }
 0x157   : > { %v2391_v43 = vld [vmem:[#allocation3 + $0x18] sm:$0xff]  ;;  %v1805_v25 = vpop.f32.mrf.mxu1 }
 0x158   : > { %2452 = vst.msk [vmem:[#allocation3] sm:$0xff] %vm171_vm1, %v2420_v33  ;;  %2005 = vst.msk [vmem:[#allocation3 + $0x38] sm:$0xff] %vm171_vm1, %v1973_v23  ;;  %v2423_v49 = vadd.f32 %v5378_v11, %v2391_v43  ;;  %v1972_v0 = vadd.f32 %v1940_v46, %v1805_v25  ;;  %v5387_v53 = vpop.f32.mrf.mxu0  ;;  %v1950_v23 = vld [vmem:[#allocation3 + $0x80] sm:$0xff] }
 0x159   : > { %v2390_v48 = vld [vmem:[#allocation3 + $0x10] sm:$0xff]  ;;  %v5337_v4 = vpop.f32.mrf.mxu1 }
 0x15a   : > { %2455 = vst.msk [vmem:[#allocation3 + $0x18] sm:$0xff] %vm171_vm1, %v2423_v49  ;;  %2004 = vst.msk [vmem:[#allocation3 + $0x30] sm:$0xff] %vm171_vm1, %v1972_v0  ;;  %v2422_v27 = vadd.f32 %v2390_v48, %v2239_v17  ;;  %v1975_v55 = vadd.f32 %v5337_v4, %v1943_v5  ;;  %v2269_v51 = vpop.f32.mrf.mxu0  ;;  %v1953_v0 = vld [vmem:[#allocation3 + $0x98] sm:$0xff] }
 0x15b   : > { %v2393_v6 = vld [vmem:[#allocation3 + $0x28] sm:$0xff]  ;;  %v1815_v7 = vpop.f32.mrf.mxu1 }
 0x15c   : > { %2454 = vst.msk [vmem:[#allocation3 + $0x10] sm:$0xff] %vm171_vm1, %v2422_v27  ;;  %2007 = vst.msk [vmem:[#allocation3 + $0x48] sm:$0xff] %vm171_vm1, %v1975_v55  ;;  %v2425_v57 = vadd.f32 %v5381_v36, %v2393_v6  ;;  %v1974_v14 = vadd.f32 %v1942_v32, %v1815_v7  ;;  %v5390_v15 = vpop.f32.mrf.mxu0  ;;  %v1952_v55 = vld [vmem:[#allocation3 + $0x90] sm:$0xff] }
 0x15d   : > { %v2392_v59 = vld [vmem:[#allocation3 + $0x20] sm:$0xff]  ;;  %v5340_v8 = vpop.f32.mrf.mxu1 }
 0x15e   : > { %2457 = vst.msk [vmem:[#allocation3 + $0x28] sm:$0xff] %vm171_vm1, %v2425_v57  ;;  %2006 = vst.msk [vmem:[#allocation3 + $0x40] sm:$0xff] %vm171_vm1, %v1974_v14  ;;  %v2424_v61 = vadd.f32 %v2392_v59, %v2249_v28  ;;  %v1977_v35 = vadd.f32 %v5340_v8, %v1945_v12  ;;  %v2279_v13 = vpop.f32.mrf.mxu0  ;;  %v1955_v14 = vld [vmem:[#allocation3 + $0xa8] sm:$0xff] }
 0x15f   : > { %v2395_v16 = vld [vmem:[#allocation3 + $0x38] sm:$0xff]  ;;  %v1825_v63 = vpop.f32.mrf.mxu1 }
 0x160   : > { %2456 = vst.msk [vmem:[#allocation3 + $0x20] sm:$0xff] %vm171_vm1, %v2424_v61  ;;  %2009 = vst.msk [vmem:[#allocation3 + $0x58] sm:$0xff] %vm171_vm1, %v1977_v35  ;;  %v2427_v1 = vadd.f32 %v5384_v62, %v2395_v16  ;;  %v1976_v45 = vadd.f32 %v1944_v54, %v1825_v63  ;;  %v5393_v56 = vpop.f32.mrf.mxu0  ;;  %v1954_v35 = vld [vmem:[#allocation3 + $0xa0] sm:$0xff] }
 0x161   : > { %v2394_v58 = vld [vmem:[#allocation3 + $0x30] sm:$0xff]  ;;  %v5343_v60 = vpop.f32.mrf.mxu1 }
 0x162   : > { %2459 = vst.msk [vmem:[#allocation3 + $0x38] sm:$0xff] %vm171_vm1, %v2427_v1  ;;  %2008 = vst.msk [vmem:[#allocation3 + $0x50] sm:$0xff] %vm171_vm1, %v1976_v45  ;;  %v2426_v11 = vadd.f32 %v2394_v58, %v2259_v50  ;;  %v1979_v37 = vadd.f32 %v5343_v60, %v1947_v20  ;;  %v2289_v2 = vpop.f32.mrf.mxu0  ;;  %v1957_v45 = vld [vmem:[#allocation3 + $0xb8] sm:$0xff] }
 0x163   : > { %v2397_v29 = vld [vmem:[#allocation3 + $0x48] sm:$0xff]  ;;  %v1835_v47 = vpop.f32.mrf.mxu1 }
 0x164   : > { %2458 = vst.msk [vmem:[#allocation3 + $0x30] sm:$0xff] %vm171_vm1, %v2426_v11  ;;  %2011 = vst.msk [vmem:[#allocation3 + $0x68] sm:$0xff] %vm171_vm1, %v1979_v37  ;;  %v2429_v17 = vadd.f32 %v5387_v53, %v2397_v29  ;;  %v1978_v30 = vadd.f32 %v1946_v3, %v1835_v47  ;;  %v5396_v22 = vpop.f32.mrf.mxu0  ;;  %v1956_v37 = vld [vmem:[#allocation3 + $0xb0] sm:$0xff] }
 0x165   : > { %v2396_v52 = vld [vmem:[#allocation3 + $0x40] sm:$0xff]  ;;  %v5346_v31 = vpop.f32.mrf.mxu1 }
 0x166   : > { %2461 = vst.msk [vmem:[#allocation3 + $0x48] sm:$0xff] %vm171_vm1, %v2429_v17  ;;  %2010 = vst.msk [vmem:[#allocation3 + $0x60] sm:$0xff] %vm171_vm1, %v1978_v30  ;;  %v2428_v36 = vadd.f32 %v2396_v52, %v2269_v51  ;;  %v1981_v10 = vadd.f32 %v5346_v31, %v1949_v24  ;;  %v2299_v18 = vpop.f32.mrf.mxu0  ;;  %v1959_v30 = vld [vmem:[#allocation3 + $0xc8] sm:$0xff] }
 0x167   : > { %v2399_v38 = vld [vmem:[#allocation3 + $0x58] sm:$0xff]  ;;  %v1845_v26 = vpop.f32.mrf.mxu1 }
 0x168   : > { %2460 = vst.msk [vmem:[#allocation3 + $0x40] sm:$0xff] %vm171_vm1, %v2428_v36  ;;  %2013 = vst.msk [vmem:[#allocation3 + $0x78] sm:$0xff] %vm171_vm1, %v1981_v10  ;;  %v2431_v28 = vadd.f32 %v5390_v15, %v2399_v38  ;;  %v1980_v39 = vadd.f32 %v1948_v41, %v1845_v26  ;;  %v5399_v42 = vpop.f32.mrf.mxu0  ;;  %v1958_v10 = vld [vmem:[#allocation3 + $0xc0] sm:$0xff] }
 0x169   : > { %v2398_v19 = vld [vmem:[#allocation3 + $0x50] sm:$0xff]  ;;  %v5349_v21 = vpop.f32.mrf.mxu1 }
 0x16a   : > { %2463 = vst.msk [vmem:[#allocation3 + $0x58] sm:$0xff] %vm171_vm1, %v2431_v28  ;;  %2012 = vst.msk [vmem:[#allocation3 + $0x70] sm:$0xff] %vm171_vm1, %v1980_v39  ;;  %v2430_v62 = vadd.f32 %v2398_v19, %v2279_v13  ;;  %v1983_v34 = vadd.f32 %v5349_v21, %v1951_v40  ;;  %v2309_v9 = vpop.f32.mrf.mxu0  ;;  %v1961_v39 = vld [vmem:[#allocation3 + $0xd8] sm:$0xff] }
 0x16b   : > { %v2401_v44 = vld [vmem:[#allocation3 + $0x68] sm:$0xff]  ;;  %v1855_v33 = vpop.f32.mrf.mxu1 }
 0x16c   : > { %2462 = vst.msk [vmem:[#allocation3 + $0x50] sm:$0xff] %vm171_vm1, %v2430_v62  ;;  %2015 = vst.msk [vmem:[#allocation3 + $0x88] sm:$0xff] %vm171_vm1, %v1983_v34  ;;  %v2433_v50 = vadd.f32 %v5393_v56, %v2401_v44  ;;  %v1982_v43 = vadd.f32 %v1950_v23, %v1855_v33  ;;  %v5402_v25 = vpop.f32.mrf.mxu0  ;;  %v1960_v34 = vld [vmem:[#allocation3 + $0xd0] sm:$0xff] }
 0x16d   : > { %v2400_v46 = vld [vmem:[#allocation3 + $0x60] sm:$0xff]  ;;  %v5352_v49 = vpop.f32.mrf.mxu1 }
 0x16e   : > { %2465 = vst.msk [vmem:[#allocation3 + $0x68] sm:$0xff] %vm171_vm1, %v2433_v50  ;;  %2014 = vst.msk [vmem:[#allocation3 + $0x80] sm:$0xff] %vm171_vm1, %v1982_v43  ;;  %v2432_v53 = vadd.f32 %v2400_v46, %v2289_v2  ;;  %v1985_v48 = vadd.f32 %v5352_v49, %v1953_v0  ;;  %v2319_v4 = vpop.f32.mrf.mxu0  ;;  %v1963_v43 = vld [vmem:[#allocation3 + $0xe8] sm:$0xff] }
 0x16f   : > { %v2403_v5 = vld [vmem:[#allocation3 + $0x78] sm:$0xff]  ;;  %v1865_v27 = vpop.f32.mrf.mxu1 }
 0x170   : > { %2464 = vst.msk [vmem:[#allocation3 + $0x60] sm:$0xff] %vm171_vm1, %v2432_v53  ;;  %2017 = vst.msk [vmem:[#allocation3 + $0x98] sm:$0xff] %vm171_vm1, %v1985_v48  ;;  %v2435_v51 = vadd.f32 %v5396_v22, %v2403_v5  ;;  %v1984_v6 = vadd.f32 %v1952_v55, %v1865_v27  ;;  %v5405_v7 = vpop.f32.mrf.mxu0  ;;  %v1962_v48 = vld [vmem:[#allocation3 + $0xe0] sm:$0xff] }
 0x171   : > { %v2402_v32 = vld [vmem:[#allocation3 + $0x70] sm:$0xff]  ;;  %v5355_v57 = vpop.f32.mrf.mxu1 }
 0x172   : > { %2467 = vst.msk [vmem:[#allocation3 + $0x78] sm:$0xff] %vm171_vm1, %v2435_v51  ;;  %2016 = vst.msk [vmem:[#allocation3 + $0x90] sm:$0xff] %vm171_vm1, %v1984_v6  ;;  %v2434_v15 = vadd.f32 %v2402_v32, %v2299_v18  ;;  %v1987_v59 = vadd.f32 %v5355_v57, %v1955_v14  ;;  %v2329_v8 = vpop.f32.mrf.mxu0  ;;  %v1965_v6 = vld [vmem:[#allocation3 + $0xf8] sm:$0xff] }
 0x173   : > { %v2405_v12 = vld [vmem:[#allocation3 + $0x88] sm:$0xff]  ;;  %v1875_v61 = vpop.f32.mrf.mxu1 }
 0x174   : > { %2466 = vst.msk [vmem:[#allocation3 + $0x70] sm:$0xff] %vm171_vm1, %v2434_v15  ;;  %2019 = vst.msk [vmem:[#allocation3 + $0xa8] sm:$0xff] %vm171_vm1, %v1987_v59  ;;  %v2437_v13 = vadd.f32 %v5399_v42, %v2405_v12  ;;  %v1986_v16 = vadd.f32 %v1954_v35, %v1875_v61  ;;  %v5408_v63 = vpop.f32.mrf.mxu0  ;;  %v1964_v59 = vld [vmem:[#allocation3 + $0xf0] sm:$0xff] }
 0x175   : > { %v2404_v54 = vld [vmem:[#allocation3 + $0x80] sm:$0xff]  ;;  %v5358_v1 = vpop.f32.mrf.mxu1 }
 0x176   : > { %2469 = vst.msk [vmem:[#allocation3 + $0x88] sm:$0xff] %vm171_vm1, %v2437_v13  ;;  %2018 = vst.msk [vmem:[#allocation3 + $0xa0] sm:$0xff] %vm171_vm1, %v1986_v16  ;;  %v2436_v56 = vadd.f32 %v2404_v54, %v2309_v9  ;;  %v1989_v58 = vadd.f32 %v5358_v1, %v1957_v45  ;;  %v2339_v60 = vpop.f32.mrf.mxu0  ;;  %v2843_v16 = vld [vmem:[#allocation3 + $0x8] sm:$0xff] }
 0x177   : > { %v2407_v20 = vld [vmem:[#allocation3 + $0x98] sm:$0xff]  ;;  %v1885_v11 = vpop.f32.mrf.mxu1 }
 0x178   : > { %2468 = vst.msk [vmem:[#allocation3 + $0x80] sm:$0xff] %vm171_vm1, %v2436_v56  ;;  %2021 = vst.msk [vmem:[#allocation3 + $0xb8] sm:$0xff] %vm171_vm1, %v1989_v58  ;;  %v2439_v2 = vadd.f32 %v5402_v25, %v2407_v20  ;;  %v1988_v29 = vadd.f32 %v1956_v37, %v1885_v11  ;;  %v5411_v47 = vpop.f32.mrf.mxu0  ;;  %v2842_v58 = vld [vmem:[#allocation3] sm:$0xff] }
 0x179   : > { %v2406_v3 = vld [vmem:[#allocation3 + $0x90] sm:$0xff]  ;;  %v5361_v17 = vpop.f32.mrf.mxu1 }
 0x17a   : > { %2471 = vst.msk [vmem:[#allocation3 + $0x98] sm:$0xff] %vm171_vm1, %v2439_v2  ;;  %2020 = vst.msk [vmem:[#allocation3 + $0xb0] sm:$0xff] %vm171_vm1, %v1988_v29  ;;  %v2438_v22 = vadd.f32 %v2406_v3, %v2319_v4  ;;  %v1991_v52 = vadd.f32 %v5361_v17, %v1959_v30  ;;  %v2349_v31 = vpop.f32.mrf.mxu0  ;;  %v2845_v29 = vld [vmem:[#allocation3 + $0x18] sm:$0xff] }
 0x17b   : > { %v2409_v24 = vld [vmem:[#allocation3 + $0xa8] sm:$0xff]  ;;  %v1895_v36 = vpop.f32.mrf.mxu1 }
 0x17c   : > { %2470 = vst.msk [vmem:[#allocation3 + $0x90] sm:$0xff] %vm171_vm1, %v2438_v22  ;;  %2023 = vst.msk [vmem:[#allocation3 + $0xc8] sm:$0xff] %vm171_vm1, %v1991_v52  ;;  %v2441_v18 = vadd.f32 %v5405_v7, %v2409_v24  ;;  %v1990_v38 = vadd.f32 %v1958_v10, %v1895_v36  ;;  %v5414_v26 = vpop.f32.mrf.mxu0  ;;  %v2844_v52 = vld [vmem:[#allocation3 + $0x10] sm:$0xff] }
 0x17d   : > { %v2408_v41 = vld [vmem:[#allocation3 + $0xa0] sm:$0xff]  ;;  %v5364_v28 = vpop.f32.mrf.mxu1 }
 0x17e   : > { %2473 = vst.msk [vmem:[#allocation3 + $0xa8] sm:$0xff] %vm171_vm1, %v2441_v18  ;;  %2022 = vst.msk [vmem:[#allocation3 + $0xc0] sm:$0xff] %vm171_vm1, %v1990_v38  ;;  %v2440_v42 = vadd.f32 %v2408_v41, %v2329_v8  ;;  %v1993_v19 = vadd.f32 %v5364_v28, %v1961_v39  ;;  %v2359_v21 = vpop.f32.mrf.mxu0  ;;  %v2847_v38 = vld [vmem:[#allocation3 + $0x28] sm:$0xff] }
 0x17f   : > { %v2411_v40 = vld [vmem:[#allocation3 + $0xb8] sm:$0xff]  ;;  %v1905_v62 = vpop.f32.mrf.mxu1 }
 0x180   : > { %2472 = vst.msk [vmem:[#allocation3 + $0xa0] sm:$0xff] %vm171_vm1, %v2440_v42  ;;  %2025 = vst.msk [vmem:[#allocation3 + $0xd8] sm:$0xff] %vm171_vm1, %v1993_v19  ;;  %v2443_v9 = vadd.f32 %v5408_v63, %v2411_v40  ;;  %v1992_v44 = vadd.f32 %v1960_v34, %v1905_v62  ;;  %v5417_v33 = vpop.f32.mrf.mxu0  ;;  %v2846_v19 = vld [vmem:[#allocation3 + $0x20] sm:$0xff] }
 0x181   : > { %v2410_v23 = vld [vmem:[#allocation3 + $0xb0] sm:$0xff]  ;;  %v5367_v50 = vpop.f32.mrf.mxu1 }
 0x182   : > { %2475 = vst.msk [vmem:[#allocation3 + $0xb8] sm:$0xff] %vm171_vm1, %v2443_v9  ;;  %2024 = vst.msk [vmem:[#allocation3 + $0xd0] sm:$0xff] %vm171_vm1, %v1992_v44  ;;  %v2442_v25 = vadd.f32 %v2410_v23, %v2339_v60  ;;  %v1995_v46 = vadd.f32 %v5367_v50, %v1963_v43  ;;  %v2369_v49 = vpop.f32.mrf.mxu0  ;;  %v2849_v44 = vld [vmem:[#allocation3 + $0x38] sm:$0xff] }
 0x183   : > { %v2413_v0 = vld [vmem:[#allocation3 + $0xc8] sm:$0xff]  ;;  %v1915_v53 = vpop.f32.mrf.mxu1 }
 0x184   : > { %2474 = vst.msk [vmem:[#allocation3 + $0xb0] sm:$0xff] %vm171_vm1, %v2442_v25  ;;  %2027 = vst.msk [vmem:[#allocation3 + $0xe8] sm:$0xff] %vm171_vm1, %v1995_v46  ;;  %v2445_v4 = vadd.f32 %v5411_v47, %v2413_v0  ;;  %v1994_v5 = vadd.f32 %v1962_v48, %v1915_v53  ;;  %v5420_v27 = vpop.f32.mrf.mxu0  ;;  %v2848_v46 = vld [vmem:[#allocation3 + $0x30] sm:$0xff] }
 0x185   : > { %v2412_v55 = vld [vmem:[#allocation3 + $0xc0] sm:$0xff]  ;;  %v5370_v51 = vpop.f32.mrf.mxu1 }
 0x186   : > { %2477 = vst.msk [vmem:[#allocation3 + $0xc8] sm:$0xff] %vm171_vm1, %v2445_v4  ;;  %2026 = vst.msk [vmem:[#allocation3 + $0xe0] sm:$0xff] %vm171_vm1, %v1994_v5  ;;  %v2444_v7 = vadd.f32 %v2412_v55, %v2349_v31  ;;  %v1997_v32 = vadd.f32 %v5370_v51, %v1965_v6  ;;  %v2379_v57 = vpop.f32.mrf.mxu0  ;;  %v2851_v5 = vld [vmem:[#allocation3 + $0x48] sm:$0xff] }
 0x187   : > { %v2415_v14 = vld [vmem:[#allocation3 + $0xd8] sm:$0xff]  ;;  %v1925_v15 = vpop.f32.mrf.mxu1 }
 0x188   : > { %2476 = vst.msk [vmem:[#allocation3 + $0xc0] sm:$0xff] %vm171_vm1, %v2444_v7  ;;  %2029 = vst.msk [vmem:[#allocation3 + $0xf8] sm:$0xff] %vm171_vm1, %v1997_v32  ;;  %v2447_v8 = vadd.f32 %v5414_v26, %v2415_v14  ;;  %v1996_v12 = vadd.f32 %v1964_v59, %v1925_v15  ;;  %v5475_v61 = vpop.f32.mrf.mxu0  ;;  %v2850_v32 = vld [vmem:[#allocation3 + $0x40] sm:$0xff] }
 0x189   : > { %v2414_v35 = vld [vmem:[#allocation3 + $0xd0] sm:$0xff]  ;;  %v5425_v13 = vpop.f32.mrf.mxu1 }
 0x18a   : > { %2479 = vst.msk [vmem:[#allocation3 + $0xd8] sm:$0xff] %vm171_vm1, %v2447_v8  ;;  %2028 = vst.msk [vmem:[#allocation3 + $0xf0] sm:$0xff] %vm171_vm1, %v1996_v12  ;;  %v2446_v63 = vadd.f32 %v2414_v35, %v2359_v21  ;;  %v2875_v54 = vadd.f32 %v5425_v13, %v2843_v16  ;;  %v3138_v1 = vpop.f32.mrf.mxu0  ;;  %v2853_v12 = vld [vmem:[#allocation3 + $0x58] sm:$0xff] }
 0x18b   : > { %v2417_v45 = vld [vmem:[#allocation3 + $0xe8] sm:$0xff]  ;;  %v2683_v56 = vpop.f32.mrf.mxu1 }
 0x18c   : > { %2478 = vst.msk [vmem:[#allocation3 + $0xd0] sm:$0xff] %vm171_vm1, %v2446_v63  ;;  %v2449_v60 = vadd.f32 %v5417_v33, %v2417_v45  ;;  %2907 = vst.msk [vmem:[#allocation3 + $0x8] sm:$0xff] %vm171_vm1, %v2875_v54  ;;  %v2874_v20 = vadd.f32 %v2842_v58, %v2683_v56  ;;  %v5478_v11 = vpop.f32.mrf.mxu0  ;;  %v2852_v54 = vld [vmem:[#allocation3 + $0x50] sm:$0xff] }
 0x18d   : > { %v2416_v37 = vld [vmem:[#allocation3 + $0xe0] sm:$0xff]  ;;  %v5428_v2 = vpop.f32.mrf.mxu1 }
 0x18e   : > { %2481 = vst.msk [vmem:[#allocation3 + $0xe8] sm:$0xff] %vm171_vm1, %v2449_v60  ;;  %v2448_v47 = vadd.f32 %v2416_v37, %v2369_v49  ;;  %2906 = vst.msk [vmem:[#allocation3] sm:$0xff] %vm171_vm1, %v2874_v20  ;;  %v2877_v3 = vadd.f32 %v5428_v2, %v2845_v29  ;;  %v3148_v17 = vpop.f32.mrf.mxu0  ;;  %v2855_v20 = vld [vmem:[#allocation3 + $0x68] sm:$0xff] }
 0x18f   : > { %v2419_v30 = vld [vmem:[#allocation3 + $0xf8] sm:$0xff]  ;;  %v2693_v22 = vpop.f32.mrf.mxu1 }
 0x190   : > { %2480 = vst.msk [vmem:[#allocation3 + $0xe0] sm:$0xff] %vm171_vm1, %v2448_v47  ;;  %v2451_v31 = vadd.f32 %v5420_v27, %v2419_v30  ;;  %2909 = vst.msk [vmem:[#allocation3 + $0x18] sm:$0xff] %vm171_vm1, %v2877_v3  ;;  %v2876_v24 = vadd.f32 %v2844_v52, %v2693_v22  ;;  %v5481_v36 = vpop.f32.mrf.mxu0  ;;  %v2854_v3 = vld [vmem:[#allocation3 + $0x60] sm:$0xff] }
 0x191   : > { %v2418_v10 = vld [vmem:[#allocation3 + $0xf0] sm:$0xff]  ;;  %v5431_v18 = vpop.f32.mrf.mxu1 }
 0x192   : > { %2483 = vst.msk [vmem:[#allocation3 + $0xf8] sm:$0xff] %vm171_vm1, %v2451_v31  ;;  %v2450_v26 = vadd.f32 %v2418_v10, %v2379_v57  ;;  %2908 = vst.msk [vmem:[#allocation3 + $0x10] sm:$0xff] %vm171_vm1, %v2876_v24  ;;  %v2879_v41 = vadd.f32 %v5431_v18, %v2847_v38  ;;  %v3158_v28 = vpop.f32.mrf.mxu0  ;;  %v2857_v24 = vld [vmem:[#allocation3 + $0x78] sm:$0xff] }
 0x193   : > { %v3298_v39 = vld [vmem:[#allocation3 + $0x8] sm:$0xff]  ;;  %v2703_v42 = vpop.f32.mrf.mxu1 }
 0x194   : > { %2482 = vst.msk [vmem:[#allocation3 + $0xf0] sm:$0xff] %vm171_vm1, %v2450_v26  ;;  %2911 = vst.msk [vmem:[#allocation3 + $0x28] sm:$0xff] %vm171_vm1, %v2879_v41  ;;  %v3330_v21 = vadd.f32 %v5475_v61, %v3298_v39  ;;  %v2878_v40 = vadd.f32 %v2846_v19, %v2703_v42  ;;  %v5484_v62 = vpop.f32.mrf.mxu0  ;;  %v2856_v41 = vld [vmem:[#allocation3 + $0x70] sm:$0xff] }
 0x195   : > { %v3297_v34 = vld [vmem:[#allocation3] sm:$0xff]  ;;  %v5434_v9 = vpop.f32.mrf.mxu1 }
 0x196   : > { %3362 = vst.msk [vmem:[#allocation3 + $0x8] sm:$0xff] %vm171_vm1, %v3330_v21  ;;  %2910 = vst.msk [vmem:[#allocation3 + $0x20] sm:$0xff] %vm171_vm1, %v2878_v40  ;;  %v3329_v33 = vadd.f32 %v3297_v34, %v3138_v1  ;;  %v2881_v23 = vadd.f32 %v5434_v9, %v2849_v44  ;;  %v3168_v50 = vpop.f32.mrf.mxu0  ;;  %v2859_v40 = vld [vmem:[#allocation3 + $0x88] sm:$0xff] }
 0x197   : > { %v3300_v43 = vld [vmem:[#allocation3 + $0x18] sm:$0xff]  ;;  %v2713_v25 = vpop.f32.mrf.mxu1 }
 0x198   : > { %3361 = vst.msk [vmem:[#allocation3] sm:$0xff] %vm171_vm1, %v3329_v33  ;;  %2913 = vst.msk [vmem:[#allocation3 + $0x38] sm:$0xff] %vm171_vm1, %v2881_v23  ;;  %v3332_v49 = vadd.f32 %v5478_v11, %v3300_v43  ;;  %v2880_v0 = vadd.f32 %v2848_v46, %v2713_v25  ;;  %v5487_v53 = vpop.f32.mrf.mxu0  ;;  %v2858_v23 = vld [vmem:[#allocation3 + $0x80] sm:$0xff] }
 0x199   : > { %v3299_v48 = vld [vmem:[#allocation3 + $0x10] sm:$0xff]  ;;  %v5437_v4 = vpop.f32.mrf.mxu1 }
 0x19a   : > { %3364 = vst.msk [vmem:[#allocation3 + $0x18] sm:$0xff] %vm171_vm1, %v3332_v49  ;;  %2912 = vst.msk [vmem:[#allocation3 + $0x30] sm:$0xff] %vm171_vm1, %v2880_v0  ;;  %v3331_v27 = vadd.f32 %v3299_v48, %v3148_v17  ;;  %v2883_v55 = vadd.f32 %v5437_v4, %v2851_v5  ;;  %v3178_v51 = vpop.f32.mrf.mxu0  ;;  %v2861_v0 = vld [vmem:[#allocation3 + $0x98] sm:$0xff] }
 0x19b   : > { %v3302_v6 = vld [vmem:[#allocation3 + $0x28] sm:$0xff]  ;;  %v2723_v7 = vpop.f32.mrf.mxu1 }
 0x19c   : > { %3363 = vst.msk [vmem:[#allocation3 + $0x10] sm:$0xff] %vm171_vm1, %v3331_v27  ;;  %2915 = vst.msk [vmem:[#allocation3 + $0x48] sm:$0xff] %vm171_vm1, %v2883_v55  ;;  %v3334_v57 = vadd.f32 %v5481_v36, %v3302_v6  ;;  %v2882_v14 = vadd.f32 %v2850_v32, %v2723_v7  ;;  %v5490_v15 = vpop.f32.mrf.mxu0  ;;  %v2860_v55 = vld [vmem:[#allocation3 + $0x90] sm:$0xff] }
 0x19d   : > { %v3301_v59 = vld [vmem:[#allocation3 + $0x20] sm:$0xff]  ;;  %v5440_v8 = vpop.f32.mrf.mxu1 }
 0x19e   : > { %3366 = vst.msk [vmem:[#allocation3 + $0x28] sm:$0xff] %vm171_vm1, %v3334_v57  ;;  %2914 = vst.msk [vmem:[#allocation3 + $0x40] sm:$0xff] %vm171_vm1, %v2882_v14  ;;  %v3333_v61 = vadd.f32 %v3301_v59, %v3158_v28  ;;  %v2885_v35 = vadd.f32 %v5440_v8, %v2853_v12  ;;  %v3188_v13 = vpop.f32.mrf.mxu0  ;;  %v2863_v14 = vld [vmem:[#allocation3 + $0xa8] sm:$0xff] }
 0x19f   : > { %v3304_v16 = vld [vmem:[#allocation3 + $0x38] sm:$0xff]  ;;  %v2733_v63 = vpop.f32.mrf.mxu1 }
 0x1a0   : > { %3365 = vst.msk [vmem:[#allocation3 + $0x20] sm:$0xff] %vm171_vm1, %v3333_v61  ;;  %2917 = vst.msk [vmem:[#allocation3 + $0x58] sm:$0xff] %vm171_vm1, %v2885_v35  ;;  %v3336_v1 = vadd.f32 %v5484_v62, %v3304_v16  ;;  %v2884_v45 = vadd.f32 %v2852_v54, %v2733_v63  ;;  %v5493_v56 = vpop.f32.mrf.mxu0  ;;  %v2862_v35 = vld [vmem:[#allocation3 + $0xa0] sm:$0xff] }
 0x1a1   : > { %v3303_v58 = vld [vmem:[#allocation3 + $0x30] sm:$0xff]  ;;  %v5443_v60 = vpop.f32.mrf.mxu1 }
 0x1a2   : > { %3368 = vst.msk [vmem:[#allocation3 + $0x38] sm:$0xff] %vm171_vm1, %v3336_v1  ;;  %2916 = vst.msk [vmem:[#allocation3 + $0x50] sm:$0xff] %vm171_vm1, %v2884_v45  ;;  %v3335_v11 = vadd.f32 %v3303_v58, %v3168_v50  ;;  %v2887_v37 = vadd.f32 %v5443_v60, %v2855_v20  ;;  %v3198_v2 = vpop.f32.mrf.mxu0  ;;  %v2865_v45 = vld [vmem:[#allocation3 + $0xb8] sm:$0xff] }
 0x1a3   : > { %v3306_v29 = vld [vmem:[#allocation3 + $0x48] sm:$0xff]  ;;  %v2743_v47 = vpop.f32.mrf.mxu1 }
 0x1a4   : > { %3367 = vst.msk [vmem:[#allocation3 + $0x30] sm:$0xff] %vm171_vm1, %v3335_v11  ;;  %2919 = vst.msk [vmem:[#allocation3 + $0x68] sm:$0xff] %vm171_vm1, %v2887_v37  ;;  %v3338_v17 = vadd.f32 %v5487_v53, %v3306_v29  ;;  %v2886_v30 = vadd.f32 %v2854_v3, %v2743_v47  ;;  %v5496_v22 = vpop.f32.mrf.mxu0  ;;  %v2864_v37 = vld [vmem:[#allocation3 + $0xb0] sm:$0xff] }
 0x1a5   : > { %v3305_v52 = vld [vmem:[#allocation3 + $0x40] sm:$0xff]  ;;  %v5446_v31 = vpop.f32.mrf.mxu1 }
 0x1a6   : > { %3370 = vst.msk [vmem:[#allocation3 + $0x48] sm:$0xff] %vm171_vm1, %v3338_v17  ;;  %2918 = vst.msk [vmem:[#allocation3 + $0x60] sm:$0xff] %vm171_vm1, %v2886_v30  ;;  %v3337_v36 = vadd.f32 %v3305_v52, %v3178_v51  ;;  %v2889_v10 = vadd.f32 %v5446_v31, %v2857_v24  ;;  %v3208_v18 = vpop.f32.mrf.mxu0  ;;  %v2867_v30 = vld [vmem:[#allocation3 + $0xc8] sm:$0xff] }
 0x1a7   : > { %v3308_v38 = vld [vmem:[#allocation3 + $0x58] sm:$0xff]  ;;  %v2753_v26 = vpop.f32.mrf.mxu1 }
 0x1a8   : > { %3369 = vst.msk [vmem:[#allocation3 + $0x40] sm:$0xff] %vm171_vm1, %v3337_v36  ;;  %2921 = vst.msk [vmem:[#allocation3 + $0x78] sm:$0xff] %vm171_vm1, %v2889_v10  ;;  %v3340_v28 = vadd.f32 %v5490_v15, %v3308_v38  ;;  %v2888_v39 = vadd.f32 %v2856_v41, %v2753_v26  ;;  %v5499_v42 = vpop.f32.mrf.mxu0  ;;  %v2866_v10 = vld [vmem:[#allocation3 + $0xc0] sm:$0xff] }
 0x1a9   : > { %v3307_v19 = vld [vmem:[#allocation3 + $0x50] sm:$0xff]  ;;  %v5449_v21 = vpop.f32.mrf.mxu1 }
 0x1aa   : > { %3372 = vst.msk [vmem:[#allocation3 + $0x58] sm:$0xff] %vm171_vm1, %v3340_v28  ;;  %2920 = vst.msk [vmem:[#allocation3 + $0x70] sm:$0xff] %vm171_vm1, %v2888_v39  ;;  %v3339_v62 = vadd.f32 %v3307_v19, %v3188_v13  ;;  %v2891_v34 = vadd.f32 %v5449_v21, %v2859_v40  ;;  %v3218_v9 = vpop.f32.mrf.mxu0  ;;  %v2869_v39 = vld [vmem:[#allocation3 + $0xd8] sm:$0xff] }
 0x1ab   : > { %v3310_v44 = vld [vmem:[#allocation3 + $0x68] sm:$0xff]  ;;  %v2763_v33 = vpop.f32.mrf.mxu1 }
 0x1ac   : > { %3371 = vst.msk [vmem:[#allocation3 + $0x50] sm:$0xff] %vm171_vm1, %v3339_v62  ;;  %2923 = vst.msk [vmem:[#allocation3 + $0x88] sm:$0xff] %vm171_vm1, %v2891_v34  ;;  %v3342_v50 = vadd.f32 %v5493_v56, %v3310_v44  ;;  %v2890_v43 = vadd.f32 %v2858_v23, %v2763_v33  ;;  %v5502_v25 = vpop.f32.mrf.mxu0  ;;  %v2868_v34 = vld [vmem:[#allocation3 + $0xd0] sm:$0xff] }
 0x1ad   : > { %v3309_v46 = vld [vmem:[#allocation3 + $0x60] sm:$0xff]  ;;  %v5452_v49 = vpop.f32.mrf.mxu1 }
 0x1ae   : > { %3374 = vst.msk [vmem:[#allocation3 + $0x68] sm:$0xff] %vm171_vm1, %v3342_v50  ;;  %2922 = vst.msk [vmem:[#allocation3 + $0x80] sm:$0xff] %vm171_vm1, %v2890_v43  ;;  %v3341_v53 = vadd.f32 %v3309_v46, %v3198_v2  ;;  %v2893_v48 = vadd.f32 %v5452_v49, %v2861_v0  ;;  %v3228_v4 = vpop.f32.mrf.mxu0  ;;  %v2871_v43 = vld [vmem:[#allocation3 + $0xe8] sm:$0xff] }
 0x1af   : > { %v3312_v5 = vld [vmem:[#allocation3 + $0x78] sm:$0xff]  ;;  %v2773_v27 = vpop.f32.mrf.mxu1 }
 0x1b0   : > { %3373 = vst.msk [vmem:[#allocation3 + $0x60] sm:$0xff] %vm171_vm1, %v3341_v53  ;;  %2925 = vst.msk [vmem:[#allocation3 + $0x98] sm:$0xff] %vm171_vm1, %v2893_v48  ;;  %v3344_v51 = vadd.f32 %v5496_v22, %v3312_v5  ;;  %v2892_v6 = vadd.f32 %v2860_v55, %v2773_v27  ;;  %v5505_v7 = vpop.f32.mrf.mxu0  ;;  %v2870_v48 = vld [vmem:[#allocation3 + $0xe0] sm:$0xff] }
 0x1b1   : > { %v3311_v32 = vld [vmem:[#allocation3 + $0x70] sm:$0xff]  ;;  %v5455_v57 = vpop.f32.mrf.mxu1 }
 0x1b2   : > { %3376 = vst.msk [vmem:[#allocation3 + $0x78] sm:$0xff] %vm171_vm1, %v3344_v51  ;;  %2924 = vst.msk [vmem:[#allocation3 + $0x90] sm:$0xff] %vm171_vm1, %v2892_v6  ;;  %v3343_v15 = vadd.f32 %v3311_v32, %v3208_v18  ;;  %v2895_v59 = vadd.f32 %v5455_v57, %v2863_v14  ;;  %v3238_v8 = vpop.f32.mrf.mxu0  ;;  %v2873_v6 = vld [vmem:[#allocation3 + $0xf8] sm:$0xff] }
 0x1b3   : > { %v3314_v12 = vld [vmem:[#allocation3 + $0x88] sm:$0xff]  ;;  %v2783_v61 = vpop.f32.mrf.mxu1 }
 0x1b4   : > { %3375 = vst.msk [vmem:[#allocation3 + $0x70] sm:$0xff] %vm171_vm1, %v3343_v15  ;;  %2927 = vst.msk [vmem:[#allocation3 + $0xa8] sm:$0xff] %vm171_vm1, %v2895_v59  ;;  %v3346_v13 = vadd.f32 %v5499_v42, %v3314_v12  ;;  %v2894_v16 = vadd.f32 %v2862_v35, %v2783_v61  ;;  %v5508_v63 = vpop.f32.mrf.mxu0  ;;  %v2872_v59 = vld [vmem:[#allocation3 + $0xf0] sm:$0xff] }
 0x1b5   : > { %v3313_v54 = vld [vmem:[#allocation3 + $0x80] sm:$0xff]  ;;  %v5458_v1 = vpop.f32.mrf.mxu1 }
 0x1b6   : > { %3378 = vst.msk [vmem:[#allocation3 + $0x88] sm:$0xff] %vm171_vm1, %v3346_v13  ;;  %2926 = vst.msk [vmem:[#allocation3 + $0xa0] sm:$0xff] %vm171_vm1, %v2894_v16  ;;  %v3345_v56 = vadd.f32 %v3313_v54, %v3218_v9  ;;  %v2897_v58 = vadd.f32 %v5458_v1, %v2865_v45  ;;  %v3248_v60 = vpop.f32.mrf.mxu0  ;;  %v3752_v16 = vld [vmem:[#allocation3 + $0x8] sm:$0xff] }
 0x1b7   : > { %v3316_v20 = vld [vmem:[#allocation3 + $0x98] sm:$0xff]  ;;  %v2793_v11 = vpop.f32.mrf.mxu1 }
 0x1b8   : > { %3377 = vst.msk [vmem:[#allocation3 + $0x80] sm:$0xff] %vm171_vm1, %v3345_v56  ;;  %2929 = vst.msk [vmem:[#allocation3 + $0xb8] sm:$0xff] %vm171_vm1, %v2897_v58  ;;  %v3348_v2 = vadd.f32 %v5502_v25, %v3316_v20  ;;  %v2896_v29 = vadd.f32 %v2864_v37, %v2793_v11  ;;  %v5511_v47 = vpop.f32.mrf.mxu0  ;;  %v3751_v58 = vld [vmem:[#allocation3] sm:$0xff] }
 0x1b9   : > { %v3315_v3 = vld [vmem:[#allocation3 + $0x90] sm:$0xff]  ;;  %v5461_v17 = vpop.f32.mrf.mxu1 }
 0x1ba   : > { %3380 = vst.msk [vmem:[#allocation3 + $0x98] sm:$0xff] %vm171_vm1, %v3348_v2  ;;  %2928 = vst.msk [vmem:[#allocation3 + $0xb0] sm:$0xff] %vm171_vm1, %v2896_v29  ;;  %v3347_v22 = vadd.f32 %v3315_v3, %v3228_v4  ;;  %v2899_v52 = vadd.f32 %v5461_v17, %v2867_v30  ;;  %v3258_v31 = vpop.f32.mrf.mxu0  ;;  %v3754_v29 = vld [vmem:[#allocation3 + $0x18] sm:$0xff] }
 0x1bb   : > { %v3318_v24 = vld [vmem:[#allocation3 + $0xa8] sm:$0xff]  ;;  %v2803_v36 = vpop.f32.mrf.mxu1 }
 0x1bc   : > { %3379 = vst.msk [vmem:[#allocation3 + $0x90] sm:$0xff] %vm171_vm1, %v3347_v22  ;;  %2931 = vst.msk [vmem:[#allocation3 + $0xc8] sm:$0xff] %vm171_vm1, %v2899_v52  ;;  %v3350_v18 = vadd.f32 %v5505_v7, %v3318_v24  ;;  %v2898_v38 = vadd.f32 %v2866_v10, %v2803_v36  ;;  %v5514_v26 = vpop.f32.mrf.mxu0  ;;  %v3753_v52 = vld [vmem:[#allocation3 + $0x10] sm:$0xff] }
 0x1bd   : > { %v3317_v41 = vld [vmem:[#allocation3 + $0xa0] sm:$0xff]  ;;  %v5464_v28 = vpop.f32.mrf.mxu1 }
 0x1be   : > { %3382 = vst.msk [vmem:[#allocation3 + $0xa8] sm:$0xff] %vm171_vm1, %v3350_v18  ;;  %2930 = vst.msk [vmem:[#allocation3 + $0xc0] sm:$0xff] %vm171_vm1, %v2898_v38  ;;  %v3349_v42 = vadd.f32 %v3317_v41, %v3238_v8  ;;  %v2901_v19 = vadd.f32 %v5464_v28, %v2869_v39  ;;  %v3268_v21 = vpop.f32.mrf.mxu0  ;;  %v3756_v38 = vld [vmem:[#allocation3 + $0x28] sm:$0xff] }
 0x1bf   : > { %v3320_v40 = vld [vmem:[#allocation3 + $0xb8] sm:$0xff]  ;;  %v2813_v62 = vpop.f32.mrf.mxu1 }
 0x1c0   : > { %3381 = vst.msk [vmem:[#allocation3 + $0xa0] sm:$0xff] %vm171_vm1, %v3349_v42  ;;  %2933 = vst.msk [vmem:[#allocation3 + $0xd8] sm:$0xff] %vm171_vm1, %v2901_v19  ;;  %v3352_v9 = vadd.f32 %v5508_v63, %v3320_v40  ;;  %v2900_v44 = vadd.f32 %v2868_v34, %v2813_v62  ;;  %v5517_v33 = vpop.f32.mrf.mxu0  ;;  %v3755_v19 = vld [vmem:[#allocation3 + $0x20] sm:$0xff] }
 0x1c1   : > { %v3319_v23 = vld [vmem:[#allocation3 + $0xb0] sm:$0xff]  ;;  %v5467_v50 = vpop.f32.mrf.mxu1 }
 0x1c2   : > { %3384 = vst.msk [vmem:[#allocation3 + $0xb8] sm:$0xff] %vm171_vm1, %v3352_v9  ;;  %2932 = vst.msk [vmem:[#allocation3 + $0xd0] sm:$0xff] %vm171_vm1, %v2900_v44  ;;  %v3351_v25 = vadd.f32 %v3319_v23, %v3248_v60  ;;  %v2903_v46 = vadd.f32 %v5467_v50, %v2871_v43  ;;  %v3278_v49 = vpop.f32.mrf.mxu0  ;;  %v3758_v44 = vld [vmem:[#allocation3 + $0x38] sm:$0xff] }
 0x1c3   : > { %v3322_v0 = vld [vmem:[#allocation3 + $0xc8] sm:$0xff]  ;;  %v2823_v53 = vpop.f32.mrf.mxu1 }
 0x1c4   : > { %3383 = vst.msk [vmem:[#allocation3 + $0xb0] sm:$0xff] %vm171_vm1, %v3351_v25  ;;  %2935 = vst.msk [vmem:[#allocation3 + $0xe8] sm:$0xff] %vm171_vm1, %v2903_v46  ;;  %v3354_v4 = vadd.f32 %v5511_v47, %v3322_v0  ;;  %v2902_v5 = vadd.f32 %v2870_v48, %v2823_v53  ;;  %v5520_v27 = vpop.f32.mrf.mxu0  ;;  %v3757_v46 = vld [vmem:[#allocation3 + $0x30] sm:$0xff] }
 0x1c5   : > { %v3321_v55 = vld [vmem:[#allocation3 + $0xc0] sm:$0xff]  ;;  %v5470_v51 = vpop.f32.mrf.mxu1 }
 0x1c6   : > { %3386 = vst.msk [vmem:[#allocation3 + $0xc8] sm:$0xff] %vm171_vm1, %v3354_v4  ;;  %2934 = vst.msk [vmem:[#allocation3 + $0xe0] sm:$0xff] %vm171_vm1, %v2902_v5  ;;  %v3353_v7 = vadd.f32 %v3321_v55, %v3258_v31  ;;  %v2905_v32 = vadd.f32 %v5470_v51, %v2873_v6  ;;  %v3288_v57 = vpop.f32.mrf.mxu0  ;;  %v3760_v5 = vld [vmem:[#allocation3 + $0x48] sm:$0xff]  ;;  %v6884_v6 = vld [vmem:[%s7132_s2] ss:$0 sm:$0xff] }
 0x1c7   : > { %v3324_v14 = vld [vmem:[#allocation3 + $0xd8] sm:$0xff]  ;;  %v2833_v15 = vpop.f32.mrf.mxu1 }
 0x1c8   : > { %3385 = vst.msk [vmem:[#allocation3 + $0xc0] sm:$0xff] %vm171_vm1, %v3353_v7  ;;  %2937 = vst.msk [vmem:[#allocation3 + $0xf8] sm:$0xff] %vm171_vm1, %v2905_v32  ;;  %v3356_v8 = vadd.f32 %v5514_v26, %v3324_v14  ;;  %v2904_v12 = vadd.f32 %v2872_v59, %v2833_v15  ;;  %v5575_v61 = vpop.f32.mrf.mxu0  ;;  %v4373_v14 = vld [vmem:[%s5745_s24 + $0x8] sm:$0xff] }
 0x1c9   : > { %v3323_v35 = vld [vmem:[#allocation3 + $0xd0] sm:$0xff]  ;;  %v5525_v13 = vpop.f32.mrf.mxu1 }
 0x1ca   : > { %3388 = vst.msk [vmem:[#allocation3 + $0xd8] sm:$0xff] %vm171_vm1, %v3356_v8  ;;  %2936 = vst.msk [vmem:[#allocation3 + $0xf0] sm:$0xff] %vm171_vm1, %v2904_v12  ;;  %v3355_v63 = vadd.f32 %v3323_v35, %v3268_v21  ;;  %v3784_v54 = vadd.f32 %v5525_v13, %v3752_v16  ;;  %v4046_v1 = vpop.f32.mrf.mxu0  ;;  %v3762_v13 = vld [vmem:[#allocation3 + $0x58] sm:$0xff] }
 0x1cb   : > { %v3326_v45 = vld [vmem:[#allocation3 + $0xe8] sm:$0xff]  ;;  %v3592_v56 = vpop.f32.mrf.mxu1 }
 0x1cc   : > { %3387 = vst.msk [vmem:[#allocation3 + $0xd0] sm:$0xff] %vm171_vm1, %v3355_v63  ;;  %v3358_v60 = vadd.f32 %v5517_v33, %v3326_v45  ;;  %3816 = vst.msk [vmem:[#allocation3 + $0x8] sm:$0xff] %vm171_vm1, %v3784_v54  ;;  %v3783_v20 = vadd.f32 %v3751_v58, %v3592_v56  ;;  %v5578_v11 = vpop.f32.mrf.mxu0  ;;  %v4372_v63 = vld [vmem:[%s5745_s24] sm:$0xff] }
 0x1cd   : > { %v3325_v37 = vld [vmem:[#allocation3 + $0xe0] sm:$0xff]  ;;  %v5528_v2 = vpop.f32.mrf.mxu1 }
 0x1ce   : > { %3390 = vst.msk [vmem:[#allocation3 + $0xe8] sm:$0xff] %vm171_vm1, %v3358_v60  ;;  %v3357_v47 = vadd.f32 %v3325_v37, %v3278_v49  ;;  %3815 = vst.msk [vmem:[#allocation3] sm:$0xff] %vm171_vm1, %v3783_v20  ;;  %v3786_v3 = vadd.f32 %v5528_v2, %v3754_v29  ;;  %v4056_v17 = vpop.f32.mrf.mxu0  ;;  %v3761_v20 = vld [vmem:[#allocation3 + $0x50] sm:$0xff] }
 0x1cf   : > { %v3328_v30 = vld [vmem:[#allocation3 + $0xf8] sm:$0xff]  ;;  %v3602_v22 = vpop.f32.mrf.mxu1 }
 0x1d0   : > { %3389 = vst.msk [vmem:[#allocation3 + $0xe0] sm:$0xff] %vm171_vm1, %v3357_v47  ;;  %v3360_v31 = vadd.f32 %v5520_v27, %v3328_v30  ;;  %3818 = vst.msk [vmem:[#allocation3 + $0x18] sm:$0xff] %vm171_vm1, %v3786_v3  ;;  %v3785_v24 = vadd.f32 %v3753_v52, %v3602_v22  ;;  %v5581_v36 = vpop.f32.mrf.mxu0 }
 0x1d1   : > { %v3327_v10 = vld [vmem:[#allocation3 + $0xf0] sm:$0xff]  ;;  %v5531_v18 = vpop.f32.mrf.mxu1 }
 0x1d2   : > { %3392 = vst.msk [vmem:[#allocation3 + $0xf8] sm:$0xff] %vm171_vm1, %v3360_v31  ;;  %v3359_v26 = vadd.f32 %v3327_v10, %v3288_v57  ;;  %3817 = vst.msk [vmem:[#allocation3 + $0x10] sm:$0xff] %vm171_vm1, %v3785_v24  ;;  %v3788_v41 = vadd.f32 %v5531_v18, %v3756_v38  ;;  %v4066_v28 = vpop.f32.mrf.mxu0  ;;  %v3759_v57 = vld [vmem:[#allocation3 + $0x40] sm:$0xff]  ;;  %v3764_v10 = vld [vmem:[#allocation3 + $0x68] sm:$0xff] }
 0x1d3   : > { %v4206_v39 = vld [vmem:[#allocation3 + $0x8] sm:$0xff]  ;;  %v3612_v42 = vpop.f32.mrf.mxu1 }
 0x1d4   : > { %3391 = vst.msk [vmem:[#allocation3 + $0xf0] sm:$0xff] %vm171_vm1, %v3359_v26  ;;  %3820 = vst.msk [vmem:[#allocation3 + $0x28] sm:$0xff] %vm171_vm1, %v3788_v41  ;;  %v4238_v21 = vadd.f32 %v5575_v61, %v4206_v39  ;;  %v3787_v40 = vadd.f32 %v3755_v19, %v3612_v42  ;;  %v5584_v62 = vpop.f32.mrf.mxu0  ;;  %v4374_v26 = vld [vmem:[%s5745_s24 + $0x10] sm:$0xff] }
 0x1d5   : > { %v4205_v34 = vld [vmem:[#allocation3] sm:$0xff]  ;;  %v5534_v9 = vpop.f32.mrf.mxu1 }
 0x1d6   : > { %4270 = vst.msk [vmem:[#allocation3 + $0x8] sm:$0xff] %vm171_vm1, %v4238_v21  ;;  %3819 = vst.msk [vmem:[#allocation3 + $0x20] sm:$0xff] %vm171_vm1, %v3787_v40  ;;  %v4237_v33 = vadd.f32 %v4205_v34, %v4046_v1  ;;  %v3790_v23 = vadd.f32 %v5534_v9, %v3758_v44  ;;  %v4076_v50 = vpop.f32.mrf.mxu0  ;;  %v4377_v44 = vld [vmem:[%s5745_s24 + $0x28] sm:$0xff] }
 0x1d7   : > { %v4208_v43 = vld [vmem:[#allocation3 + $0x18] sm:$0xff]  ;;  %v3622_v25 = vpop.f32.mrf.mxu1 }
 0x1d8   : > { %4269 = vst.msk [vmem:[#allocation3] sm:$0xff] %vm171_vm1, %v4237_v33  ;;  %3822 = vst.msk [vmem:[#allocation3 + $0x38] sm:$0xff] %vm171_vm1, %v3790_v23  ;;  %v4240_v49 = vadd.f32 %v5578_v11, %v4208_v43  ;;  %v3789_v0 = vadd.f32 %v3757_v46, %v3622_v25  ;;  %v6875_v53 = vpop.f32.mrf.mxu0 }
 0x1d9   : > { %v4207_v48 = vld [vmem:[#allocation3 + $0x10] sm:$0xff]  ;;  %v5537_v4 = vpop.f32.mrf.mxu1 }
 0x1da   : > { %4272 = vst.msk [vmem:[#allocation3 + $0x18] sm:$0xff] %vm171_vm1, %v4240_v49  ;;  %3821 = vst.msk [vmem:[#allocation3 + $0x30] sm:$0xff] %vm171_vm1, %v3789_v0  ;;  %v4239_v27 = vadd.f32 %v4207_v48, %v4056_v17  ;;  %v3792_v55 = vadd.f32 %v5537_v4, %v3760_v5  ;;  %v6879_v51 = vpop.f32.mrf.mxu0  ;;  %v4375_v17 = vld [vmem:[%s5745_s24 + $0x18] sm:$0xff]  ;;  %v4376_v4 = vld [vmem:[%s5745_s24 + $0x20] sm:$0xff] }
 0x1db   : > { %v4210_v7 = vld [vmem:[#allocation3 + $0x28] sm:$0xff]  ;;  %v3632_v32 = vpop.f32.mrf.mxu1  ;;  %v3766_v0 = vld [vmem:[#allocation3 + $0x78] sm:$0xff] }
 0x1dc   : > { %4271 = vst.msk [vmem:[#allocation3 + $0x10] sm:$0xff] %vm171_vm1, %v4239_v27  ;;  %3824 = vst.msk [vmem:[#allocation3 + $0x48] sm:$0xff] %vm171_vm1, %v3792_v55  ;;  %v4242_v15 = vadd.f32 %v5581_v36, %v4210_v7  ;;  %v3791_v59 = vadd.f32 %v3759_v57, %v3632_v32  ;;  %v6889_v8 = vpop.f32.mrf.mxu0 }
 0x1dd   : > { %v4302_v12 = vld [vmem:[#allocation3 + $0x8] sm:$0xff]  ;;  %v4209_v61 = vld [vmem:[#allocation3 + $0x20] sm:$0xff]  ;;  %v5540_v35 = vpop.f32.mrf.mxu1 }
 0x1de   : > { %v4341_v16 = vadd.f32 %v6884_v6, %v4302_v12  ;;  %4274 = vst.msk [vmem:[#allocation3 + $0x28] sm:$0xff] %vm171_vm1, %v4242_v15  ;;  %3823 = vst.msk [vmem:[#allocation3 + $0x40] sm:$0xff] %vm171_vm1, %v3791_v59  ;;  %v4241_v54 = vadd.f32 %v4209_v61, %v4066_v28  ;;  %v3794_v1 = vadd.f32 %v5540_v35, %v3762_v13  ;;  %v6895_v45 = vpop.f32.mrf.mxu0  ;;  %v4379_v12 = vld [vmem:[%s5745_s24 + $0x38] sm:$0xff] }
 0x1df   : > { %v4301_v56 = vld [vmem:[#allocation3] sm:$0xff]  ;;  %v4212_v58 = vld [vmem:[#allocation3 + $0x38] sm:$0xff]  ;;  %v3642_v60 = vpop.f32.mrf.mxu1 }
 0x1e0   : > { %v4405_v11 = vadd.f32 %v4373_v14, %v4341_v16  ;;  %v4340_v37 = vadd.f32 %v6884_v6, %v4301_v56  ;;  %4273 = vst.msk [vmem:[#allocation3 + $0x20] sm:$0xff] %vm171_vm1, %v4241_v54  ;;  %3826 = vst.msk [vmem:[#allocation3 + $0x58] sm:$0xff] %vm171_vm1, %v3794_v1  ;;  %v4244_v2 = vadd.f32 %v5584_v62, %v4212_v58  ;;  %v6900_v47 = vpop.f32.mrf.mxu0  ;;  %v3763_v62 = vld [vmem:[#allocation3 + $0x60] sm:$0xff]  ;;  %v3765_v14 = vld [vmem:[#allocation3 + $0x70] sm:$0xff] }
 0x1e1   : > { %v3793_v29 = vadd.f32 %v3761_v20, %v3642_v60  ;;  %v4304_v3 = vld [vmem:[#allocation3 + $0x18] sm:$0xff]  ;;  %v4211_v30 = vld [vmem:[#allocation3 + $0x30] sm:$0xff]  ;;  %v5543_v22 = vpop.f32.mrf.mxu1  ;;  %v3768_v1 = vld [vmem:[#allocation3 + $0x88] sm:$0xff] }
 0x1e2   : > { %v4437_v52 = vmul.f32 0.70710677, %v4405_v11  ;;  %v4404_v31 = vadd.f32 %v4372_v63, %v4340_v37  ;;  %v4343_v24 = vadd.f32 %v6884_v6, %v4304_v3  ;;  %4276 = vst.msk [vmem:[#allocation3 + $0x38] sm:$0xff] %vm171_vm1, %v4244_v2  ;;  %v4243_v36 = vadd.f32 %v4211_v30, %v4076_v50  ;;  %v6913_v18 = vpop.f32.mrf.mxu0  ;;  %v4378_v60 = vld [vmem:[%s5745_s24 + $0x30] sm:$0xff]  ;;  %v3767_v37 = vld [vmem:[#allocation3 + $0x80] sm:$0xff] }
 0x1e3   : > { %3825 = vst.msk [vmem:[#allocation3 + $0x50] sm:$0xff] %vm171_vm1, %v3793_v29  ;;  %v4303_v38 = vld [vmem:[#allocation3 + $0x10] sm:$0xff]  ;;  %v3796_v41 = vadd.f32 %v5543_v22, %v3764_v10  ;;  %v4214_v28 = vld [vmem:[#allocation3 + $0x48] sm:$0xff]  ;;  %v3652_v39 = vpop.f32.mrf.mxu1 }
 0x1e4   : > { %4469 = vst.msk [vmem:[%s6907_s16 + $0x8] sm:$0xff] %vm171_vm1, %v4437_v52  ;;  %v4436_v42 = vmul.f32 0.70710677, %v4404_v31  ;;  %v4407_v19 = vadd.f32 %v4375_v17, %v4343_v24  ;;  %v4342_v21 = vadd.f32 %v6884_v6, %v4303_v38  ;;  %4275 = vst.msk [vmem:[#allocation3 + $0x30] sm:$0xff] %vm171_vm1, %v4243_v36  ;;  %v4246_v40 = vadd.f32 %v6875_v53, %v4214_v28  ;;  %v6921_v34 = vpop.f32.mrf.mxu0  ;;  %v4381_v52 = vld [vmem:[%s5745_s24 + $0x48] sm:$0xff]  ;;  %v3770_v36 = vld [vmem:[#allocation3 + $0x98] sm:$0xff] }
 0x1e5   : > { %v4306_v9 = vld [vmem:[#allocation3 + $0x28] sm:$0xff]  ;;  %3828 = vst.msk [vmem:[#allocation3 + $0x68] sm:$0xff] %vm171_vm1, %v3796_v41  ;;  %v3795_v33 = vadd.f32 %v3763_v62, %v3652_v39  ;;  %v4213_v23 = vld [vmem:[#allocation3 + $0x40] sm:$0xff]  ;;  %v5546_v50 = vpop.f32.mrf.mxu1 }
 0x1e6   : > { %4468 = vst.msk [vmem:[%s6907_s16] sm:$0xff] %vm171_vm1, %v4436_v42  ;;  %v4439_v43 = vmul.f32 0.70710677, %v4407_v19  ;;  %v4406_v25 = vadd.f32 %v4374_v26, %v4342_v21  ;;  %v4345_v46 = vadd.f32 %v6884_v6, %v4306_v9  ;;  %4278 = vst.msk [vmem:[#allocation3 + $0x48] sm:$0xff] %vm171_vm1, %v4246_v40  ;;  %v4245_v49 = vadd.f32 %v4213_v23, %v6879_v51  ;;  %v6930_v53 = vpop.f32.mrf.mxu0  ;;  %v4380_v19 = vld [vmem:[%s5745_s24 + $0x40] sm:$0xff]  ;;  %v3769_v40 = vld [vmem:[#allocation3 + $0x90] sm:$0xff] }
 0x1e7   : > { %v4305_v48 = vld [vmem:[#allocation3 + $0x20] sm:$0xff]  ;;  %3827 = vst.msk [vmem:[#allocation3 + $0x60] sm:$0xff] %vm171_vm1, %v3795_v33  ;;  %v3798_v5 = vadd.f32 %v5546_v50, %v3766_v0  ;;  %v4216_v27 = vld [vmem:[#allocation3 + $0x58] sm:$0xff]  ;;  %v3662_v55 = vpop.f32.mrf.mxu1 }
 0x1e8   : > { %4471 = vst.msk [vmem:[%s6907_s16 + $0x18] sm:$0xff] %vm171_vm1, %v4439_v43  ;;  %v4438_v7 = vmul.f32 0.70710677, %v4406_v25  ;;  %v4409_v32 = vadd.f32 %v4377_v44, %v4345_v46  ;;  %v4344_v57 = vadd.f32 %v6884_v6, %v4305_v48  ;;  %4277 = vst.msk [vmem:[#allocation3 + $0x40] sm:$0xff] %vm171_vm1, %v4245_v49  ;;  %v4248_v51 = vadd.f32 %v6889_v8, %v4216_v27  ;;  %v6939_v15 = vpop.f32.mrf.mxu0  ;;  %v4383_v25 = vld [vmem:[%s5745_s24 + $0x58] sm:$0xff]  ;;  %v3772_v49 = vld [vmem:[#allocation3 + $0xa8] sm:$0xff] }
 0x1e9   : > { %v4308_v59 = vld [vmem:[#allocation3 + $0x38] sm:$0xff]  ;;  %3830 = vst.msk [vmem:[#allocation3 + $0x78] sm:$0xff] %vm171_vm1, %v3798_v5  ;;  %v3797_v61 = vadd.f32 %v3765_v14, %v3662_v55  ;;  %v5549_v13 = vpop.f32.mrf.mxu1 }
 0x1ea   : > { %v4215_v35 = vld [vmem:[#allocation3 + $0x50] sm:$0xff]  ;;  %4470 = vst.msk [vmem:[%s6907_s16 + $0x10] sm:$0xff] %vm171_vm1, %v4438_v7  ;;  %v4441_v16 = vmul.f32 0.70710677, %v4409_v32  ;;  %v4408_v63 = vadd.f32 %v4376_v4, %v4344_v57  ;;  %v4347_v54 = vadd.f32 %v6884_v6, %v4308_v59  ;;  %4280 = vst.msk [vmem:[#allocation3 + $0x58] sm:$0xff] %vm171_vm1, %v4248_v51  ;;  %v6948_v56 = vpop.f32.mrf.mxu0  ;;  %v3800_v20 = vadd.f32 %v5549_v13, %v3768_v1  ;;  %v3771_v51 = vld [vmem:[#allocation3 + $0xa0] sm:$0xff] }
 0x1eb   : > { %v4247_v8 = vadd.f32 %v4215_v35, %v6895_v45  ;;  %v4307_v58 = vld [vmem:[#allocation3 + $0x30] sm:$0xff]  ;;  %3829 = vst.msk [vmem:[#allocation3 + $0x70] sm:$0xff] %vm171_vm1, %v3797_v61  ;;  %v3672_v11 = vpop.f32.mrf.mxu1 }
 0x1ec   : > { %4473 = vst.msk [vmem:[%s6907_s16 + $0x28] sm:$0xff] %vm171_vm1, %v4441_v16  ;;  %v4440_v2 = vmul.f32 0.70710677, %v4408_v63  ;;  %v4411_v29 = vadd.f32 %v4379_v12, %v4347_v54  ;;  %v4346_v3 = vadd.f32 %v6884_v6, %v4307_v58  ;;  %v4218_v45 = vld [vmem:[#allocation3 + $0x68] sm:$0xff]  ;;  %v3799_v17 = vadd.f32 %v3767_v37, %v3672_v11  ;;  %v6956_v30 = vpop.f32.mrf.mxu0  ;;  %3832 = vst.msk [vmem:[#allocation3 + $0x88] sm:$0xff] %vm171_vm1, %v3800_v20  ;;  %v4382_v32 = vld [vmem:[%s5745_s24 + $0x50] sm:$0xff] }
 0x1ed   : > { %4279 = vst.msk [vmem:[#allocation3 + $0x50] sm:$0xff] %vm171_vm1, %v4247_v8  ;;  %v4310_v22 = vld [vmem:[#allocation3 + $0x48] sm:$0xff]  ;;  %v4250_v31 = vadd.f32 %v6900_v47, %v4218_v45  ;;  %v5552_v24 = vpop.f32.mrf.mxu1  ;;  %v3774_v54 = vld [vmem:[#allocation3 + $0xb8] sm:$0xff] }
 0x1ee   : > { %4472 = vst.msk [vmem:[%s6907_s16 + $0x20] sm:$0xff] %vm171_vm1, %v4440_v2  ;;  %v4443_v10 = vmul.f32 0.70710677, %v4411_v29  ;;  %v4410_v38 = vadd.f32 %v4378_v60, %v4346_v3  ;;  %v4349_v26 = vadd.f32 %v6884_v6, %v4310_v22  ;;  %3831 = vst.msk [vmem:[#allocation3 + $0x80] sm:$0xff] %vm171_vm1, %v3799_v17  ;;  %v4217_v41 = vld [vmem:[#allocation3 + $0x60] sm:$0xff]  ;;  %v3802_v28 = vadd.f32 %v5552_v24, %v3770_v36  ;;  %v6965_v39 = vpop.f32.mrf.mxu0  ;;  %v4385_v60 = vld [vmem:[%s5745_s24 + $0x68] sm:$0xff] }
 0x1ef   : > { %v4309_v42 = vld [vmem:[#allocation3 + $0x40] sm:$0xff]  ;;  %4282 = vst.msk [vmem:[#allocation3 + $0x68] sm:$0xff] %vm171_vm1, %v4250_v31  ;;  %v4249_v47 = vadd.f32 %v4217_v41, %v6913_v18  ;;  %v3682_v21 = vpop.f32.mrf.mxu1  ;;  %v3773_v3 = vld [vmem:[#allocation3 + $0xb0] sm:$0xff] }
 0x1f0   : > { %4475 = vst.msk [vmem:[%s6907_s16 + $0x38] sm:$0xff] %vm171_vm1, %v4443_v10  ;;  %v4442_v62 = vmul.f32 0.70710677, %v4410_v38  ;;  %v4413_v9 = vadd.f32 %v4381_v52, %v4349_v26  ;;  %v4348_v44 = vadd.f32 %v6884_v6, %v4309_v42  ;;  %3834 = vst.msk [vmem:[#allocation3 + $0x98] sm:$0xff] %vm171_vm1, %v3802_v28  ;;  %v4220_v33 = vld [vmem:[#allocation3 + $0x78] sm:$0xff]  ;;  %v3801_v23 = vadd.f32 %v3769_v40, %v3682_v21  ;;  %v6974_v50 = vpop.f32.mrf.mxu0  ;;  %v4384_v22 = vld [vmem:[%s5745_s24 + $0x60] sm:$0xff] }
 0x1f1   : > { %v4312_v43 = vld [vmem:[#allocation3 + $0x58] sm:$0xff]  ;;  %4281 = vst.msk [vmem:[#allocation3 + $0x60] sm:$0xff] %vm171_vm1, %v4249_v47  ;;  %v4252_v18 = vadd.f32 %v6921_v34, %v4220_v33  ;;  %v5555_v46 = vpop.f32.mrf.mxu1  ;;  %v3776_v26 = vld [vmem:[#allocation3 + $0xc8] sm:$0xff] }
 0x1f2   : > { %4474 = vst.msk [vmem:[%s6907_s16 + $0x30] sm:$0xff] %vm171_vm1, %v4442_v62  ;;  %v4445_v0 = vmul.f32 0.70710677, %v4413_v9  ;;  %v4412_v48 = vadd.f32 %v4380_v19, %v4348_v44  ;;  %v4351_v4 = vadd.f32 %v6884_v6, %v4312_v43  ;;  %3833 = vst.msk [vmem:[#allocation3 + $0x90] sm:$0xff] %vm171_vm1, %v3801_v23  ;;  %v4219_v5 = vld [vmem:[#allocation3 + $0x70] sm:$0xff]  ;;  %v3804_v27 = vadd.f32 %v5555_v46, %v3772_v49  ;;  %v6983_v55 = vpop.f32.mrf.mxu0  ;;  %v4387_v28 = vld [vmem:[%s5745_s24 + $0x78] sm:$0xff] }
 0x1f3   : > { %4284 = vst.msk [vmem:[#allocation3 + $0x78] sm:$0xff] %vm171_vm1, %v4252_v18  ;;  %v4251_v34 = vadd.f32 %v4219_v5, %v6930_v53  ;;  %v3692_v57 = vpop.f32.mrf.mxu1  ;;  %v4222_v61 = vld [vmem:[#allocation3 + $0x88] sm:$0xff]  ;;  %v3775_v44 = vld [vmem:[#allocation3 + $0xc0] sm:$0xff]  ;;  %v4386_v23 = vld [vmem:[%s5745_s24 + $0x70] sm:$0xff] }
 0x1f4   : > { %v4311_v7 = vld [vmem:[#allocation3 + $0x50] sm:$0xff]  ;;  %4477 = vst.msk [vmem:[%s6907_s16 + $0x48] sm:$0xff] %vm171_vm1, %v4445_v0  ;;  %v4444_v14 = vmul.f32 0.70710677, %v4412_v48  ;;  %v4415_v59 = vadd.f32 %v4383_v25, %v4351_v4  ;;  %3836 = vst.msk [vmem:[#allocation3 + $0xa8] sm:$0xff] %vm171_vm1, %v3804_v27  ;;  %v3803_v35 = vadd.f32 %v3771_v51, %v3692_v57  ;;  %v6992_v13 = vpop.f32.mrf.mxu0  ;;  %v4254_v53 = vadd.f32 %v6939_v15, %v4222_v61  ;;  %v3778_v48 = vld [vmem:[#allocation3 + $0xd8] sm:$0xff] }
 0x1f5   : > { %v4350_v12 = vadd.f32 %v6884_v6, %v4311_v7  ;;  %4283 = vst.msk [vmem:[#allocation3 + $0x70] sm:$0xff] %vm171_vm1, %v4251_v34  ;;  %v4221_v16 = vld [vmem:[#allocation3 + $0x80] sm:$0xff]  ;;  %v5558_v63 = vpop.f32.mrf.mxu1  ;;  %v4389_v5 = vld [vmem:[%s5745_s24 + $0x88] sm:$0xff]  ;;  %v3777_v61 = vld [vmem:[#allocation3 + $0xd0] sm:$0xff] }
 0x1f6   : > { %4476 = vst.msk [vmem:[%s6907_s16 + $0x40] sm:$0xff] %vm171_vm1, %v4444_v14  ;;  %v4447_v8 = vmul.f32 0.70710677, %v4415_v59  ;;  %v4314_v58 = vld [vmem:[#allocation3 + $0x68] sm:$0xff]  ;;  %3835 = vst.msk [vmem:[#allocation3 + $0xa0] sm:$0xff] %vm171_vm1, %v3803_v35  ;;  %v4253_v20 = vadd.f32 %v4221_v16, %v6948_v56  ;;  %v3806_v11 = vadd.f32 %v5558_v63, %v3774_v54  ;;  %v7001_v37 = vpop.f32.mrf.mxu0  ;;  %v4388_v27 = vld [vmem:[%s5745_s24 + $0x80] sm:$0xff] }
 0x1f7   : > { %v4414_v1 = vadd.f32 %v4382_v32, %v4350_v12  ;;  %v4353_v15 = vadd.f32 %v6884_v6, %v4314_v58  ;;  %4286 = vst.msk [vmem:[#allocation3 + $0x88] sm:$0xff] %vm171_vm1, %v4254_v53  ;;  %v4224_v2 = vld [vmem:[#allocation3 + $0x98] sm:$0xff]  ;;  %v3702_v29 = vpop.f32.mrf.mxu1 }
 0x1f8   : > { %4479 = vst.msk [vmem:[%s6907_s16 + $0x58] sm:$0xff] %vm171_vm1, %v4447_v8  ;;  %v4313_v17 = vld [vmem:[#allocation3 + $0x60] sm:$0xff]  ;;  %4285 = vst.msk [vmem:[#allocation3 + $0x80] sm:$0xff] %vm171_vm1, %v4253_v20  ;;  %v4256_v56 = vadd.f32 %v6956_v30, %v4224_v2  ;;  %v3805_v52 = vadd.f32 %v3773_v3, %v3702_v29  ;;  %v7011_v31 = vpop.f32.mrf.mxu0  ;;  %v4391_v53 = vld [vmem:[%s5745_s24 + $0x98] sm:$0xff] }
 0x1f9   : > { %v4446_v45 = vmul.f32 0.70710677, %v4414_v1  ;;  %3838 = vst.msk [vmem:[#allocation3 + $0xb8] sm:$0xff] %vm171_vm1, %v3806_v11  ;;  %v4417_v24 = vadd.f32 %v4385_v60, %v4353_v15  ;;  %v4352_v36 = vadd.f32 %v6884_v6, %v4313_v17  ;;  %v4223_v10 = vld [vmem:[#allocation3 + $0x90] sm:$0xff]  ;;  %v5561_v38 = vpop.f32.mrf.mxu1  ;;  %v3780_v60 = vld [vmem:[#allocation3 + $0xe8] sm:$0xff] }
 0x1fa   : > { %v4316_v41 = vld [vmem:[#allocation3 + $0x78] sm:$0xff]  ;;  %4288 = vst.msk [vmem:[#allocation3 + $0x98] sm:$0xff] %vm171_vm1, %v4256_v56  ;;  %3837 = vst.msk [vmem:[#allocation3 + $0xb0] sm:$0xff] %vm171_vm1, %v3805_v52  ;;  %v4255_v30 = vadd.f32 %v4223_v10, %v6965_v39  ;;  %v3808_v42 = vadd.f32 %v5561_v38, %v3776_v26  ;;  %v7020_v19 = vpop.f32.mrf.mxu0  ;;  %v4393_v38 = vld [vmem:[%s5745_s24 + $0xa8] sm:$0xff] }
 0x1fb   : > { %4478 = vst.msk [vmem:[%s6907_s16 + $0x50] sm:$0xff] %vm171_vm1, %v4446_v45  ;;  %v4449_v47 = vmul.f32 0.70710677, %v4417_v24  ;;  %v4416_v21 = vadd.f32 %v4384_v22, %v4352_v36  ;;  %v4355_v40 = vadd.f32 %v6884_v6, %v4316_v41  ;;  %v4226_v62 = vld [vmem:[#allocation3 + $0xa8] sm:$0xff]  ;;  %v3712_v9 = vpop.f32.mrf.mxu1  ;;  %v4390_v45 = vld [vmem:[%s5745_s24 + $0x90] sm:$0xff]  ;;  %v3779_v36 = vld [vmem:[#allocation3 + $0xe0] sm:$0xff] }
 0x1fc   : > { %v4315_v33 = vld [vmem:[#allocation3 + $0x70] sm:$0xff]  ;;  %4287 = vst.msk [vmem:[#allocation3 + $0x90] sm:$0xff] %vm171_vm1, %v4255_v30  ;;  %3840 = vst.msk [vmem:[#allocation3 + $0xc8] sm:$0xff] %vm171_vm1, %v3808_v42  ;;  %v4258_v39 = vadd.f32 %v6974_v50, %v4226_v62  ;;  %v3807_v43 = vadd.f32 %v3775_v44, %v3712_v9  ;;  %v7035_v32 = vpop.f32.mrf.mxu0  ;;  %v4392_v9 = vld [vmem:[%s5745_s24 + $0xa0] sm:$0xff] }
 0x1fd   : > { %4481 = vst.msk [vmem:[%s6907_s16 + $0x68] sm:$0xff] %vm171_vm1, %v4449_v47  ;;  %v4448_v25 = vmul.f32 0.70710677, %v4416_v21  ;;  %v4419_v18 = vadd.f32 %v4387_v28, %v4355_v40  ;;  %v4354_v46 = vadd.f32 %v6884_v6, %v4315_v33  ;;  %v4225_v49 = vld [vmem:[#allocation3 + $0xa0] sm:$0xff]  ;;  %v5564_v0 = vpop.f32.mrf.mxu1  ;;  %v3782_v21 = vld [vmem:[#allocation3 + $0xf8] sm:$0xff] }
 0x1fe   : > { %v4318_v4 = vld [vmem:[#allocation3 + $0x88] sm:$0xff]  ;;  %4290 = vst.msk [vmem:[#allocation3 + $0xa8] sm:$0xff] %vm171_vm1, %v4258_v39  ;;  %3839 = vst.msk [vmem:[#allocation3 + $0xc0] sm:$0xff] %vm171_vm1, %v3807_v43  ;;  %v4257_v50 = vadd.f32 %v4225_v49, %v6983_v55  ;;  %v3810_v7 = vadd.f32 %v5564_v0, %v3778_v48  ;;  %v4176_v2 = vpop.f32.mrf.mxu0  ;;  %v4395_v49 = vld [vmem:[%s5745_s24 + $0xb8] sm:$0xff] }
 0x1ff   : > { %4480 = vst.msk [vmem:[%s6907_s16 + $0x60] sm:$0xff] %vm171_vm1, %v4448_v25  ;;  %v4451_v34 = vmul.f32 0.70710677, %v4419_v18  ;;  %v4418_v57 = vadd.f32 %v4386_v23, %v4354_v46  ;;  %v4357_v51 = vadd.f32 %v6884_v6, %v4318_v4  ;;  %v4317_v14 = vld [vmem:[#allocation3 + $0x80] sm:$0xff]  ;;  %v3722_v12 = vpop.f32.mrf.mxu1  ;;  %v3781_v18 = vld [vmem:[#allocation3 + $0xf0] sm:$0xff] }
 0x200   : > { %v4228_v59 = vld [vmem:[#allocation3 + $0xb8] sm:$0xff]  ;;  %v4356_v35 = vadd.f32 %v6884_v6, %v4317_v14  ;;  %4289 = vst.msk [vmem:[#allocation3 + $0xa0] sm:$0xff] %vm171_vm1, %v4257_v50  ;;  %3842 = vst.msk [vmem:[#allocation3 + $0xd8] sm:$0xff] %vm171_vm1, %v3810_v7  ;;  %v3809_v16 = vadd.f32 %v3777_v61, %v3722_v12  ;;  %v5617_v40 = vpop.f32.mrf.mxu0 }
 0x201   : > { %v4260_v55 = vadd.f32 %v6992_v13, %v4228_v59  ;;  %4483 = vst.msk [vmem:[%s6907_s16 + $0x78] sm:$0xff] %vm171_vm1, %v4451_v34  ;;  %v4450_v63 = vmul.f32 0.70710677, %v4418_v57  ;;  %v4421_v54 = vadd.f32 %v4389_v5, %v4357_v51  ;;  %v4320_v8 = vld [vmem:[#allocation3 + $0x98] sm:$0xff]  ;;  %v4227_v1 = vld [vmem:[#allocation3 + $0xb0] sm:$0xff]  ;;  %v5567_v58 = vpop.f32.mrf.mxu1 }
 0x202   : > { %v4420_v20 = vadd.f32 %v4388_v27, %v4356_v35  ;;  %v4359_v11 = vadd.f32 %v6884_v6, %v4320_v8  ;;  %3841 = vst.msk [vmem:[#allocation3 + $0xd0] sm:$0xff] %vm171_vm1, %v3809_v16  ;;  %v4259_v13 = vadd.f32 %v4227_v1, %v7001_v37  ;;  %v3812_v15 = vadd.f32 %v5567_v58, %v3780_v60  ;;  %v4186_v7 = vpop.f32.mrf.mxu0  ;;  %v4394_v34 = vld [vmem:[%s5745_s24 + $0xb0] sm:$0xff]  ;;  %v4397_v35 = vld [vmem:[%s5745_s24 + $0xc8] sm:$0xff]  ;;  %v4396_v1 = vld [vmem:[%s5745_s24 + $0xc0] sm:$0xff] }
 0x203   : > { %4292 = vst.msk [vmem:[#allocation3 + $0xb8] sm:$0xff] %vm171_vm1, %v4260_v55  ;;  %4482 = vst.msk [vmem:[%s6907_s16 + $0x70] sm:$0xff] %vm171_vm1, %v4450_v63  ;;  %v4453_v29 = vmul.f32 0.70710677, %v4421_v54  ;;  %v4319_v3 = vld [vmem:[#allocation3 + $0x90] sm:$0xff]  ;;  %v4230_v17 = vld [vmem:[#allocation3 + $0xc8] sm:$0xff]  ;;  %v3732_v22 = vpop.f32.mrf.mxu1 }
 0x204   : > { %v4452_v56 = vmul.f32 0.70710677, %v4420_v20  ;;  %v4423_v52 = vadd.f32 %v4391_v53, %v4359_v11  ;;  %v4358_v24 = vadd.f32 %v6884_v6, %v4319_v3  ;;  %4291 = vst.msk [vmem:[#allocation3 + $0xb0] sm:$0xff] %vm171_vm1, %v4259_v13  ;;  %3844 = vst.msk [vmem:[#allocation3 + $0xe8] sm:$0xff] %vm171_vm1, %v3812_v15  ;;  %v4262_v37 = vadd.f32 %v7011_v31, %v4230_v17  ;;  %v5620_v54 = vpop.f32.mrf.mxu0 }
 0x205   : > { %4485 = vst.msk [vmem:[%s6907_s16 + $0x88] sm:$0xff] %vm171_vm1, %v4453_v29  ;;  %v4322_v10 = vld [vmem:[#allocation3 + $0xa8] sm:$0xff]  ;;  %v3811_v26 = vadd.f32 %v3779_v36, %v3732_v22  ;;  %v4229_v41 = vld [vmem:[#allocation3 + $0xc0] sm:$0xff]  ;;  %v5570_v28 = vpop.f32.mrf.mxu1 }
 0x206   : > { %4484 = vst.msk [vmem:[%s6907_s16 + $0x80] sm:$0xff] %vm171_vm1, %v4452_v56  ;;  %v4455_v30 = vmul.f32 0.70710677, %v4423_v52  ;;  %v4422_v42 = vadd.f32 %v4390_v45, %v4358_v24  ;;  %v4361_v47 = vadd.f32 %v6884_v6, %v4322_v10  ;;  %4294 = vst.msk [vmem:[#allocation3 + $0xc8] sm:$0xff] %vm171_vm1, %v4262_v37  ;;  %v4261_v31 = vadd.f32 %v4229_v41, %v7020_v19  ;;  %v4196_v22 = vpop.f32.mrf.mxu0  ;;  %v4398_v24 = vld [vmem:[%s5745_s24 + $0xd0] sm:$0xff]  ;;  %v4401_v41 = vld [vmem:[%s5745_s24 + $0xe8] sm:$0xff] }
 0x207   : > { %v4321_v62 = vld [vmem:[#allocation3 + $0xa0] sm:$0xff]  ;;  %3843 = vst.msk [vmem:[#allocation3 + $0xe0] sm:$0xff] %vm171_vm1, %v3811_v26  ;;  %v3814_v44 = vadd.f32 %v5570_v28, %v3782_v21  ;;  %v4232_v33 = vld [vmem:[#allocation3 + $0xd8] sm:$0xff]  ;;  %v3742_v23 = vpop.f32.mrf.mxu1 }
 0x208   : > { %4487 = vst.msk [vmem:[%s6907_s16 + $0x98] sm:$0xff] %vm171_vm1, %v4455_v30  ;;  %v4454_v39 = vmul.f32 0.70710677, %v4422_v42  ;;  %v4425_v43 = vadd.f32 %v4393_v38, %v4361_v47  ;;  %v4360_v25 = vadd.f32 %v6884_v6, %v4321_v62  ;;  %4293 = vst.msk [vmem:[#allocation3 + $0xc0] sm:$0xff] %vm171_vm1, %v4261_v31  ;;  %v4264_v19 = vadd.f32 %v7035_v32, %v4232_v33  ;;  %v4403_v33 = vld [vmem:[%s5745_s24 + $0xf8] sm:$0xff] }
 0x209   : > { %3846 = vst.msk [vmem:[#allocation3 + $0xf8] sm:$0xff] %vm171_vm1, %v3814_v44  ;;  %v3813_v0 = vadd.f32 %v3781_v18, %v3742_v23  ;;  %v4231_v48 = vld [vmem:[#allocation3 + $0xd0] sm:$0xff] }
 0x20a   : > { %v4324_v46 = vld [vmem:[#allocation3 + $0xb8] sm:$0xff]  ;;  %4486 = vst.msk [vmem:[%s6907_s16 + $0x90] sm:$0xff] %vm171_vm1, %v4454_v39  ;;  %v4457_v4 = vmul.f32 0.70710677, %v4425_v43  ;;  %v4424_v5 = vadd.f32 %v4392_v9, %v4360_v25  ;;  %4296 = vst.msk [vmem:[#allocation3 + $0xd8] sm:$0xff] %vm171_vm1, %v4264_v19  ;;  %v4263_v50 = vadd.f32 %v4231_v48, %v4176_v2  ;;  %v4402_v25 = vld [vmem:[%s5745_s24 + $0xf0] sm:$0xff] }
 0x20b   : > { %v4363_v27 = vadd.f32 %v6884_v6, %v4324_v46  ;;  %v4323_v32 = vld [vmem:[#allocation3 + $0xb0] sm:$0xff]  ;;  %3845 = vst.msk [vmem:[#allocation3 + $0xf0] sm:$0xff] %vm171_vm1, %v3813_v0  ;;  %v4234_v57 = vld [vmem:[#allocation3 + $0xe8] sm:$0xff]  ;;  %v4399_v2 = vld [vmem:[%s5745_s24 + $0xd8] sm:$0xff] }
 0x20c   : > { %4489 = vst.msk [vmem:[%s6907_s16 + $0xa8] sm:$0xff] %vm171_vm1, %v4457_v4  ;;  %v4456_v51 = vmul.f32 0.70710677, %v4424_v5  ;;  %v4362_v59 = vadd.f32 %v6884_v6, %v4323_v32  ;;  %4295 = vst.msk [vmem:[#allocation3 + $0xd0] sm:$0xff] %vm171_vm1, %v4263_v50  ;;  %v4266_v12 = vadd.f32 %v5617_v40, %v4234_v57  ;;  %v4400_v40 = vld [vmem:[%s5745_s24 + $0xe0] sm:$0xff] }
 0x20d   : > { %v4427_v14 = vadd.f32 %v4395_v49, %v4363_v27  ;;  %v4326_v61 = vld [vmem:[#allocation3 + $0xc8] sm:$0xff] }
 0x20e   : > { %4488 = vst.msk [vmem:[%s6907_s16 + $0xa0] sm:$0xff] %vm171_vm1, %v4456_v51  ;;  %v4426_v55 = vadd.f32 %v4394_v34, %v4362_v59  ;;  %v4365_v16 = vadd.f32 %v6884_v6, %v4326_v61  ;;  %4298 = vst.msk [vmem:[#allocation3 + $0xe8] sm:$0xff] %vm171_vm1, %v4266_v12  ;;  %v4233_v63 = vld [vmem:[#allocation3 + $0xe0] sm:$0xff] }
 0x20f   : > { %v4459_v53 = vmul.f32 0.70710677, %v4427_v14  ;;  %v4325_v8 = vld [vmem:[#allocation3 + $0xc0] sm:$0xff]  ;;  %v4265_v58 = vadd.f32 %v4233_v63, %v4186_v7 }
 0x210   : > { %v4458_v60 = vmul.f32 0.70710677, %v4426_v55  ;;  %v4429_v20 = vadd.f32 %v4397_v35, %v4365_v16  ;;  %v4364_v11 = vadd.f32 %v6884_v6, %v4325_v8  ;;  %v4236_v13 = vld [vmem:[#allocation3 + $0xf8] sm:$0xff] }
 0x211   : > { %4491 = vst.msk [vmem:[%s6907_s16 + $0xb8] sm:$0xff] %vm171_vm1, %v4459_v53  ;;  %v4328_v15 = vld [vmem:[#allocation3 + $0xd8] sm:$0xff]  ;;  %4297 = vst.msk [vmem:[#allocation3 + $0xe0] sm:$0xff] %vm171_vm1, %v4265_v58  ;;  %v4268_v29 = vadd.f32 %v5620_v54, %v4236_v13 }
 0x212   : > { %4490 = vst.msk [vmem:[%s6907_s16 + $0xb0] sm:$0xff] %vm171_vm1, %v4458_v60  ;;  %v4461_v3 = vmul.f32 0.70710677, %v4429_v20  ;;  %v4428_v45 = vadd.f32 %v4396_v1, %v4364_v11  ;;  %v4367_v17 = vadd.f32 %v6884_v6, %v4328_v15  ;;  %v4235_v56 = vld [vmem:[#allocation3 + $0xf0] sm:$0xff] }
 0x213   : > { %v4327_v52 = vld [vmem:[#allocation3 + $0xd0] sm:$0xff]  ;;  %4300 = vst.msk [vmem:[#allocation3 + $0xf8] sm:$0xff] %vm171_vm1, %v4268_v29  ;;  %v4267_v37 = vadd.f32 %v4235_v56, %v4196_v22 }
 0x214   : > { %4493 = vst.msk [vmem:[%s6907_s16 + $0xc8] sm:$0xff] %vm171_vm1, %v4461_v3  ;;  %v4460_v36 = vmul.f32 0.70710677, %v4428_v45  ;;  %v4431_v10 = vadd.f32 %v4399_v2, %v4367_v17  ;;  %v4366_v38 = vadd.f32 %v6884_v6, %v4327_v52 }
 0x215   : > { %v4330_v26 = vld [vmem:[#allocation3 + $0xe8] sm:$0xff]  ;;  %4299 = vst.msk [vmem:[#allocation3 + $0xf0] sm:$0xff] %vm171_vm1, %v4267_v37 }
 0x216   : > { %4492 = vst.msk [vmem:[%s6907_s16 + $0xc0] sm:$0xff] %vm171_vm1, %v4460_v36  ;;  %v4463_v28 = vmul.f32 0.70710677, %v4431_v10  ;;  %v4430_v30 = vadd.f32 %v4398_v24, %v4366_v38  ;;  %v4369_v42 = vadd.f32 %v6884_v6, %v4330_v26 }
 0x218   : > { %4495 = vst.msk [vmem:[%s6907_s16 + $0xd8] sm:$0xff] %vm171_vm1, %v4463_v28  ;;  %v4462_v47 = vmul.f32 0.70710677, %v4430_v30  ;;  %v4433_v31 = vadd.f32 %v4401_v41, %v4369_v42  ;;  %v4329_v21 = vld [vmem:[#allocation3 + $0xe0] sm:$0xff] }
 0x219   : > { %v4368_v62 = vadd.f32 %v6884_v6, %v4329_v21 }
 0x21a   : > { %4494 = vst.msk [vmem:[%s6907_s16 + $0xd0] sm:$0xff] %vm171_vm1, %v4462_v47  ;;  %v4465_v9 = vmul.f32 0.70710677, %v4433_v31  ;;  %v4332_v44 = vld [vmem:[#allocation3 + $0xf8] sm:$0xff] }
 0x21b   : > { %v4432_v23 = vadd.f32 %v4400_v40, %v4368_v62  ;;  %v4371_v39 = vadd.f32 %v6884_v6, %v4332_v44 }
 0x21c   : > { %4497 = vst.msk [vmem:[%s6907_s16 + $0xe8] sm:$0xff] %vm171_vm1, %v4465_v9  ;;  %v4331_v43 = vld [vmem:[#allocation3 + $0xf0] sm:$0xff] }
 0x21d   : > { %v4464_v19 = vmul.f32 0.70710677, %v4432_v23  ;;  %v4435_v18 = vadd.f32 %v4403_v33, %v4371_v39  ;;  %v4370_v46 = vadd.f32 %v6884_v6, %v4331_v43 }
 0x21f   : > { %4496 = vst.msk [vmem:[%s6907_s16 + $0xe0] sm:$0xff] %vm171_vm1, %v4464_v19  ;;  %v4467_v49 = vmul.f32 0.70710677, %v4435_v18  ;;  %v4434_v0 = vadd.f32 %v4402_v25, %v4370_v46 }
 0x221   : > { %4499 = vst.msk [vmem:[%s6907_s16 + $0xf8] sm:$0xff] %vm171_vm1, %v4467_v49  ;;  %v4466_v48 = vmul.f32 0.70710677, %v4434_v0 }
 0x223   : > { %4498 = vst.msk [vmem:[%s6907_s16 + $0xf0] sm:$0xff] %vm171_vm1, %v4466_v48 }
 0x224 PF: > { %s13_s12 = sadd.s32 1, %s5638_s12  }
 0x225   : > { %p10_p4 = scmp.ge.s32.totalorder %s13_s12, 4  }
 0x227   :  { %12 = sbr.rel (!%p10_p4) target bundleno = 1 (0x1), region = 73 }

</bundles_post_ra>
